<compile_context>
chip_gen: v5e
topology: v5e:2x2
jax: 0.10.0
libtpu: 0.0.40
codegen_flags: <defaults>
</compile_context>

<pallas_src>
import functools
import math

import jax
import jax.numpy as jnp
from jax import lax
from jax.experimental import pallas as pl
from jax.experimental.pallas import tpu as pltpu


def _round_up(x, m):
    return ((x + m - 1) // m) * m


def _vmem_capacity_bytes():
    try:
        return int(pltpu.get_tpu_info().vmem_capacity_bytes)
    except Exception:
        return 64 * 1024 * 1024          # conservative (v7x per-TensorCore)


# ----------------------------- Pallas kernel -------------------------------- #
def _conv_gelu_kernel(x_ref, xh_ref, w_ref, b_ref, o_ref, xcat_ref, *,
                      kh, kw, wp8, approx_gelu):
    """Fused shift-and-matmul conv + bias + GELU for one flattened row strip.

    x_ref   : (1, 1, TM, C)     main strip of the flattened padded NHWC image
    xh_ref  : (1, 1, HALO, C)   small halo (rows just below the strip)
    w_ref   : (kh, kw*C, Op)    conv weights, out-channels zero-padded to Op
    b_ref   : (1, Op)           bias (f32, zero-padded)
    o_ref   : (1, 1, TM, Op)    output strip (lane-dense)
    xcat_ref: (TM + HALO, C)    VMEM scratch: strip + halo, contiguous
    """
    tm = x_ref.shape[2]
    halo = xh_ref.shape[2]

    # One copy of the strip + small halo into a contiguous scratch (replaces
    # the old full 2*TM concatenate).
    xcat_ref[pl.ds(0, tm), :] = x_ref[0, 0]
    xcat_ref[pl.ds(tm, halo), :] = xh_ref[0, 0]

    # Column-expanded slab: xc[r, j*C + c] = xcat[r + j, c].  Built once per
    # grid step; folds the kw column taps into the matmul contraction.
    lr = tm + (kh - 1) * wp8
    if kw == 1:
        xc = xcat_ref[pl.ds(0, lr), :]
    else:
        xc = jnp.concatenate(
            [xcat_ref[pl.ds(j, lr), :] for j in range(kw)], axis=-1)

    # kh matmuls with sublane-aligned (i * wp8) shifts; only dots feed the
    # accumulator so the MXU result buffer can accumulate in place (v7x MRB).
    acc = jnp.dot(xc[0:tm, :], w_ref[0], preferred_element_type=jnp.float32)
    for i in range(1, kh):
        s = i * wp8                              # static, multiple of 8
        acc = acc + jnp.dot(xc[s:s + tm, :], w_ref[i],
                            preferred_element_type=jnp.float32)

    acc = acc + b_ref[...]                       # (1, Op) broadcast
    if approx_gelu:
        y = jax.nn.gelu(acc, approximate=True)   # tanh -> EUP slot
    else:
        # Exact GELU (PyTorch nn.GELU default): 0.5*x*(1+erf(x/sqrt(2))).
        y = 0.5 * acc * (1.0 + lax.erf(acc * (1.0 / math.sqrt(2.0))))
    o_ref[0, 0] = y.astype(o_ref.dtype)


# ------------------------------ VMEM budgeting ------------------------------- #
def _vmem_estimate(tm, halo_r, c, op, kh, kw, wp8, in_isz, out_isz):
    lr = tm + (kh - 1) * wp8
    return (2 * tm * c * in_isz            # main strip (double-buffered)
            + 2 * halo_r * c * in_isz      # halo strip (double-buffered)
            + 2 * tm * op * out_isz        # output strip (double-buffered)
            + kh * kw * c * op * in_isz    # resident weights
            + op * 4                       # bias
            + (tm + halo_r) * c * in_isz   # contiguous input scratch
            + lr * kw * c * in_isz         # column-expanded slab
            + 3 * tm * op * 4)             # f32 accumulator + epilogue temps


# ------------------------------- NHWC wrapper -------------------------------- #
def basic_conv_gelu_nhwc(x, weight, bias, *, stride=1,
                         compute_dtype=jnp.float32, out_dtype=None,
                         approx_gelu=False, target_rows=1024):
    """x: (N, H, W, C) NHWC; weight: (O, C, kh, kw) PyTorch layout; bias: (O,).
    Returns GELU(conv2d(x, padding=k//2, stride) + bias) as NHWC."""
    N, H, W, C = x.shape
    O, Cw, kh, kw = weight.shape
    assert C == Cw
    p = kh // 2                              # BasicConv: padding = k // 2
    s = int(stride)
    out_dtype = x.dtype if out_dtype is None else out_dtype

    Ho1 = H + 2 * p - kh + 1                 # dense (stride-1) output size
    Wo1 = W + 2 * p - kw + 1
    Wp = W + 2 * p
    Wp8 = _round_up(Wp, 8)                   # sublane-aligned row pitch
    Op = _round_up(O, 128)                   # lane-dense output blocks

    halo = (kh - 1) * Wp8 + (kw - 1)         # extra rows needed below a strip
    halo_r = _round_up(max(halo, 8), 8)

    in_isz = jnp.dtype(compute_dtype).itemsize
    out_isz = jnp.dtype(out_dtype).itemsize

    # --- tile-size / vmem_limit budgeting (per TPU generation) ---
    cap = _vmem_capacity_bytes()
    budget = int(0.45 * cap)
    th_min = max(kh, -(-halo_r // Wp8))      # halo must fit inside one strip
    th = max(th_min, min(Ho1, -(-target_rows // Wp8)))
    while th > th_min and _vmem_estimate(th * Wp8, halo_r, C, Op, kh, kw, Wp8,
                                         in_isz, out_isz) > budget:
        th -= 1
    tm = th * Wp8
    nhb = -(-Ho1 // th)
    est = _vmem_estimate(tm, halo_r, C, Op, kh, kw, Wp8, in_isz, out_isz)
    vmem_limit = int(min(int(0.9 * cap), max(16 * 1024 * 1024, 2 * est)))

    # --- single layout/pad pass; flatten (h, w) with row pitch Wp8 ---
    L = nhb * tm + halo_r                    # flat rows the kernel touches
    rows = -(-L // Wp8)                      # padded-image spatial rows needed
    bot = max(p, rows - H - p)
    x_pad = jnp.pad(x, ((0, 0), (p, bot), (p, Wp8 - W - p), (0, 0)))
    x_flat = x_pad.reshape(N, (H + p + bot) * Wp8, C).astype(compute_dtype)

    x_blocks = x_flat[:, :nhb * tm, :].reshape(N, nhb, tm, C)
    last_halo = x_flat[:, nhb * tm:nhb * tm + halo_r, :][:, None]
    if nhb > 1:
        x_halo = jnp.concatenate([x_blocks[:, 1:, :halo_r, :], last_halo],
                                 axis=1)
    else:
        x_halo = last_halo                   # (N, nhb, halo_r, C)

    # Weights -> (kh, kw*C, Op) with zero-padded O tail; bias -> (1, Op) f32.
    w3 = jnp.transpose(weight, (2, 3, 1, 0))            # (kh, kw, C, O)
    w3 = jnp.pad(w3, ((0, 0), (0, 0), (0, 0), (0, Op - O)))
    w3 = w3.reshape(kh, kw * C, Op).astype(compute_dtype)
    b2 = jnp.pad(bias.astype(jnp.float32), (0, Op - O)).reshape(1, Op)

    kernel = functools.partial(_conv_gelu_kernel, kh=kh, kw=kw, wp8=Wp8,
                               approx_gelu=approx_gelu)

    out = pl.pallas_call(
        kernel,
        out_shape=jax.ShapeDtypeStruct((N, nhb, tm, Op), out_dtype),
        grid_spec=pltpu.PrefetchScalarGridSpec(
            num_scalar_prefetch=0,
            grid=(N, nhb),
            in_specs=[
                pl.BlockSpec((1, 1, tm, C), lambda n, hb: (n, hb, 0, 0)),
                pl.BlockSpec((1, 1, halo_r, C), lambda n, hb: (n, hb, 0, 0)),
                pl.BlockSpec((kh, kw * C, Op), lambda n, hb: (0, 0, 0)),
                pl.BlockSpec((1, Op), lambda n, hb: (0, 0)),
            ],
            out_specs=pl.BlockSpec((1, 1, tm, Op),
                                   lambda n, hb: (n, hb, 0, 0)),
            scratch_shapes=[pltpu.VMEM((tm + halo_r, C), compute_dtype)],
        ),
        compiler_params=pltpu.CompilerParams(
            dimension_semantics=("parallel", "parallel"),
            vmem_limit_bytes=vmem_limit,
        ),
    )(x_blocks, x_halo, w3, b2)

    # Unflatten; drop garbage rows/columns and the O padding.
    y = out.reshape(N, nhb * th, Wp8, Op)[:, :Ho1, :Wo1, :O]
    if s > 1:
        # Same padding => stride-s conv equals the stride-1 conv subsampled.
        # TODO(synk): fused strided store to avoid the 1/s^2 extra work.
        y = y[:, ::s, ::s, :]
    return y


def basic_conv_gelu_nchw(x, weight, bias, *, stride=1,
                         compute_dtype=jnp.float32, out_dtype=None,
                         approx_gelu=False):
    """NCHW in / NCHW out; single layout conversion at the boundary."""
    x_nhwc = jnp.transpose(x, (0, 2, 3, 1))
    y = basic_conv_gelu_nhwc(x_nhwc, weight, bias, stride=stride,
                             compute_dtype=compute_dtype, out_dtype=out_dtype,
                             approx_gelu=approx_gelu)
    return jnp.transpose(y, (0, 3, 1, 2))


# --------------------------------- module ----------------------------------- #
class BasicConvPallas:
    """Pallas equivalent of BasicConv(in, out, k, stride, bias=True, norm=False,
    relu=True, transpose=False): y = GELU(Conv2d(x) + b).  NCHW in/out."""
    # TODO(synk): transpose=True (ConvTranspose2d) and norm=True (BatchNorm2d)
    # branches are not exercised by the default constructor args and are omitted.

    def __init__(self, in_channel, out_channel, kernel_size, stride, key,
                 compute_dtype=jnp.float32, approx_gelu=False):
        self.in_channel = in_channel
        self.out_channel = out_channel
        self.kernel_size = kernel_size
        self.stride = stride

        kw_key, kb_key = jax.random.split(key)
        fan_in = in_channel * kernel_size * kernel_size
        bound = 1.0 / math.sqrt(fan_in)
        # PyTorch Conv2d weight layout: (O, C, KH, KW); deterministic init.
        self.weight = jax.random.uniform(
            kw_key, (out_channel, in_channel, kernel_size, kernel_size),
            minval=-bound, maxval=bound, dtype=jnp.float32)
        self.bias = jax.random.uniform(
            kb_key, (out_channel,), minval=-bound, maxval=bound,
            dtype=jnp.float32)

        self._fn = jax.jit(functools.partial(
            basic_conv_gelu_nchw, stride=stride, compute_dtype=compute_dtype,
            approx_gelu=approx_gelu))

    def __call__(self, x):
        return self._fn(x, self.weight, self.bias)


# --------------------------------- reference --------------------------------- #
def _reference(x, weight, bias, stride, padding):
    y = lax.conv_general_dilated(
        x, weight, window_strides=(stride, stride),
        padding=((padding, padding), (padding, padding)),
        dimension_numbers=("NCHW", "OIHW", "NCHW"))
    y = y + bias.reshape(1, -1, 1, 1)
    return jax.nn.gelu(y, approximate=False)


if __name__ == "__main__":
    key = jax.random.PRNGKey(0)
    k_x, k_mod = jax.random.split(key)

    in_channel, out_channel, kernel_size = 4, 8, 3
    x = jax.random.normal(k_x, (2, in_channel, 16, 16), dtype=jnp.float32)

    # stride = 1 (the default BasicConv usage)
    mod = BasicConvPallas(in_channel, out_channel, kernel_size, 1, k_mod)
    y = jax.block_until_ready(mod(x))
    y_ref = _reference(x, mod.weight, mod.bias, 1, kernel_size // 2)
    assert y.shape == y_ref.shape, (y.shape, y_ref.shape)
    assert jnp.allclose(y, y_ref, atol=1e-4, rtol=1e-4), float(
        jnp.max(jnp.abs(y - y_ref)))

    # stride = 2 (subsampled fused conv path)
    mod2 = BasicConvPallas(in_channel, out_channel, kernel_size, 2, k_mod)
    y2 = jax.block_until_ready(mod2(x))
    y2_ref = _reference(x, mod2.weight, mod2.bias, 2, kernel_size // 2)
    assert y2.shape == y2_ref.shape, (y2.shape, y2_ref.shape)
    assert jnp.allclose(y2, y2_ref, atol=1e-4, rtol=1e-4), float(
        jnp.max(jnp.abs(y2 - y2_ref)))

    print("KERNEL_OK")
</pallas_src>

<mosaic_0001>
module attributes {stable_mosaic.version = 11 : i64} {
  func.func @_conv_gelu_kernel(%arg0: i32, %arg1: i32, %arg2: memref<1x1x384x4xf32, #tpu.memory_space<vmem>>, %arg3: memref<1x1x56x4xf32, #tpu.memory_space<vmem>>, %arg4: memref<3x12x128xf32, #tpu.memory_space<vmem>>, %arg5: memref<1x128xf32, #tpu.memory_space<vmem>>, %arg6: memref<1x1x384x128xf32, #tpu.memory_space<vmem>>, %arg7: memref<440x4xf32, #tpu.memory_space<vmem>>) attributes {dimension_semantics = [#tpu.dimension_semantics<parallel>, #tpu.dimension_semantics<parallel>], iteration_bounds = array<i64: 2, 1>, scalar_prefetch = 0 : i64, scratch_operands = 1 : i64, tpu.core_type = #tpu.core_type<tc>, window_params = [{transform_indices = @transform_0, window_bounds = array<i64: 1, 1, 384, 4>}, {transform_indices = @transform_1, window_bounds = array<i64: 1, 1, 56, 4>}, {pipeline_mode = #tpu.pipeline_mode<synchronous>, transform_indices = @transform_2, window_bounds = array<i64: 3, 12, 128>}, {pipeline_mode = #tpu.pipeline_mode<synchronous>, transform_indices = @transform_3, window_bounds = array<i64: 1, 128>}, {transform_indices = @transform_4, window_bounds = array<i64: 1, 1, 384, 128>}]} {
    %c0 = arith.constant 0 : index
    %c0_0 = arith.constant 0 : index
    %c0_1 = arith.constant 0 : index
    %c0_2 = arith.constant 0 : index
    %0 = vector.load %arg2[%c0, %c0_0, %c0_1, %c0_2] : memref<1x1x384x4xf32, #tpu.memory_space<vmem>>, vector<1x1x384x4xf32>
    %1 = vector.shape_cast %0 : vector<1x1x384x4xf32> to vector<384x4xf32>
    %c0_3 = arith.constant 0 : index
    %c0_4 = arith.constant 0 : index
    %2 = vector.load %arg7[%c0_3, %c0_4] : memref<440x4xf32, #tpu.memory_space<vmem>>, vector<384x4xf32>
    tpu.vector_store %arg7[%c0_3, %c0_4], %1 {strides = array<i32>} : memref<440x4xf32, #tpu.memory_space<vmem>>, vector<384x4xf32>,
    %c0_5 = arith.constant 0 : index
    %c0_6 = arith.constant 0 : index
    %c0_7 = arith.constant 0 : index
    %c0_8 = arith.constant 0 : index
    %3 = vector.load %arg3[%c0_5, %c0_6, %c0_7, %c0_8] : memref<1x1x56x4xf32, #tpu.memory_space<vmem>>, vector<1x1x56x4xf32>
    %4 = vector.shape_cast %3 : vector<1x1x56x4xf32> to vector<56x4xf32>
    %c384 = arith.constant 384 : index
    %c0_9 = arith.constant 0 : index
    %5 = vector.load %arg7[%c384, %c0_9] : memref<440x4xf32, #tpu.memory_space<vmem>>, vector<56x4xf32>
    tpu.vector_store %arg7[%c384, %c0_9], %4 {strides = array<i32>} : memref<440x4xf32, #tpu.memory_space<vmem>>, vector<56x4xf32>,
    %c0_10 = arith.constant 0 : index
    %c0_11 = arith.constant 0 : index
    %6 = vector.load %arg7[%c0_10, %c0_11] : memref<440x4xf32, #tpu.memory_space<vmem>>, vector<432x4xf32>
    %c1 = arith.constant 1 : index
    %c0_12 = arith.constant 0 : index
    %7 = vector.load %arg7[%c1, %c0_12] : memref<440x4xf32, #tpu.memory_space<vmem>>, vector<432x4xf32>
    %c2 = arith.constant 2 : index
    %c0_13 = arith.constant 0 : index
    %8 = vector.load %arg7[%c2, %c0_13] : memref<440x4xf32, #tpu.memory_space<vmem>>, vector<432x4xf32>
    %9 = tpu.concatenate %6, %7, %8 in 1 : vector<432x4xf32>, vector<432x4xf32>, vector<432x4xf32> -> vector<432x12xf32>
    %10 = vector.extract_strided_slice %9 {offsets = [0, 0], sizes = [384, 12], strides = [1, 1]} : vector<432x12xf32> to vector<384x12xf32>
    %c0_14 = arith.constant 0 : index
    %c0_15 = arith.constant 0 : index
    %c0_16 = arith.constant 0 : index
    %11 = vector.load %arg4[%c0_14, %c0_15, %c0_16] : memref<3x12x128xf32, #tpu.memory_space<vmem>>, vector<1x12x128xf32>
    %12 = vector.shape_cast %11 : vector<1x12x128xf32> to vector<12x128xf32>
    %cst = arith.constant dense<0.000000e+00> : vector<384x128xf32>
    %13 = tpu.matmul %10, %12, %cst {dimension_numbers = #tpu.dot_dimension_numbers<[1], [0], [0], [1], [0, 0, 1, 1], [], []>} : vector<384x12xf32>, vector<12x128xf32>, vector<384x128xf32> -> vector<384x128xf32>
    %14 = vector.extract_strided_slice %9 {offsets = [24, 0], sizes = [384, 12], strides = [1, 1]} : vector<432x12xf32> to vector<384x12xf32>
    %c1_17 = arith.constant 1 : index
    %c0_18 = arith.constant 0 : index
    %c0_19 = arith.constant 0 : index
    %15 = vector.load %arg4[%c1_17, %c0_18, %c0_19] : memref<3x12x128xf32, #tpu.memory_space<vmem>>, vector<1x12x128xf32>
    %16 = vector.shape_cast %15 : vector<1x12x128xf32> to vector<12x128xf32>
    %cst_20 = arith.constant dense<0.000000e+00> : vector<384x128xf32>
    %17 = tpu.matmul %14, %16, %cst_20 {dimension_numbers = #tpu.dot_dimension_numbers<[1], [0], [0], [1], [0, 0, 1, 1], [], []>} : vector<384x12xf32>, vector<12x128xf32>, vector<384x128xf32> -> vector<384x128xf32>
    %18 = arith.addf %13, %17 : vector<384x128xf32>
    %19 = vector.extract_strided_slice %9 {offsets = [48, 0], sizes = [384, 12], strides = [1, 1]} : vector<432x12xf32> to vector<384x12xf32>
    %c2_21 = arith.constant 2 : index
    %c0_22 = arith.constant 0 : index
    %c0_23 = arith.constant 0 : index
    %20 = vector.load %arg4[%c2_21, %c0_22, %c0_23] : memref<3x12x128xf32, #tpu.memory_space<vmem>>, vector<1x12x128xf32>
    %21 = vector.shape_cast %20 : vector<1x12x128xf32> to vector<12x128xf32>
    %cst_24 = arith.constant dense<0.000000e+00> : vector<384x128xf32>
    %22 = tpu.matmul %19, %21, %cst_24 {dimension_numbers = #tpu.dot_dimension_numbers<[1], [0], [0], [1], [0, 0, 1, 1], [], []>} : vector<384x12xf32>, vector<12x128xf32>, vector<384x128xf32> -> vector<384x128xf32>
    %23 = arith.addf %18, %22 : vector<384x128xf32>
    %c0_25 = arith.constant 0 : index
    %c0_26 = arith.constant 0 : index
    %24 = vector.load %arg5[%c0_25, %c0_26] : memref<1x128xf32, #tpu.memory_space<vmem>>, vector<1x128xf32>
    %25 = vector.broadcast %24 : vector<1x128xf32> to vector<384x128xf32>
    %26 = arith.addf %23, %25 : vector<384x128xf32>
    %cst_27 = arith.constant 5.000000e-01 : f32
    %27 = vector.broadcast %cst_27 : f32 to vector<384x128xf32>
    %28 = arith.mulf %27, %26 : vector<384x128xf32>
    %cst_28 = arith.constant 0.707106769 : f32
    %29 = vector.broadcast %cst_28 : f32 to vector<384x128xf32>
    %30 = arith.mulf %26, %29 : vector<384x128xf32>
    %31 = math.erf %30 : vector<384x128xf32>
    %cst_29 = arith.constant 1.000000e+00 : f32
    %32 = vector.broadcast %cst_29 : f32 to vector<384x128xf32>
    %33 = arith.addf %32, %31 : vector<384x128xf32>
    %34 = arith.mulf %28, %33 : vector<384x128xf32>
    %c0_30 = arith.constant 0 : index
    %c0_31 = arith.constant 0 : index
    %c0_32 = arith.constant 0 : index
    %c0_33 = arith.constant 0 : index
    %35 = vector.load %arg6[%c0_30, %c0_31, %c0_32, %c0_33] : memref<1x1x384x128xf32, #tpu.memory_space<vmem>>, vector<1x1x384x128xf32>
    %36 = vector.shape_cast %35 : vector<1x1x384x128xf32> to vector<384x128xf32>
    %37 = vector.shape_cast %34 : vector<384x128xf32> to vector<1x1x384x128xf32>
    tpu.vector_store %arg6[%c0_30, %c0_31, %c0_32, %c0_33], %37 {strides = array<i32>} : memref<1x1x384x128xf32, #tpu.memory_space<vmem>>, vector<1x1x384x128xf32>,
    return
  }
  func.func @transform_0(%arg0: i32, %arg1: i32) -> (i32, i32, i32, i32) {
    %c0_i32 = arith.constant 0 : i32
    %c0_i32_0 = arith.constant 0 : i32
    %c0_i32_1 = arith.constant 0 : i32
    return %arg0, %arg1, %c0_i32, %c0_i32_0 : i32, i32, i32, i32
  }
  func.func @transform_1(%arg0: i32, %arg1: i32) -> (i32, i32, i32, i32) {
    %c0_i32 = arith.constant 0 : i32
    %c0_i32_0 = arith.constant 0 : i32
    %c0_i32_1 = arith.constant 0 : i32
    return %arg0, %arg1, %c0_i32, %c0_i32_0 : i32, i32, i32, i32
  }
  func.func @transform_2(%arg0: i32, %arg1: i32) -> (i32, i32, i32) {
    %c0_i32 = arith.constant 0 : i32
    %c0_i32_0 = arith.constant 0 : i32
    %c0_i32_1 = arith.constant 0 : i32
    %c0_i32_2 = arith.constant 0 : i32
    return %c0_i32, %c0_i32_0, %c0_i32_1 : i32, i32, i32
  }
  func.func @transform_3(%arg0: i32, %arg1: i32) -> (i32, i32) {
    %c0_i32 = arith.constant 0 : i32
    %c0_i32_0 = arith.constant 0 : i32
    %c0_i32_1 = arith.constant 0 : i32
    return %c0_i32, %c0_i32_0 : i32, i32
  }
  func.func @transform_4(%arg0: i32, %arg1: i32) -> (i32, i32, i32, i32) {
    %c0_i32 = arith.constant 0 : i32
    %c0_i32_0 = arith.constant 0 : i32
    %c0_i32_1 = arith.constant 0 : i32
    return %arg0, %arg1, %c0_i32, %c0_i32_0 : i32, i32, i32, i32
  }
}

</mosaic_0001>

<bundles_post_ra>
// kernel: basic_conv_gelu_nchw.1
= control target key start
LH: loop header
LB: loop body
LE: loop exit
PB: predicated region body
PF: predicated region fallthrough
CT: control target
= control target key end

     0   :  { %s4514_s15 = smov 0   ;;  %s4516_s16 = smov 0   ;;  %s7184_s0 = inlined_call_operand.vmem [shape: f32[2,1,384,4], index: 0, kind: input, shape index: {}]   ;;  %s7185_s1 = inlined_call_operand.vmem [shape: f32[2,1,56,4], index: 1, kind: input, shape index: {}]   ;;  %s7186_s2 = inlined_call_operand.vmem [shape: f32[3,12,128], index: 2, kind: input, shape index: {}]   ;;  %s7187_s3 = inlined_call_operand.vmem [shape: f32[1,128], index: 3, kind: input, shape index: {}]   ;;  %s7188_s4 = inlined_call_operand.vmem [shape: f32[2,1,384,128], index: 4, kind: output, shape index: {}]  }
   0x1   :  { %s4518_s17 = smov 0  }
   0x2 LB: > { %s26_s18 = sadd.s32 1, %s4481_s16  ;;  %p4123_p0 = scmp.ge.s32.totalorder %s4485_s17, 1  ;;  %s4485_s17 = sphi %s4518_s17, %s14_s17   ;;  %s4481_s16 = sphi %s4516_s16, %s7234_s16   ;;  %s4477_s15 = sphi %s4514_s15, %s7233_s15  }
   0x3   : > { %p28_p1 = scmp.ge.s32.totalorder %s26_s18, 2  ;;  %p198_p2 = scmp.lt.s32.totalorder %s4485_s17, 3 }
   0x5   : > { %s7236_s18 = smov (%p28_p1, %s26_s18), 0  ;;  %p199_p3 = pnand %p4123_p0, %p198_p2 }
   0x6   : > { %p241_p4 = scmp.lt.s32.totalorder (!%p199_p3), %s4477_s15, 1  ;;  %s4487_s23 = smov (!%p199_p3), 8  }
   0x7   : > { %202 = sbr.rel (%p199_p3) target bundleno = 894 (0x37e), region = 36  ;;  %s4488_s24 = smov (!%p199_p3), 4  }
   0xc   : > { %s7238_s15 = smov (!%p241_p4, %s4477_s15), 1  ;;  %vm316_vm0 = vcmask 31744   ;;  %vm1232_vm1 = vcmask 1043456   ;;  %v4632_v57 = vld [vmem:[%s7186_s2 + $0x28] sm:$0xf]  ;;  %v4642_v60 = vld [vmem:[%s7186_s2 + $0x20] sm:$0xff] }
   0xd   : > { %s4334_s19 = smul.u32 384, %s7238_s15  ;;  %4229 = vmatpush.msk.msra.mxu2 %vm1232_vm1, %v4632_v57  ;;  %vm1027_vm2 = vcmask 64512   ;;  %vm1087_vm3 = vcmask 97280  }
   0xe   : > { %s4335_s25 = smul.u32 56, %s7238_s15 }
   0xf   : > { %s4540_s22 = scalar_lea.vmem %s7184_s0, %s4334_s19  ;;  %1600 = vmatpush.msra.mxu2 %v4642_v60  ;;  %s5141_s26 = scalar_lea.vmem %s7188_s4, %s4334_s19 }
  0x10   : > { %v274_v0 = vld [vmem:[%s4540_s22 + $0x30] sm:$0xff]  ;;  %v275_v1 = vld [vmem:[%s4540_s22 + $0x38] sm:$0xff]  ;;  %v308_v3 = vld [vmem:[%s4540_s22 + $0x140] sm:$0xff]  ;;  %s4623_s28 = scalar_lea.vmem %s7185_s1, %s4335_s25 }
  0x11   : > { %v307_v2 = vld [vmem:[%s4540_s22 + $0x138] sm:$0xff]  ;;  %323 = vst.msk [vmem:[#allocation2 + $0x30] sm:$0xff] %vm316_vm0, %v274_v0  ;;  %v272_v5 = vld [vmem:[%s4540_s22 + $0x20] sm:$0xff]  ;;  %v269_v7 = vld [vmem:[%s4540_s22 + $0x8] sm:$0xff] }
  0x12   : > { %324 = vst.msk [vmem:[#allocation2 + $0x38] sm:$0xff] %vm316_vm0, %v275_v1  ;;  %v271_v4 = vld [vmem:[%s4540_s22 + $0x18] sm:$0xff]  ;;  %v268_v6 = vld [vmem:[%s4540_s22] sm:$0xff]  ;;  %v309_v9 = vld [vmem:[%s4540_s22 + $0x148] sm:$0xff] }
  0x13   : > { %356 = vst.msk [vmem:[#allocation2 + $0x138] sm:$0xff] %vm316_vm0, %v307_v2  ;;  %v276_v8 = vld [vmem:[%s4540_s22 + $0x40] sm:$0xff]  ;;  %v273_v10 = vld [vmem:[%s4540_s22 + $0x28] sm:$0xff]  ;;  %v270_v13 = vld [vmem:[%s4540_s22 + $0x10] sm:$0xff] }
  0x14   : > { %357 = vst.msk [vmem:[#allocation2 + $0x140] sm:$0xff] %vm316_vm0, %v308_v3  ;;  %v277_v14 = vld [vmem:[%s4540_s22 + $0x48] sm:$0xff]  ;;  %v310_v18 = vld [vmem:[%s4540_s22 + $0x150] sm:$0xff]  ;;  %v311_v25 = vld [vmem:[%s4540_s22 + $0x158] sm:$0xff] }
  0x15   : > { %320 = vst.msk [vmem:[#allocation2 + $0x18] sm:$0xff] %vm316_vm0, %v271_v4  ;;  %v278_v26 = vld [vmem:[%s4540_s22 + $0x50] sm:$0xff]  ;;  %v279_v30 = vld [vmem:[%s4540_s22 + $0x58] sm:$0xff]  ;;  %v312_v34 = vld [vmem:[%s4540_s22 + $0x160] sm:$0xff] }
  0x16   : > { %321 = vst.msk [vmem:[#allocation2 + $0x20] sm:$0xff] %vm316_vm0, %v272_v5  ;;  %v280_v38 = vld [vmem:[%s4540_s22 + $0x60] sm:$0xff]  ;;  %v313_v39 = vld [vmem:[%s4540_s22 + $0x168] sm:$0xff]  ;;  %v314_v43 = vld [vmem:[%s4540_s22 + $0x170] sm:$0xff] }
  0x17   : > { %317 = vst.msk [vmem:[#allocation2] sm:$0xff] %vm316_vm0, %v268_v6  ;;  %v281_v44 = vld [vmem:[%s4540_s22 + $0x68] sm:$0xff]  ;;  %v282_v48 = vld [vmem:[%s4540_s22 + $0x70] sm:$0xff]  ;;  %v315_v52 = vld [vmem:[%s4540_s22 + $0x178] sm:$0xff] }
  0x18   : > { %318 = vst.msk [vmem:[#allocation2 + $0x8] sm:$0xff] %vm316_vm0, %v269_v7  ;;  %v283_v56 = vld [vmem:[%s4540_s22 + $0x78] sm:$0xff]  ;;  %v365_v58 = vld [vmem:[%s4623_s28] sm:$0xff]  ;;  %v366_v63 = vld [vmem:[%s4623_s28 + $0x8] sm:$0xff] }
  0x19   : > { %v493_v11 = vld [vmem:[#allocation2 + $0x32] sm:$0xff]  ;;  %325 = vst.msk [vmem:[#allocation2 + $0x40] sm:$0xff] %vm316_vm0, %v276_v8  ;;  %v284_v0 = vld [vmem:[%s4540_s22 + $0x80] sm:$0xff]  ;;  %v285_v6 = vld [vmem:[%s4540_s22 + $0x88] sm:$0xff] }
  0x1a   : > { %v439_v12 = vld [vmem:[#allocation2 + $0x31] sm:$0xff]  ;;  %823 = vrot.lane.b32.xlu1 %v493_v11, %s4487_s23  ;;  %358 = vst.msk [vmem:[#allocation2 + $0x148] sm:$0xff] %vm316_vm0, %v309_v9  ;;  %v1083_v8 = vld [vmem:[%s7186_s2 + $0x8] sm:$0xf]  ;;  %v1082_v9 = vld [vmem:[%s7186_s2] sm:$0xff] }
  0x1b   : > { %607 = vrot.lane.b32.xlu0 %v439_v12, %s4488_s24  ;;  %322 = vst.msk [vmem:[#allocation2 + $0x28] sm:$0xff] %vm316_vm0, %v273_v10  ;;  %v526_v15 = vld [vmem:[#allocation2 + $0x13a] sm:$0xff]  ;;  %v4127_v3 = vld [vmem:[%s7186_s2 + $0x10] sm:$0xff]  ;;  %4178 = vmatpush.msk.msra.mxu1 %vm1232_vm1, %v1083_v8 }
  0x1c   : > { %319 = vst.msk [vmem:[#allocation2 + $0x10] sm:$0xff] %vm316_vm0, %v270_v13  ;;  %v472_v16 = vld [vmem:[#allocation2 + $0x139] sm:$0xff]  ;;  %v367_v13 = vld [vmem:[%s4623_s28 + $0x10] sm:$0xff] }
  0x1d   : > { %326 = vst.msk [vmem:[#allocation2 + $0x48] sm:$0xff] %vm316_vm0, %v277_v14  ;;  %v436_v19 = vld [vmem:[#allocation2 + $0x19] sm:$0xff]  ;;  %1424 = vmatpush.msra.mxu1 %v1082_v9 }
  0x1e   : > { %359 = vst.msk [vmem:[#allocation2 + $0x150] sm:$0xff] %vm316_vm0, %v310_v18  ;;  %v490_v20 = vld [vmem:[#allocation2 + $0x1a] sm:$0xff]  ;;  %v286_v18 = vld [vmem:[%s4540_s22 + $0x90] sm:$0xff] }
  0x1f   : > { %v433_v17 = vld [vmem:[#allocation2 + $0x1] sm:$0xff]  ;;  %360 = vst.msk [vmem:[#allocation2 + $0x158] sm:$0xff] %vm316_vm0, %v311_v25  ;;  %v4128_v1 = vld [vmem:[%s7186_s2 + $0x18] sm:$0xf] }
  0x20   : > { %595 = vrot.lane.b32.xlu2 %v433_v17, %s4488_s24  ;;  %v487_v21 = vld [vmem:[#allocation2 + $0x2] sm:$0xff]  ;;  %v440_v22 = vld [vmem:[#allocation2 + $0x39] sm:$0xff]  ;;  %327 = vst.msk [vmem:[#allocation2 + $0x50] sm:$0xff] %vm316_vm0, %v278_v26  ;;  %4328 = vmatpush.msk.msra.mxu3 %vm1232_vm1, %v4128_v1 }
  0x21   : > { %v494_v23 = vld [vmem:[#allocation2 + $0x3a] sm:$0xff]  ;;  %v527_v27 = vld [vmem:[#allocation2 + $0x142] sm:$0xff]  ;;  %328 = vst.msk [vmem:[#allocation2 + $0x58] sm:$0xff] %vm316_vm0, %v279_v30  ;;  %4129 = vmatpush.msk.msra.mxu0 %vm1232_vm1, %v4128_v1 }
  0x22   : > { %889 = vrot.lane.b32.xlu1 %v526_v15, %s4487_s23  ;;  %v473_v24 = vld [vmem:[#allocation2 + $0x141] sm:$0xff]  ;;  %361 = vst.msk [vmem:[#allocation2 + $0x160] sm:$0xff] %vm316_vm0, %v312_v34  ;;  %v438_v42 = vld [vmem:[#allocation2 + $0x29] sm:$0xff]  ;;  %4329 = vmatpush.msra.mxu3 %v4127_v3 }
  0x23   : > { %673 = vrot.lane.b32.xlu0 %v472_v16, %s4488_s24  ;;  %v437_v28 = vld [vmem:[#allocation2 + $0x21] sm:$0xff]  ;;  %v434_v29 = vld [vmem:[#allocation2 + $0x9] sm:$0xff]  ;;  %329 = vst.msk [vmem:[#allocation2 + $0x60] sm:$0xff] %vm316_vm0, %v280_v38  ;;  %v435_v40 = vld [vmem:[#allocation2 + $0x11] sm:$0xff]  ;;  %1251 = vmatpush.msra.mxu0 %v4127_v3 }
  0x24   : > { %v488_v31 = vld [vmem:[#allocation2 + $0xa] sm:$0xff]  ;;  %v441_v32 = vld [vmem:[#allocation2 + $0x41] sm:$0xff]  ;;  %362 = vst.msk [vmem:[#allocation2 + $0x168] sm:$0xff] %vm316_vm0, %v313_v39  ;;  %v489_v41 = vld [vmem:[#allocation2 + $0x12] sm:$0xff]  ;;  %4330 = vmatpush.msk.msrb.mxu3 %vm1232_vm1, %v1083_v8 }
  0x25   : > { %v491_v33 = vld [vmem:[#allocation2 + $0x22] sm:$0xff]  ;;  %v528_v36 = vld [vmem:[#allocation2 + $0x14a] sm:$0xff]  ;;  %363 = vst.msk [vmem:[#allocation2 + $0x170] sm:$0xff] %vm316_vm0, %v314_v43 }
  0x26   : > { %v474_v35 = vld [vmem:[#allocation2 + $0x149] sm:$0xff]  ;;  %330 = vst.msk [vmem:[#allocation2 + $0x68] sm:$0xff] %vm316_vm0, %v281_v44  ;;  %v475_v46 = vld [vmem:[#allocation2 + $0x151] sm:$0xff]  ;;  %4331 = vmatpush.msrb.mxu3 %v1082_v9  ;;  %v288_v43 = vld [vmem:[%s4540_s22 + $0xa0] sm:$0xff] }
  0x27   : > { %v495_v37 = vld [vmem:[#allocation2 + $0x42] sm:$0xff]  ;;  %v492_v45 = vld [vmem:[#allocation2 + $0x2a] sm:$0xff]  ;;  %331 = vst.msk [vmem:[#allocation2 + $0x70] sm:$0xff] %vm316_vm0, %v282_v48  ;;  %v529_v51 = vld [vmem:[#allocation2 + $0x152] sm:$0xff] }
  0x28   : > { %601 = vrot.lane.b32.xlu2 %v436_v19, %s4488_s24  ;;  %v442_v47 = vld [vmem:[#allocation2 + $0x49] sm:$0xff]  ;;  %v443_v50 = vld [vmem:[#allocation2 + $0x51] sm:$0xff]  ;;  %364 = vst.msk [vmem:[#allocation2 + $0x178] sm:$0xff] %vm316_vm0, %v315_v52 }
  0x29   : > { %v496_v49 = vld [vmem:[#allocation2 + $0x4a] sm:$0xff]  ;;  %v476_v53 = vld [vmem:[#allocation2 + $0x159] sm:$0xff]  ;;  %332 = vst.msk [vmem:[#allocation2 + $0x78] sm:$0xff] %vm316_vm0, %v283_v56 }
  0x2a   : > { %817 = vrot.lane.b32.xlu1 %v490_v20, %s4487_s23  ;;  %v530_v54 = vld [vmem:[#allocation2 + $0x15a] sm:$0xff]  ;;  %v497_v55 = vld [vmem:[#allocation2 + $0x52] sm:$0xff]  ;;  %372 = vst.msk [vmem:[#allocation2 + $0x180] sm:$0xff] %vm316_vm0, %v365_v58  ;;  %v305_v30 = vld [vmem:[%s4540_s22 + $0x128] sm:$0xff] }
  0x2b   : > { %811 = vrot.lane.b32.xlu0 %v487_v21, %s4487_s23  ;;  %v444_v59 = vld [vmem:[#allocation2 + $0x59] sm:$0xff]  ;;  %v477_v62 = vld [vmem:[#allocation2 + $0x161] sm:$0xff]  ;;  %373 = vst.msk [vmem:[#allocation2 + $0x188] sm:$0xff] %vm316_vm0, %v366_v63  ;;  %v385_v19 = vld [vmem:[#allocation2 + $0x30] sm:$0xff] }
  0x2c   : > { %v498_v61 = vld [vmem:[#allocation2 + $0x5a] sm:$0xff]  ;;  %333 = vst.msk [vmem:[#allocation2 + $0x80] sm:$0xff] %vm316_vm0, %v284_v0  ;;  %v531_v2 = vld [vmem:[#allocation2 + $0x162] sm:$0xff]  ;;  %v532_v12 = vld [vmem:[#allocation2 + $0x16a] sm:$0xff] }
  0x2d   : > { %v478_v4 = vld [vmem:[#allocation2 + $0x169] sm:$0xff]  ;;  %v445_v5 = vld [vmem:[#allocation2 + $0x61] sm:$0xff]  ;;  %334 = vst.msk [vmem:[#allocation2 + $0x88] sm:$0xff] %vm316_vm0, %v285_v6  ;;  %v368_v21 = vld [vmem:[%s4623_s28 + $0x18] sm:$0xff] }
  0x2e   : > { %v499_v10 = vld [vmem:[#allocation2 + $0x62] sm:$0xff]  ;;  %374 = vst.msk [vmem:[#allocation2 + $0x190] sm:$0xff] %vm316_vm0, %v367_v13  ;;  %v500_v17 = vld [vmem:[#allocation2 + $0x6a] sm:$0xff] }
  0x2f   : > { %v446_v11 = vld [vmem:[#allocation2 + $0x69] sm:$0xff]  ;;  %v479_v15 = vld [vmem:[#allocation2 + $0x171] sm:$0xff]  ;;  %335 = vst.msk [vmem:[#allocation2 + $0x90] sm:$0xff] %vm316_vm0, %v286_v18  ;;  %v419_v56 = vld [vmem:[#allocation2 + $0x140] sm:$0xff] }
  0x30   : > { %609 = vrot.lane.b32.xlu2 %v440_v22, %s4488_s24  ;;  %v533_v16 = vld [vmem:[#allocation2 + $0x172] sm:$0xff]  ;;  %375 = vst.msk [vmem:[#allocation2 + $0x198] sm:$0xff] %vm316_vm0, %v368_v21  ;;  %v289_v3 = vld [vmem:[%s4540_s22 + $0xa8] sm:$0xff]  ;;  %v383_v13 = vld [vmem:[#allocation2 + $0x20] sm:$0xff] }
  0x31   : > { %v447_v25 = vld [vmem:[#allocation2 + $0x71] sm:$0xff]  ;;  %354 = vst.msk [vmem:[#allocation2 + $0x128] sm:$0xff] %vm316_vm0, %v305_v30 }
  0x32   : > { %825 = vrot.lane.b32.xlu1 %v494_v23, %s4487_s23  ;;  %v481_v39 = vld [vmem:[#allocation2 + $0x181] sm:$0xff]  ;;  %337 = vst.msk [vmem:[#allocation2 + $0xa0] sm:$0xff] %vm316_vm0, %v288_v43 }
  0x33   : > { %675 = vrot.lane.b32.xlu0 %v473_v24, %s4488_s24  ;;  %338 = vst.msk [vmem:[#allocation2 + $0xa8] sm:$0xff] %vm316_vm0, %v289_v3 }
  0x34   : > { %v449_v52 = vld [vmem:[#allocation2 + $0x81] sm:$0xff] }
  0x35   : > { %v482_v63 = vld [vmem:[#allocation2 + $0x189] sm:$0xff] }
  0x36   : > { %v536_v1 = vld [vmem:[#allocation2 + $0x18a] sm:$0xff] }
  0x37   : > { %v450_v9 = vld [vmem:[#allocation2 + $0x89] sm:$0xff] }
  0x38   : > { %891 = vrot.lane.b32.xlu2 %v527_v27, %s4487_s23  ;;  %v501_v27 = vld [vmem:[#allocation2 + $0x72] sm:$0xff] }
  0x3a   : > { %603 = vrot.lane.b32.xlu1 %v437_v28, %s4488_s24  ;;  %v480_v28 = vld [vmem:[#allocation2 + $0x179] sm:$0xff] }
  0x3b   : > { %597 = vrot.lane.b32.xlu0 %v434_v29, %s4488_s24  ;;  %v304_v29 = vld [vmem:[%s4540_s22 + $0x120] sm:$0xff] }
  0x3c   : > { %353 = vst.msk [vmem:[#allocation2 + $0x120] sm:$0xff] %vm316_vm0, %v304_v29 }
  0x40   : > { %813 = vrot.lane.b32.xlu2 %v488_v31, %s4487_s23  ;;  %v418_v31 = vld [vmem:[#allocation2 + $0x138] sm:$0xff] }
  0x42   : > { %611 = vrot.lane.b32.xlu1 %v441_v32, %s4488_s24 }
  0x43   : > { %819 = vrot.lane.b32.xlu0 %v491_v33, %s4487_s23  ;;  %v287_v33 = vld [vmem:[%s4540_s22 + $0x98] sm:$0xff]  ;;  %v469_v21 = vld [vmem:[#allocation2 + $0x121] sm:$0xff] }
  0x44   : > { %336 = vst.msk [vmem:[#allocation2 + $0x98] sm:$0xff] %vm316_vm0, %v287_v33 }
  0x48   : > { %677 = vrot.lane.b32.xlu2 %v474_v35, %s4488_s24 }
  0x4a   : > { %893 = vrot.lane.b32.xlu1 %v528_v36, %s4487_s23 }
  0x4b   : > { %827 = vrot.lane.b32.xlu0 %v495_v37, %s4487_s23  ;;  %v534_v37 = vld [vmem:[#allocation2 + $0x17a] sm:$0xff] }
  0x50   : > { %599 = vrot.lane.b32.xlu2 %v435_v40, %s4488_s24  ;;  %v448_v40 = vld [vmem:[#allocation2 + $0x79] sm:$0xff] }
  0x52   : > { %815 = vrot.lane.b32.xlu1 %v489_v41, %s4487_s23  ;;  %v379_v41 = vld [vmem:[#allocation2] sm:$0xff] }
  0x53   : > { %605 = vrot.lane.b32.xlu0 %v438_v42, %s4488_s24  ;;  %v382_v42 = vld [vmem:[#allocation2 + $0x18] sm:$0xff] }
  0x58   : > { %821 = vrot.lane.b32.xlu2 %v492_v45, %s4487_s23 }
  0x5a   : > { %679 = vrot.lane.b32.xlu1 %v475_v46, %s4488_s24 }
  0x5b   : > { %613 = vrot.lane.b32.xlu0 %v442_v47, %s4488_s24 }
  0x60   : > { %829 = vrot.lane.b32.xlu2 %v496_v49, %s4487_s23 }
  0x62   : > { %615 = vrot.lane.b32.xlu1 %v443_v50, %s4488_s24 }
  0x63   : > { %895 = vrot.lane.b32.xlu0 %v529_v51, %s4487_s23  ;;  %v502_v51 = vld [vmem:[#allocation2 + $0x7a] sm:$0xff] }
  0x68   : > { %681 = vrot.lane.b32.xlu2 %v476_v53, %s4488_s24  ;;  %v535_v53 = vld [vmem:[#allocation2 + $0x182] sm:$0xff] }
  0x6a   : > { %897 = vrot.lane.b32.xlu1 %v530_v54, %s4487_s23  ;;  %v386_v54 = vld [vmem:[#allocation2 + $0x38] sm:$0xff] }
  0x6b   : > { %831 = vrot.lane.b32.xlu0 %v497_v55, %s4487_s23  ;;  %v306_v55 = vld [vmem:[%s4540_s22 + $0x130] sm:$0xff] }
  0x6c   : > { %355 = vst.msk [vmem:[#allocation2 + $0x130] sm:$0xff] %vm316_vm0, %v306_v55 }
  0x70   : > { %617 = vrot.lane.b32.xlu2 %v444_v59, %s4488_s24 }
  0x72   : > { %833 = vrot.lane.b32.xlu1 %v498_v61, %s4487_s23 }
  0x73   : > { %683 = vrot.lane.b32.xlu0 %v477_v62, %s4488_s24 }
  0x78   : > { %899 = vrot.lane.b32.xlu2 %v531_v2, %s4487_s23  ;;  %v503_v2 = vld [vmem:[#allocation2 + $0x82] sm:$0xff] }
  0x7a   : > { %685 = vrot.lane.b32.xlu1 %v478_v4, %s4488_s24  ;;  %v4664_v7 = vpop.permute.xlu2 %595  ;;  %v380_v4 = vld [vmem:[#allocation2 + $0x8] sm:$0xff] }
  0x7b   : > { %619 = vrot.lane.b32.xlu0 %v445_v5, %s4488_s24  ;;  %v973_v45 = vsel %vm316_vm0, %v379_v41, %v4664_v7  ;;  %v292_v41 = vld [vmem:[%s4540_s22 + $0xc0] sm:$0xff] }
  0x7c   : > { %341 = vst.msk [vmem:[#allocation2 + $0xc0] sm:$0xff] %vm316_vm0, %v292_v41 }
  0x80   : > { %835 = vrot.lane.b32.xlu2 %v499_v10, %s4487_s23 }
  0x82   : > { %621 = vrot.lane.b32.xlu1 %v446_v11, %s4488_s24  ;;  %v602_v14 = vpop.permute.xlu2 %601  ;;  %v504_v11 = vld [vmem:[#allocation2 + $0x8a] sm:$0xff] }
  0x83   : > { %901 = vrot.lane.b32.xlu0 %v532_v12, %s4487_s23  ;;  %v976_v46 = vsel %vm316_vm0, %v382_v42, %v602_v14  ;;  %v483_v12 = vld [vmem:[#allocation2 + $0x191] sm:$0xff] }
  0x84   : > { %v290_v14 = vld [vmem:[%s4540_s22 + $0xb0] sm:$0xff] }
  0x85   : > { %339 = vst.msk [vmem:[#allocation2 + $0xb0] sm:$0xff] %vm316_vm0, %v290_v14 }
  0x88   : > { %687 = vrot.lane.b32.xlu2 %v479_v15, %s4488_s24 }
  0x8a   : > { %903 = vrot.lane.b32.xlu1 %v533_v16, %s4487_s23  ;;  %v4684_v20 = vpop.permute.xlu2 %609 }
  0x8b   : > { %837 = vrot.lane.b32.xlu0 %v500_v17, %s4487_s23  ;;  %v980_v58 = vsel %vm316_vm0, %v386_v54, %v4684_v20  ;;  %v537_v20 = vld [vmem:[#allocation2 + $0x192] sm:$0xff]  ;;  %v293_v54 = vld [vmem:[%s4540_s22 + $0xc8] sm:$0xff] }
  0x8c   : > { %v824_v22 = vpop.permute.xlu1 %823  ;;  %342 = vst.msk [vmem:[#allocation2 + $0xc8] sm:$0xff] %vm316_vm0, %v293_v54 }
  0x8d   : > { %v608_v23 = vpop.permute.xlu0 %607 }
  0x8e   : > { %v979_v24 = vsel %vm316_vm0, %v385_v19, %v608_v23  ;;  %v387_v23 = vld [vmem:[#allocation2 + $0x40] sm:$0xff] }
  0x8f   : > { %v4691_v26 = vsel %vm1027_vm2, %v979_v24, %v824_v22  ;;  %v451_v22 = vld [vmem:[#allocation2 + $0x91] sm:$0xff]  ;;  %v420_v24 = vld [vmem:[#allocation2 + $0x148] sm:$0xff] }
  0x90   : > { %4230 = vmatmul.msk.f32.vlgmr.msra.gmra.mxu2 %vm1087_vm3, %v4691_v26  ;;  %623 = vrot.lane.b32.xlu2 %v447_v25, %s4488_s24 }
  0x92   : > { %839 = vrot.lane.b32.xlu1 %v501_v27, %s4487_s23  ;;  %v892_v32 = vpop.permute.xlu2 %891  ;;  %v291_v27 = vld [vmem:[%s4540_s22 + $0xb8] sm:$0xff] }
  0x93   : > { %689 = vrot.lane.b32.xlu0 %v480_v28, %s4488_s24  ;;  %340 = vst.msk [vmem:[#allocation2 + $0xb8] sm:$0xff] %vm316_vm0, %v291_v27 }
  0x94   : > { %v890_v34 = vpop.permute.xlu1 %889 }
  0x95   : > { %v674_v35 = vpop.permute.xlu0 %673 }
  0x96   : > { %v1012_v36 = vsel %vm316_vm0, %v418_v31, %v674_v35  ;;  %v452_v35 = vld [vmem:[#allocation2 + $0x99] sm:$0xff] }
  0x97   : > { %v4706_v38 = vsel %vm1027_vm2, %v1012_v36, %v890_v34  ;;  %v505_v34 = vld [vmem:[#allocation2 + $0x92] sm:$0xff]  ;;  %v523_v36 = vld [vmem:[#allocation2 + $0x122] sm:$0xff] }
  0x98   : > { %4166 = vmatmul.msk.f32.vlgmr.msra.gmra.mxu3 %vm1087_vm3, %v4706_v38  ;;  %905 = vrot.lane.b32.xlu2 %v534_v37, %s4487_s23  ;;  %v381_v37 = vld [vmem:[#allocation2 + $0x10] sm:$0xff] }
  0x99   : > { %4332 = vmatpush.msk.msra.mxu3 %vm1232_vm1, %v4632_v57 }
  0x9a   : > { %691 = vrot.lane.b32.xlu1 %v481_v39, %s4488_s24  ;;  %v814_v44 = vpop.permute.xlu2 %813  ;;  %v384_v39 = vld [vmem:[#allocation2 + $0x28] sm:$0xff] }
  0x9b   : > { %625 = vrot.lane.b32.xlu0 %v448_v40, %s4488_s24  ;;  %4333 = vmatpush.msra.mxu3 %v4642_v60 }
  0x9c   : > { %v818_v47 = vpop.permute.xlu1 %817 }
  0x9d   : > { %v812_v48 = vpop.permute.xlu0 %811  ;;  %v4722_v49 = vsel %vm1027_vm2, %v976_v46, %v818_v47  ;;  %v470_v47 = vld [vmem:[#allocation2 + $0x129] sm:$0xff] }
  0x9e   : > { %v1028_v50 = vsel %vm1027_vm2, %v973_v45, %v812_v48  ;;  %4130 = vmatmul.msk.f32.vlgmr.msra.gmra.mxu0 %vm1087_vm3, %v4722_v49 }
  0x9f   : > { %4179 = vmatmul.msk.f32.vlgmr.msra.gmra.mxu1 %vm1087_vm3, %v1028_v50  ;;  %v524_v50 = vld [vmem:[#allocation2 + $0x12a] sm:$0xff] }
  0xa0   : > { %841 = vrot.lane.b32.xlu2 %v502_v51, %s4487_s23  ;;  %v506_v51 = vld [vmem:[#allocation2 + $0x9a] sm:$0xff] }
  0xa2   : > { %627 = vrot.lane.b32.xlu1 %v449_v52, %s4488_s24  ;;  %v678_v57 = vpop.permute.xlu2 %677  ;;  %v388_v52 = vld [vmem:[#allocation2 + $0x48] sm:$0xff] }
  0xa3   : > { %907 = vrot.lane.b32.xlu0 %v535_v53, %s4487_s23  ;;  %v1014_v29 = vsel %vm316_vm0, %v420_v24, %v678_v57 }
  0xa4   : > { %v826_v59 = vpop.permute.xlu1 %825 }
  0xa5   : > { %v676_v60 = vpop.permute.xlu0 %675  ;;  %v4737_v62 = vsel %vm1027_vm2, %v980_v58, %v826_v59  ;;  %v453_v58 = vld [vmem:[#allocation2 + $0xa1] sm:$0xff] }
  0xa6   : > { %v1013_v61 = vsel %vm316_vm0, %v419_v56, %v676_v60  ;;  %4231 = vmatmul.msk.f32.gmra.mxu2 %vm1087_vm3, %v4737_v62  ;;  %v507_v60 = vld [vmem:[#allocation2 + $0xa2] sm:$0xff] }
  0xa7   : > { %v4742_v0 = vsel %vm1027_vm2, %v1013_v61, %v892_v32  ;;  %v471_v61 = vld [vmem:[#allocation2 + $0x131] sm:$0xff] }
  0xa8   : > { %4167 = vmatmul.msk.f32.gmra.mxu3 %vm1087_vm3, %v4742_v0  ;;  %693 = vrot.lane.b32.xlu2 %v482_v63, %s4488_s24  ;;  %v421_v63 = vld [vmem:[#allocation2 + $0x150] sm:$0xff] }
  0xaa   : > { %909 = vrot.lane.b32.xlu1 %v536_v1, %s4487_s23  ;;  %v600_v5 = vpop.permute.xlu2 %599 }
  0xab   : > { %843 = vrot.lane.b32.xlu0 %v503_v2, %s4487_s23  ;;  %v975_v42 = vsel %vm316_vm0, %v381_v37, %v600_v5  ;;  %v511_v37 = vld [vmem:[#allocation2 + $0xc2] sm:$0xff] }
  0xac   : > { %v604_v6 = vpop.permute.xlu1 %603 }
  0xad   : > { %v598_v7 = vpop.permute.xlu0 %597  ;;  %v977_v16 = vsel %vm316_vm0, %v383_v13, %v604_v6  ;;  %v525_v6 = vld [vmem:[#allocation2 + $0x132] sm:$0xff] }
  0xae   : > { %v974_v8 = vsel %vm316_vm0, %v380_v4, %v598_v7  ;;  %v454_v7 = vld [vmem:[#allocation2 + $0xa9] sm:$0xff] }
  0xaf   : > { %v1029_v10 = vsel %vm1027_vm2, %v974_v8, %v814_v44  ;;  %v508_v8 = vld [vmem:[#allocation2 + $0xaa] sm:$0xff] }
  0xb0   : > { %4180 = vmatmul.msk.f32.gmra.mxu1 %vm1087_vm3, %v1029_v10  ;;  %629 = vrot.lane.b32.xlu2 %v450_v9, %s4488_s24  ;;  %v389_v9 = vld [vmem:[#allocation2 + $0x50] sm:$0xff]  ;;  %v422_v10 = vld [vmem:[#allocation2 + $0x158] sm:$0xff] }
  0xb2   : > { %845 = vrot.lane.b32.xlu1 %v504_v11, %s4487_s23  ;;  %v822_v15 = vpop.permute.xlu2 %821 }
  0xb3   : > { %695 = vrot.lane.b32.xlu0 %v483_v12, %s4488_s24  ;;  %v295_v12 = vld [vmem:[%s4540_s22 + $0xd8] sm:$0xff] }
  0xb4   : > { %v612_v17 = vpop.permute.xlu1 %611  ;;  %344 = vst.msk [vmem:[#allocation2 + $0xd8] sm:$0xff] %vm316_vm0, %v295_v12 }
  0xb5   : > { %v820_v18 = vpop.permute.xlu0 %819  ;;  %v981_v28 = vsel %vm316_vm0, %v387_v23, %v612_v17  ;;  %v423_v23 = vld [vmem:[#allocation2 + $0x160] sm:$0xff] }
  0xb6   : > { %v4761_v19 = vsel %vm1027_vm2, %v977_v16, %v820_v18 }
  0xb7   : > { %4131 = vmatmul.msk.f32.gmra.mxu0 %vm1087_vm3, %v4761_v19 }
  0xb8   : > { %911 = vrot.lane.b32.xlu2 %v537_v20, %s4487_s23  ;;  %v509_v20 = vld [vmem:[#allocation2 + $0xb2] sm:$0xff] }
  0xba   : > { %667 = vrot.lane.b32.xlu1 %v469_v21, %s4488_s24  ;;  %v830_v25 = vpop.permute.xlu2 %829  ;;  %v456_v21 = vld [vmem:[#allocation2 + $0xb9] sm:$0xff] }
  0xbb   : > { %631 = vrot.lane.b32.xlu0 %v451_v22, %s4488_s24  ;;  %v390_v22 = vld [vmem:[#allocation2 + $0x58] sm:$0xff] }
  0xbc   : > { %v894_v30 = vpop.permute.xlu1 %893 }
  0xbd   : > { %v828_v31 = vpop.permute.xlu0 %827  ;;  %v4773_v32 = vsel %vm1027_vm2, %v1014_v29, %v894_v30 }
  0xbe   : > { %v4776_v33 = vsel %vm1027_vm2, %v981_v28, %v828_v31  ;;  %4168 = vmatmul.msk.f32.gmra.mxu3 %vm1087_vm3, %v4773_v32 }
  0xbf   : > { %4232 = vmatmul.msk.f32.gmra.mxu2 %vm1087_vm3, %v4776_v33 }
  0xc0   : > { %847 = vrot.lane.b32.xlu2 %v505_v34, %s4487_s23  ;;  %v510_v34 = vld [vmem:[#allocation2 + $0xba] sm:$0xff] }
  0xc2   : > { %633 = vrot.lane.b32.xlu1 %v452_v35, %s4488_s24  ;;  %v682_v40 = vpop.permute.xlu2 %681 }
  0xc3   : > { %883 = vrot.lane.b32.xlu0 %v523_v36, %s4487_s23  ;;  %v1016_v14 = vsel %vm316_vm0, %v422_v10, %v682_v40  ;;  %v457_v36 = vld [vmem:[#allocation2 + $0xc1] sm:$0xff] }
  0xc4   : > { %v816_v43 = vpop.permute.xlu1 %815  ;;  %v297_v40 = vld [vmem:[%s4540_s22 + $0xe8] sm:$0xff]  ;;  %v300_v10 = vld [vmem:[%s4540_s22 + $0x100] sm:$0xff] }
  0xc5   : > { %v606_v44 = vpop.permute.xlu0 %605  ;;  %v1030_v46 = vsel %vm1027_vm2, %v975_v42, %v816_v43  ;;  %346 = vst.msk [vmem:[#allocation2 + $0xe8] sm:$0xff] %vm316_vm0, %v297_v40 }
  0xc6   : > { %v978_v45 = vsel %vm316_vm0, %v384_v39, %v606_v44  ;;  %4181 = vmatmul.msk.f32.gmra.mxu1 %vm1087_vm3, %v1030_v46  ;;  %v391_v39 = vld [vmem:[#allocation2 + $0x60] sm:$0xff]  ;;  %349 = vst.msk [vmem:[#allocation2 + $0x100] sm:$0xff] %vm316_vm0, %v300_v10 }
  0xc7   : > { %v1033_v48 = vsel %vm1027_vm2, %v978_v45, %v822_v15 }
  0xc8   : > { %4132 = vmatmul.msk.f32.gmra.mxu0 %vm1087_vm3, %v1033_v48  ;;  %669 = vrot.lane.b32.xlu2 %v470_v47, %s4488_s24  ;;  %v424_v47 = vld [vmem:[#allocation2 + $0x168] sm:$0xff] }
  0xca   : > { %885 = vrot.lane.b32.xlu1 %v524_v50, %s4487_s23  ;;  %v618_v53 = vpop.permute.xlu2 %617 }
  0xcb   : > { %849 = vrot.lane.b32.xlu0 %v506_v51, %s4487_s23  ;;  %v984_v27 = vsel %vm316_vm0, %v390_v22, %v618_v53  ;;  %v298_v51 = vld [vmem:[%s4540_s22 + $0xf0] sm:$0xff]  ;;  %v301_v22 = vld [vmem:[%s4540_s22 + $0x108] sm:$0xff] }
  0xcc   : > { %v680_v55 = vpop.permute.xlu1 %679  ;;  %347 = vst.msk [vmem:[#allocation2 + $0xf0] sm:$0xff] %vm316_vm0, %v298_v51 }
  0xcd   : > { %v614_v56 = vpop.permute.xlu0 %613  ;;  %v1015_v2 = vsel %vm316_vm0, %v421_v63, %v680_v55  ;;  %350 = vst.msk [vmem:[#allocation2 + $0x108] sm:$0xff] %vm316_vm0, %v301_v22 }
  0xce   : > { %v982_v57 = vsel %vm316_vm0, %v388_v52, %v614_v56  ;;  %4182 = vmatmul.msk.f32.gmra.mxu1 %vm1087_vm3, %v4722_v49  ;;  %v294_v49 = vld [vmem:[%s4540_s22 + $0xd0] sm:$0xff] }
  0xcf   : > { %v4802_v59 = vsel %vm1027_vm2, %v982_v57, %v830_v25  ;;  %343 = vst.msk [vmem:[#allocation2 + $0xd0] sm:$0xff] %vm316_vm0, %v294_v49  ;;  %v296_v25 = vld [vmem:[%s4540_s22 + $0xe0] sm:$0xff]  ;;  %v392_v57 = vld [vmem:[#allocation2 + $0x68] sm:$0xff] }
  0xd0   : > { %4133 = vmatmul.msk.f32.gmra.mxu0 %vm1087_vm3, %v4691_v26  ;;  %4233 = vmatmul.msk.f32.gmra.mxu2 %vm1087_vm3, %v4802_v59  ;;  %345 = vst.msk [vmem:[#allocation2 + $0xe0] sm:$0xff] %vm316_vm0, %v296_v25 }
  0xd1   : > { %635 = vrot.lane.b32.xlu2 %v453_v58, %s4488_s24  ;;  %v425_v58 = vld [vmem:[#allocation2 + $0x170] sm:$0xff] }
  0xd2   : > { %851 = vrot.lane.b32.xlu1 %v507_v60, %s4487_s23  ;;  %v900_v1 = vpop.permute.xlu2 %899 }
  0xd3   : > { %671 = vrot.lane.b32.xlu0 %v471_v61, %s4488_s24  ;;  %v299_v61 = vld [vmem:[%s4540_s22 + $0xf8] sm:$0xff] }
  0xd4   : > { %v616_v3 = vpop.permute.xlu1 %615  ;;  %348 = vst.msk [vmem:[#allocation2 + $0xf8] sm:$0xff] %vm316_vm0, %v299_v61 }
  0xd5   : > { %v896_v4 = vpop.permute.xlu0 %895  ;;  %v983_v13 = vsel %vm316_vm0, %v389_v9, %v616_v3  ;;  %v426_v9 = vld [vmem:[#allocation2 + $0x178] sm:$0xff] }
  0xd6   : > { %v4815_v5 = vsel %vm1027_vm2, %v1015_v2, %v896_v4  ;;  %4183 = vmatmul.msk.f32.gmra.mxu1 %vm1087_vm3, %v4761_v19  ;;  %v455_v19 = vld [vmem:[#allocation2 + $0xb1] sm:$0xff]  ;;  %v458_v50 = vld [vmem:[#allocation2 + $0xc9] sm:$0xff] }
  0xd7   : > { %4169 = vmatmul.msk.f32.gmra.mxu3 %vm1087_vm3, %v4815_v5  ;;  %v512_v45 = vld [vmem:[#allocation2 + $0xca] sm:$0xff]  ;;  %v460_v55 = vld [vmem:[#allocation2 + $0xd9] sm:$0xff] }
  0xd8   : > { %4134 = vmatmul.msk.f32.gmra.mxu0 %vm1087_vm3, %v4737_v62  ;;  %v459_v46 = vld [vmem:[#allocation2 + $0xd1] sm:$0xff]  ;;  %v514_v56 = vld [vmem:[#allocation2 + $0xda] sm:$0xff] }
  0xd9   : > { %887 = vrot.lane.b32.xlu2 %v525_v6, %s4487_s23  ;;  %v513_v60 = vld [vmem:[#allocation2 + $0xd2] sm:$0xff]  ;;  %v515_v6 = vld [vmem:[#allocation2 + $0xe2] sm:$0xff] }
  0xda   : > { %853 = vrot.lane.b32.xlu1 %v508_v8, %s4487_s23  ;;  %v836_v11 = vpop.permute.xlu2 %835  ;;  %v393_v8 = vld [vmem:[#allocation2 + $0x70] sm:$0xff] }
  0xdb   : > { %637 = vrot.lane.b32.xlu0 %v454_v7, %s4488_s24  ;;  %v462_v7 = vld [vmem:[#allocation2 + $0xe9] sm:$0xff] }
  0xdc   : > { %v898_v15 = vpop.permute.xlu1 %897 }
  0xdd   : > { %v832_v16 = vpop.permute.xlu0 %831  ;;  %v4831_v17 = vsel %vm1027_vm2, %v1016_v14, %v898_v15 }
  0xde   : > { %v4834_v18 = vsel %vm1027_vm2, %v983_v13, %v832_v16  ;;  %4184 = vmatmul.msk.f32.gmra.mxu1 %vm1087_vm3, %v1033_v48 }
  0xdf   : > { %4170 = vmatmul.msk.f32.gmra.mxu3 %vm1087_vm3, %v4831_v17  ;;  %4234 = vmatmul.msk.f32.gmra.mxu2 %vm1087_vm3, %v4834_v18 }
  0xe0   : > { %4135 = vmatmul.msk.f32.gmra.mxu0 %vm1087_vm3, %v4776_v33 }
  0xe1   : > { %639 = vrot.lane.b32.xlu2 %v455_v19, %s4488_s24  ;;  %v463_v19 = vld [vmem:[#allocation2 + $0xf1] sm:$0xff] }
  0xe2   : > { %641 = vrot.lane.b32.xlu1 %v456_v21, %s4488_s24  ;;  %v688_v24 = vpop.permute.xlu2 %687  ;;  %v394_v21 = vld [vmem:[#allocation2 + $0x78] sm:$0xff] }
  0xe3   : > { %855 = vrot.lane.b32.xlu0 %v509_v20, %s4487_s23  ;;  %v517_v20 = vld [vmem:[#allocation2 + $0xf2] sm:$0xff] }
  0xe4   : > { %v834_v28 = vpop.permute.xlu1 %833 }
  0xe5   : > { %v684_v29 = vpop.permute.xlu0 %683  ;;  %v4851_v31 = vsel %vm1027_vm2, %v984_v27, %v834_v28  ;;  %v518_v28 = vld [vmem:[#allocation2 + $0xfa] sm:$0xff] }
  0xe6   : > { %v1017_v30 = vsel %vm316_vm0, %v423_v23, %v684_v29  ;;  %4185 = vmatmul.msk.f32.gmra.mxu1 %vm1087_vm3, %v4691_v26 }
  0xe7   : > { %v4856_v35 = vsel %vm1027_vm2, %v1017_v30, %v900_v1  ;;  %4235 = vmatmul.msk.f32.gmra.mxu2 %vm1087_vm3, %v4851_v31  ;;  %v1019_v1 = vsel %vm316_vm0, %v425_v58, %v688_v24  ;;  %v427_v30 = vld [vmem:[#allocation2 + $0x180] sm:$0xff] }
  0xe8   : > { %4136 = vmatmul.msk.f32.gmra.mxu0 %vm1087_vm3, %v4802_v59  ;;  %4171 = vmatmul.msk.f32.gmra.mxu3 %vm1087_vm3, %v4856_v35 }
  0xe9   : > { %857 = vrot.lane.b32.xlu2 %v510_v34, %s4487_s23  ;;  %v465_v34 = vld [vmem:[#allocation2 + $0x101] sm:$0xff] }
  0xea   : > { %859 = vrot.lane.b32.xlu1 %v511_v37, %s4487_s23  ;;  %v624_v26 = vpop.permute.xlu2 %623  ;;  %v302_v37 = vld [vmem:[%s4540_s22 + $0x110] sm:$0xff] }
  0xeb   : > { %643 = vrot.lane.b32.xlu0 %v457_v36, %s4488_s24  ;;  %v516_v36 = vld [vmem:[#allocation2 + $0xea] sm:$0xff]  ;;  %351 = vst.msk [vmem:[#allocation2 + $0x110] sm:$0xff] %vm316_vm0, %v302_v37 }
  0xec   : > { %v686_v41 = vpop.permute.xlu1 %685 }
  0xed   : > { %v620_v42 = vpop.permute.xlu0 %619 }
  0xee   : > { %v985_v43 = vsel %vm316_vm0, %v391_v39, %v620_v42  ;;  %4186 = vmatmul.msk.f32.gmra.mxu1 %vm1087_vm3, %v4737_v62  ;;  %v1018_v62 = vsel %vm316_vm0, %v424_v47, %v686_v41  ;;  %v395_v41 = vld [vmem:[#allocation2 + $0x80] sm:$0xff]  ;;  %v428_v42 = vld [vmem:[#allocation2 + $0x188] sm:$0xff] }
  0xef   : > { %v4873_v44 = vsel %vm1027_vm2, %v985_v43, %v836_v11  ;;  %v987_v11 = vsel %vm316_vm0, %v393_v8, %v624_v26 }
  0xf0   : > { %4137 = vmatmul.msk.f32.gmra.mxu0 %vm1087_vm3, %v4834_v18  ;;  %4236 = vmatmul.msk.f32.gmra.mxu2 %vm1087_vm3, %v4873_v44 }
  0xf1   : > { %645 = vrot.lane.b32.xlu2 %v458_v50, %s4488_s24 }
  0xf2   : > { %647 = vrot.lane.b32.xlu1 %v459_v46, %s4488_s24  ;;  %v906_v48 = vpop.permute.xlu2 %905  ;;  %v466_v47 = vld [vmem:[#allocation2 + $0x109] sm:$0xff] }
  0xf3   : > { %861 = vrot.lane.b32.xlu0 %v512_v45, %s4487_s23 }
  0xf4   : > { %v622_v52 = vpop.permute.xlu1 %621 }
  0xf5   : > { %v902_v53 = vpop.permute.xlu0 %901 }
  0xf6   : > { %v4886_v54 = vsel %vm1027_vm2, %v1018_v62, %v902_v53  ;;  %4187 = vmatmul.msk.f32.gmra.mxu1 %vm1087_vm3, %v4776_v33  ;;  %v986_v33 = vsel %vm316_vm0, %v392_v57, %v622_v52  ;;  %v4970_v62 = vld [vmem:[%s7187_s3] ss:$0 sm:$0xff]  ;;  %v520_v53 = vld [vmem:[#allocation2 + $0x10a] sm:$0xff] }
  0xf7   : > { %4172 = vmatmul.msk.f32.gmra.mxu3 %vm1087_vm3, %v4886_v54 }
  0xf8   : > { %4138 = vmatmul.msk.f32.gmra.mxu0 %vm1087_vm3, %v4851_v31 }
  0xf9   : > { %863 = vrot.lane.b32.xlu2 %v513_v60, %s4487_s23 }
  0xfa   : > { %865 = vrot.lane.b32.xlu1 %v514_v56, %s4487_s23  ;;  %v842_v63 = vpop.permute.xlu2 %841 }
  0xfb   : > { %649 = vrot.lane.b32.xlu0 %v460_v55, %s4488_s24  ;;  %v303_v55 = vld [vmem:[%s4540_s22 + $0x118] sm:$0xff] }
  0xfc   : > { %v904_v49 = vpop.permute.xlu1 %903  ;;  %352 = vst.msk [vmem:[#allocation2 + $0x118] sm:$0xff] %vm316_vm0, %v303_v55 }
  0xfd   : > { %v838_v2 = vpop.permute.xlu0 %837  ;;  %v4902_v3 = vsel %vm1027_vm2, %v1019_v1, %v904_v49  ;;  %v429_v1 = vld [vmem:[#allocation2 + $0x190] sm:$0xff]  ;;  %v464_v49 = vld [vmem:[#allocation2 + $0xf9] sm:$0xff] }
  0xfe   : > { %v4905_v4 = vsel %vm1027_vm2, %v986_v33, %v838_v2  ;;  %4188 = vmatmul.msk.f32.gmra.mxu1 %vm1087_vm3, %v4802_v59 }
  0xff   : > { %4173 = vmatmul.msk.f32.gmra.mxu3 %vm1087_vm3, %v4902_v3  ;;  %4237 = vmatmul.msk.f32.gmra.mxu2 %vm1087_vm3, %v4905_v4 }
 0x100   : > { %4139 = vmatmul.msk.f32.gmra.mxu0 %vm1087_vm3, %v4873_v44 }
 0x102   : > { %653 = vrot.lane.b32.xlu1 %v462_v7, %s4488_s24  ;;  %v694_v16 = vpop.permute.xlu2 %693 }
 0x103   : > { %867 = vrot.lane.b32.xlu0 %v515_v6, %s4487_s23  ;;  %v1022_v50 = vsel %vm316_vm0, %v428_v42, %v694_v16  ;;  %v521_v8 = vld [vmem:[#allocation2 + $0x112] sm:$0xff] }
 0x104   : > { %v840_v12 = vpop.permute.xlu1 %839 }
 0x105   : > { %v690_v13 = vpop.permute.xlu0 %689  ;;  %v4922_v14 = vsel %vm1027_vm2, %v987_v11, %v840_v12 }
 0x106   : > { %v1020_v59 = vsel %vm316_vm0, %v426_v9, %v690_v13  ;;  %4189 = vmatmul.msk.f32.gmra.mxu1 %vm1087_vm3, %v4834_v18  ;;  %v461_v18 = vld [vmem:[#allocation2 + $0xe1] sm:$0xff] }
 0x107   : > { %v4927_v15 = vsel %vm1027_vm2, %v1020_v59, %v906_v48  ;;  %4238 = vmatmul.msk.f32.gmra.mxu2 %vm1087_vm3, %v4922_v14  ;;  %651 = vrot.lane.b32.xlu2 %v461_v18, %s4488_s24 }
 0x108   : > { %4140 = vmatmul.msk.f32.gmra.mxu0 %vm1087_vm3, %v4905_v4  ;;  %4174 = vmatmul.msk.f32.gmra.mxu3 %vm1087_vm3, %v4927_v15 }
 0x10a   : > { %871 = vrot.lane.b32.xlu1 %v517_v20, %s4487_s23  ;;  %v630_v29 = vpop.permute.xlu2 %629 }
 0x10b   : > { %655 = vrot.lane.b32.xlu0 %v463_v19, %s4488_s24 }
 0x10c   : > { %v692_v23 = vpop.permute.xlu1 %691 }
 0x10d   : > { %v626_v24 = vpop.permute.xlu0 %625 }
 0x10e   : > { %v988_v25 = vsel %vm316_vm0, %v394_v21, %v626_v24  ;;  %4190 = vmatmul.msk.f32.gmra.mxu1 %vm1087_vm3, %v4851_v31  ;;  %v1021_v31 = vsel %vm316_vm0, %v427_v30, %v692_v23  ;;  %v397_v21 = vld [vmem:[#allocation2 + $0x90] sm:$0xff] }
 0x10f   : > { %v4944_v27 = vsel %vm1027_vm2, %v988_v25, %v842_v63  ;;  %869 = vrot.lane.b32.xlu2 %v516_v36, %s4487_s23  ;;  %v396_v63 = vld [vmem:[#allocation2 + $0x88] sm:$0xff] }
 0x110   : > { %4141 = vmatmul.msk.f32.gmra.mxu0 %vm1087_vm3, %v4922_v14  ;;  %4239 = vmatmul.msk.f32.gmra.mxu2 %vm1087_vm3, %v4944_v27  ;;  %v519_v25 = vld [vmem:[#allocation2 + $0x102] sm:$0xff] }
 0x112   : > { %659 = vrot.lane.b32.xlu1 %v465_v34, %s4488_s24  ;;  %v912_v43 = vpop.permute.xlu2 %911 }
 0x113   : > { %873 = vrot.lane.b32.xlu0 %v518_v28, %s4487_s23  ;;  %v1602_v56 = vpop.f32.mrf.mxu2 }
 0x114   : > { %v628_v39 = vpop.permute.xlu1 %627 }
 0x115   : > { %v908_v26 = vpop.permute.xlu0 %907  ;;  %v989_v48 = vsel %vm316_vm0, %v395_v41, %v628_v39  ;;  %v415_v39 = vld [vmem:[#allocation2 + $0x120] sm:$0xff] }
 0x116   : > { %v4957_v40 = vsel %vm1027_vm2, %v1021_v31, %v908_v26  ;;  %4191 = vmatmul.msk.f32.gmra.mxu1 %vm1087_vm3, %v4873_v44 }
 0x117   : > { %4175 = vmatmul.msk.f32.gmra.mxu3 %vm1087_vm3, %v4957_v40  ;;  %657 = vrot.lane.b32.xlu2 %v464_v49, %s4488_s24 }
 0x118   : > { %4142 = vmatmul.msk.f32.gmra.mxu0 %vm1087_vm3, %v4944_v27 }
 0x11a   : > { %877 = vrot.lane.b32.xlu1 %v520_v53, %s4487_s23  ;;  %v848_v11 = vpop.permute.xlu2 %847 }
 0x11b   : > { %v1253_v45 = vpop.f32.mrf.mxu0  ;;  %661 = vrot.lane.b32.xlu0 %v466_v47, %s4488_s24 }
 0x11c   : > { %v1426_v46 = vpop.f32.mrf.mxu1  ;;  %v910_v44 = vpop.permute.xlu1 %909 }
 0x11d   : > { %v1427_v51 = vadd.f32 %v1426_v46, %v1253_v45  ;;  %v844_v52 = vpop.permute.xlu0 %843  ;;  %v4975_v57 = vsel %vm1027_vm2, %v1022_v50, %v910_v44 }
 0x11e   : > { %v4978_v58 = vsel %vm1027_vm2, %v989_v48, %v844_v52  ;;  %4192 = vmatmul.msk.f32.gmra.mxu1 %vm1087_vm3, %v4905_v4  ;;  %v990_v4 = vsel %vm316_vm0, %v396_v63, %v630_v29  ;;  %v416_v63 = vld [vmem:[#allocation2 + $0x128] sm:$0xff] }
 0x11f   : > { %v1746_v60 = vadd.f32 %v1602_v56, %v1427_v51  ;;  %4176 = vmatmul.msk.f32.gmra.mxu3 %vm1087_vm3, %v4975_v57  ;;  %4240 = vmatmul.msk.f32.gmra.mxu2 %vm1087_vm3, %v4978_v58 }
 0x120   : > { %4143 = vmatmul.msk.f32.gmra.mxu0 %vm1087_vm3, %v4978_v58  ;;  %875 = vrot.lane.b32.xlu2 %v519_v25, %s4487_s23 }
 0x121   : > { %v4991_v61 = vadd.f32 %v4970_v62, %v1746_v60  ;;  %v398_v60 = vld [vmem:[#allocation2 + $0x98] sm:$0xff] }
 0x122   : > { %v670_v36 = vpop.permute.xlu2 %669 }
 0x123   : > { %v4994_v33 = vmul.f32 0.70710677, %v4991_v61  ;;  %879 = vrot.lane.b32.xlu0 %v521_v8, %s4487_s23 }
 0x124   : > { %v846_v6 = vpop.permute.xlu1 %845 }
 0x125   : > { %v1942_v2 = vmul.f32 %v4994_v33, %v4994_v33  ;;  %v696_v7 = vpop.permute.xlu0 %695  ;;  %v5002_v10 = vsel %vm1027_vm2, %v990_v4, %v846_v6  ;;  %v1010_v6 = vsel %vm316_vm0, %v416_v63, %v670_v36 }
 0x126   : > { %v1023_v9 = vsel %vm316_vm0, %v429_v1, %v696_v7  ;;  %4193 = vmatmul.msk.f32.gmra.mxu1 %vm1087_vm3, %v4922_v14  ;;  %v468_v14 = vld [vmem:[#allocation2 + $0x119] sm:$0xff] }
 0x127   : > { %v5005_v12 = vmin.f32 %v1942_v2, 16.0  ;;  %v5010_v13 = vsel %vm1027_vm2, %v1023_v9, %v912_v43  ;;  %4241 = vmatmul.msk.f32.gmra.mxu2 %vm1087_vm3, %v5002_v10  ;;  %665 = vrot.lane.b32.xlu1 %v468_v14, %s4488_s24  ;;  %v467_v9 = vld [vmem:[#allocation2 + $0x111] sm:$0xff] }
 0x128   : > { %4144 = vmatmul.msk.f32.gmra.mxu0 %vm1087_vm3, %v5002_v10  ;;  %4177 = vmatmul.msk.f32.gmra.mxu3 %vm1087_vm3, %v5010_v13 }
 0x129   : > { %v1944_v59 = vmul.f32 2.1237322e-06, %v5005_v12  ;;  %v1955_v16 = vmul.f32 3.8918573e-05, %v5005_v12  ;;  %v1605_v50 = vpop.f32.mrf.mxu2  ;;  %663 = vrot.lane.b32.xlu2 %v467_v9, %s4488_s24 }
 0x12b   : > { %v1945_v19 = vadd.f32 0.00028619796, %v1944_v59  ;;  %v1956_v20 = vadd.f32 0.001143296, %v1955_v16  ;;  %v636_v1 = vpop.permute.xlu2 %635 }
 0x12c   : > { %v668_v23 = vpop.permute.xlu1 %667 }
 0x12d   : > { %v1946_v18 = vmul.f32 %v1945_v19, %v5005_v12  ;;  %v1957_v22 = vmul.f32 %v1956_v20, %v5005_v12  ;;  %v632_v24 = vpop.permute.xlu0 %631  ;;  %v1429_v41 = vpop.f32.mrf.mxu1  ;;  %v1009_v45 = vsel %vm316_vm0, %v415_v39, %v668_v23  ;;  %v417_v23 = vld [vmem:[#allocation2 + $0x130] sm:$0xff] }
 0x12e   : > { %v991_v28 = vsel %vm316_vm0, %v397_v21, %v632_v24  ;;  %4194 = vmatmul.msk.f32.gmra.mxu1 %vm1087_vm3, %v4944_v27 }
 0x12f   : > { %v1947_v29 = vadd.f32 0.0036580483, %v1946_v18  ;;  %v1958_v30 = vadd.f32 0.014752088, %v1957_v22  ;;  %v5028_v34 = vsel %vm1027_vm2, %v991_v28, %v848_v11  ;;  %v399_v18 = vld [vmem:[#allocation2 + $0xa0] sm:$0xff] }
 0x130   : > { %4145 = vmatmul.msk.f32.gmra.mxu0 %vm1087_vm3, %v5028_v34  ;;  %4242 = vmatmul.msk.f32.gmra.mxu2 %vm1087_vm3, %v5028_v34 }
 0x131   : > { %v1948_v37 = vmul.f32 %v1947_v29, %v5005_v12  ;;  %v1959_v31 = vmul.f32 %v1958_v30, %v5005_v12 }
 0x133   : > { %v1960_v26 = vadd.f32 0.112945676, %v1959_v31  ;;  %v1949_v43 = vadd.f32 0.05243302, %v1948_v37  ;;  %v888_v29 = vpop.permute.xlu2 %887  ;;  %v993_v37 = vsel %vm316_vm0, %v399_v18, %v636_v1 }
 0x134   : > { %v1256_v42 = vpop.f32.mrf.mxu0  ;;  %v634_v47 = vpop.permute.xlu1 %633 }
 0x135   : > { %v1961_v27 = vmul.f32 %v1960_v26, %v5005_v12  ;;  %v1430_v46 = vadd.f32 %v1429_v41, %v1256_v42  ;;  %v884_v48 = vpop.permute.xlu0 %883  ;;  %v1950_v53 = vmul.f32 %v1949_v43, %v5005_v12 }
 0x136   : > { %v5039_v51 = vsel %vm1027_vm2, %v1009_v45, %v884_v48  ;;  %4195 = vmatmul.msk.f32.gmra.mxu1 %vm1087_vm3, %v4978_v58  ;;  %v992_v58 = vsel %vm316_vm0, %v398_v60, %v634_v47  ;;  %v522_v48 = vld [vmem:[#allocation2 + $0x11a] sm:$0xff] }
 0x137   : > { %v1962_v44 = vadd.f32 0.4994258, %v1961_v27  ;;  %v1747_v52 = vadd.f32 %v1605_v50, %v1430_v46  ;;  %4215 = vmatmul.msk.f32.vlgmr.msrb.gmra.mxu3 %vm1087_vm3, %v5039_v51  ;;  %v1951_v4 = vadd.f32 0.18741608, %v1950_v53  ;;  %881 = vrot.lane.b32.xlu2 %v522_v48, %s4487_s23 }
 0x139   : > { %v1963_v55 = vmul.f32 %v1962_v44, %v5005_v12  ;;  %v5048_v56 = vadd.f32 %v4970_v62, %v1747_v52  ;;  %v1952_v20 = vmul.f32 %v1951_v4, %v5005_v12 }
 0x13b   : > { %v5050_v49 = vadd.f32 1.0, %v1963_v55  ;;  %v5053_v2 = vmul.f32 0.70710677, %v5048_v56  ;;  %v1953_v30 = vadd.f32 1.1283791, %v1952_v20 }
 0x13c   : > { %v886_v7 = vpop.permute.xlu1 %885 }
 0x13d   : > { %4363 = vrcp.f32 %v5050_v49  ;;  %v850_v8 = vpop.permute.xlu0 %849  ;;  %v1982_v11 = vmul.f32 %v5053_v2, %v5053_v2  ;;  %v5064_v16 = vsel %vm1027_vm2, %v1010_v6, %v886_v7  ;;  %v1974_v36 = vand.u32 2147483647, %v5050_v49  ;;  %v400_v7 = vld [vmem:[#allocation2 + $0xa8] sm:$0xff] }
 0x13e   : > { %v5061_v59 = vsel %vm1027_vm2, %v992_v58, %v850_v8  ;;  %4196 = vmatmul.msk.f32.gmra.mxu1 %vm1087_vm3, %v5002_v10  ;;  %v1976_v27 = vand.u32 2147483648, %v5050_v49  ;;  %vm1970_vm5 = vweird.f32 %v5050_v49  ;;  %v1954_v4 = vmul.f32 %v1953_v30, %v4994_v33 }
 0x13f   : > { %4146 = vmatmul.msk.f32.gmra.mxu0 %vm1087_vm3, %v5061_v59  ;;  %v5071_v19 = vmin.f32 %v1982_v11, 16.0  ;;  %4216 = vmatmul.msk.f32.gmra.mxu3 %vm1087_vm3, %v5064_v16  ;;  %vm1975_vm7 = vcmp.eq.f32.partialorder %v1974_v36, 8.507059e+37 }
 0x140   : > { %4243 = vmatmul.msk.f32.gmra.mxu2 %vm1087_vm3, %v5061_v59  ;;  %v1977_v58 = vor.u32 1.1754944e-38, %v1976_v27 }
 0x141   : > { %v1984_v21 = vmul.f32 2.1237322e-06, %v5071_v19  ;;  %v1995_v14 = vmul.f32 3.8918573e-05, %v5071_v19 }
 0x142   : > { %v1608_v53 = vpop.f32.mrf.mxu2 }
 0x143   : > { %v4364_v22 = vpop.eup %4363  ;;  %v1985_v10 = vadd.f32 0.00028619796, %v1984_v21  ;;  %v1996_v25 = vadd.f32 0.001143296, %v1995_v14  ;;  %v1432_v28 = vpop.f32.mrf.mxu1 }
 0x144   : > { %v1966_v24 = vmul.f32 %v4364_v22, %v5050_v49  ;;  %v852_v31 = vpop.permute.xlu1 %851  ;;  %vm1971_vm4 = vweird.f32 %v4364_v22 }
 0x145   : > { %v672_v12 = vpop.permute.xlu0 %671  ;;  %v1986_v26 = vmul.f32 %v1985_v10, %v5071_v19  ;;  %v1997_v41 = vmul.f32 %v1996_v25, %v5071_v19  ;;  %v1259_v43 = vpop.f32.mrf.mxu0  ;;  %v5088_v46 = vsel %vm1027_vm2, %v993_v37, %v852_v31  ;;  %vm1972_vm6 = vmor %vm1970_vm5, %vm1971_vm4  ;;  %v1846_v31 = vmul.f32 0.5, %v4991_v61 }
 0x146   : > { %v1967_v39 = vsub.f32 1.0, %v1966_v24  ;;  %v1011_v42 = vsel %vm316_vm0, %v417_v23, %v672_v12  ;;  %v1433_v45 = vadd.f32 %v1432_v28, %v1259_v43  ;;  %4197 = vmatmul.msk.f32.gmra.mxu1 %vm1087_vm3, %v5028_v34  ;;  %v369_v34 = vld [vmem:[%s4623_s28 + $0x20] sm:$0xff] }
 0x147   : > { %v5093_v47 = vsel %vm1027_vm2, %v1011_v42, %v888_v29  ;;  %v1987_v44 = vadd.f32 0.0036580483, %v1986_v26  ;;  %v1998_v52 = vadd.f32 0.014752088, %v1997_v41  ;;  %4147 = vmatmul.msk.f32.gmra.mxu0 %vm1087_vm3, %v5088_v46  ;;  %376 = vst.msk [vmem:[#allocation2 + $0x1a0] sm:$0xff] %vm316_vm0, %v369_v34  ;;  %v401_v41 = vld [vmem:[#allocation2 + $0xb0] sm:$0xff] }
 0x148   : > { %v1968_v50 = vmul.f32 %v4364_v22, %v1967_v39  ;;  %4244 = vmatmul.msk.f32.gmra.mxu2 %vm1087_vm3, %v5088_v46  ;;  %v1748_v55 = vadd.f32 %v1608_v53, %v1433_v45  ;;  %4217 = vmatmul.msk.f32.gmra.mxu3 %vm1087_vm3, %v5093_v47  ;;  %v370_v45 = vld [vmem:[%s4623_s28 + $0x28] sm:$0xff] }
 0x149   : > { %v1988_v63 = vmul.f32 %v1987_v44, %v5071_v19  ;;  %v1999_v1 = vmul.f32 %v1998_v52, %v5071_v19  ;;  %377 = vst.msk [vmem:[#allocation2 + $0x1a8] sm:$0xff] %vm316_vm0, %v370_v45 }
 0x14a   : > { %v1969_v60 = vadd.f32 %v4364_v22, %v1968_v50  ;;  %v5110_v6 = vadd.f32 %v4970_v62, %v1748_v55 }
 0x14b   : > { %v1989_v9 = vadd.f32 0.05243302, %v1988_v63  ;;  %v2000_v11 = vadd.f32 0.112945676, %v1999_v1  ;;  %v1435_v49 = vpop.f32.mrf.mxu1 }
 0x14c   : > { %v1973_v8 = vsel %vm1972_vm6, %v4364_v22, %v1969_v60  ;;  %v5113_v21 = vmul.f32 0.70710677, %v5110_v6  ;;  %v854_v18 = vpop.permute.xlu1 %853 }
 0x14d   : > { %v1978_v20 = vsel %vm1975_vm7, %v1977_v58, %v1973_v8  ;;  %v638_v14 = vpop.permute.xlu0 %637  ;;  %v2001_v33 = vmul.f32 %v2000_v11, %v5071_v19  ;;  %v1262_v10 = vpop.f32.mrf.mxu0  ;;  %v1990_v29 = vmul.f32 %v1989_v9, %v5071_v19  ;;  %v402_v11 = vld [vmem:[#allocation2 + $0xb8] sm:$0xff] }
 0x14e   : > { %v1979_v23 = vmul.f32 %v1978_v20, %v1954_v4  ;;  %v994_v24 = vsel %vm316_vm0, %v400_v7, %v638_v14  ;;  %v2022_v25 = vmul.f32 %v5113_v21, %v5113_v21  ;;  %4198 = vmatmul.msk.f32.gmra.mxu1 %vm1087_vm3, %v5061_v59  ;;  %v640_v59 = vpop.permute.xlu2 %639  ;;  %v484_v37 = vld [vmem:[#allocation2 + $0x199] sm:$0xff]  ;;  %v1436_v26 = vadd.f32 %v1435_v49, %v1262_v10 }
 0x14f   : > { %v5122_v22 = vsel %vm1027_vm2, %v994_v24, %v854_v18  ;;  %v2002_v30 = vadd.f32 0.4994258, %v2001_v33  ;;  %697 = vrot.lane.b32.xlu0 %v484_v37, %s4488_s24  ;;  %v538_v42 = vld [vmem:[#allocation2 + $0x19a] sm:$0xff]  ;;  %v1991_v50 = vadd.f32 0.18741608, %v1990_v29  ;;  %v995_v60 = vsel %vm316_vm0, %v401_v41, %v640_v59 }
 0x150   : > { %v4278_v28 = vclamps-f32 %v1979_v23, 1.0  ;;  %4148 = vmatmul.msk.f32.gmra.mxu0 %vm1087_vm3, %v5122_v22  ;;  %4245 = vmatmul.msk.f32.gmra.mxu2 %vm1087_vm3, %v5122_v22  ;;  %v5129_v36 = vmin.f32 %v2022_v25, 16.0  ;;  %v539_v10 = vld [vmem:[#allocation2 + $0x1a2] sm:$0xff] }
 0x151   : > { %4218 = vmatmul.msk.f32.gmra.mxu3 %vm1087_vm3, %v4706_v38  ;;  %v2003_v39 = vmul.f32 %v2002_v30, %v5071_v19  ;;  %913 = vrot.lane.b32.xlu1 %v538_v42, %s4487_s23  ;;  %v1992_v8 = vmul.f32 %v1991_v50, %v5071_v19  ;;  %v371_v19 = vld [vmem:[%s4623_s28 + $0x30] sm:$0xff] }
 0x152   : > { %v3862_v12 = vadd.f32 1.0, %v4278_v28  ;;  %v2024_v43 = vmul.f32 2.1237322e-06, %v5129_v36  ;;  %v2035_v27 = vmul.f32 3.8918573e-05, %v5129_v36  ;;  %378 = vst.msk [vmem:[#allocation2 + $0x1b0] sm:$0xff] %vm316_vm0, %v371_v19 }
 0x153   : > { %v1611_v61 = vpop.f32.mrf.mxu2  ;;  %v5147_v44 = vadd.f32 1.0, %v2003_v39  ;;  %v1438_v53 = vpop.f32.mrf.mxu1  ;;  %v1993_v28 = vadd.f32 1.1283791, %v1992_v8 }
 0x154   : > { %v3910_v48 = vmul.f32 %v3862_v12, %v1846_v31  ;;  %v1749_v52 = vadd.f32 %v1611_v61, %v1436_v26  ;;  %v2025_v55 = vadd.f32 0.00028619796, %v2024_v43  ;;  %v2036_v34 = vadd.f32 0.001143296, %v2035_v27  ;;  %v642_v49 = vpop.permute.xlu1 %641  ;;  %v403_v27 = vld [vmem:[#allocation2 + $0xc0] sm:$0xff] }
 0x155   : > { %v856_v63 = vpop.permute.xlu0 %855  ;;  %4365 = vrcp.f32 %v5147_v44  ;;  %v1265_v1 = vpop.f32.mrf.mxu0  ;;  %v996_v33 = vsel %vm316_vm0, %v402_v11, %v642_v49  ;;  %v2014_v42 = vand.u32 2147483647, %v5147_v44  ;;  %v1994_v45 = vmul.f32 %v1993_v28, %v5053_v2 }
 0x156   : > { %3958 = vst [vmem:[%s5141_s26] sm:$0xff] %v3910_v48  ;;  %v2026_v4 = vmul.f32 %v2025_v55, %v5129_v36  ;;  %v2037_v58 = vmul.f32 %v2036_v34, %v5129_v36  ;;  %v5156_v7 = vadd.f32 %v4970_v62, %v1749_v52  ;;  %4199 = vmatmul.msk.f32.gmra.mxu1 %vm1087_vm3, %v5088_v46  ;;  %v858_v24 = vpop.permute.xlu2 %857  ;;  %v2016_v48 = vand.u32 2147483648, %v5147_v44 }
 0x157   : > { %v5162_v9 = vsel %vm1027_vm2, %v995_v60, %v856_v63  ;;  %915 = vrot.lane.b32.xlu0 %v539_v10, %s4487_s23  ;;  %v5187_v26 = vsel %vm1027_vm2, %v996_v33, %v858_v24  ;;  %v1439_v2 = vadd.f32 %v1438_v53, %v1265_v1  ;;  %vm2010_vm9 = vweird.f32 %v5147_v44  ;;  %v5216_v24 = vpop.f32.mrf.mxu3 }
 0x158   : > { %v2027_v20 = vadd.f32 0.0036580483, %v2026_v4  ;;  %v2038_v14 = vadd.f32 0.014752088, %v2037_v58  ;;  %4149 = vmatmul.msk.f32.gmra.mxu0 %vm1087_vm3, %v5162_v9  ;;  %v5169_v18 = vmul.f32 0.70710677, %v5156_v7  ;;  %4246 = vmatmul.msk.f32.gmra.mxu2 %vm1087_vm3, %v5162_v9 }
 0x159   : > { %4219 = vmatmul.msk.f32.gmra.mxu3 %vm1087_vm3, %v4742_v0  ;;  %v486_v8 = vld [vmem:[#allocation2 + $0x1a9] sm:$0xff]  ;;  %vm2015_vm10 = vcmp.eq.f32.partialorder %v2014_v42, 8.507059e+37 }
 0x15a   : > { %v2028_v46 = vmul.f32 %v2027_v20, %v5129_v36  ;;  %v2039_v23 = vmul.f32 %v2038_v14, %v5129_v36  ;;  %v2062_v29 = vmul.f32 %v5169_v18, %v5169_v18  ;;  %701 = vrot.lane.b32.xlu1 %v486_v8, %s4488_s24  ;;  %v2017_v14 = vor.u32 1.1754944e-38, %v2016_v48 }
 0x15b   : > { %v4366_v25 = vpop.eup %4365  ;;  %v5182_v31 = vpop.f32.mrf.mxu1 }
 0x15c   : > { %v2006_v30 = vmul.f32 %v4366_v25, %v5147_v44  ;;  %v2029_v59 = vadd.f32 0.05243302, %v2028_v46  ;;  %v2040_v37 = vadd.f32 0.112945676, %v2039_v23  ;;  %v5184_v12 = vmin.f32 %v2062_v29, 16.0  ;;  %v860_v58 = vpop.permute.xlu1 %859 }
 0x15d   : > { %v1268_v39 = vpop.f32.mrf.mxu0  ;;  %v644_v61 = vpop.permute.xlu0 %643  ;;  %vm2011_vm8 = vweird.f32 %v4366_v25 }
 0x15e   : > { %v2007_v41 = vsub.f32 1.0, %v2006_v30  ;;  %v2041_v43 = vmul.f32 %v2040_v37, %v5129_v36  ;;  %4200 = vmatmul.msk.f32.gmra.mxu1 %vm1087_vm3, %v5122_v22  ;;  %v2064_v50 = vmul.f32 2.1237322e-06, %v5184_v12  ;;  %v2075_v52 = vmul.f32 3.8918573e-05, %v5184_v12  ;;  %vm2012_vm11 = vmor %vm2010_vm9, %vm2011_vm8 }
 0x15f   : > { %v2030_v34 = vmul.f32 %v2029_v59, %v5129_v36  ;;  %v997_v4 = vsel %vm316_vm0, %v403_v27, %v644_v61  ;;  %v646_v59 = vpop.permute.xlu2 %645  ;;  %v404_v27 = vld [vmem:[#allocation2 + $0xc8] sm:$0xff] }
 0x160   : > { %v2008_v55 = vmul.f32 %v4366_v25, %v2007_v41  ;;  %v2042_v60 = vadd.f32 0.4994258, %v2041_v43  ;;  %4150 = vmatmul.msk.f32.gmra.mxu0 %vm1087_vm3, %v5187_v26  ;;  %v2065_v22 = vadd.f32 0.00028619796, %v2064_v50  ;;  %v2076_v63 = vadd.f32 0.001143296, %v2075_v52  ;;  %4247 = vmatmul.msk.f32.gmra.mxu2 %vm1087_vm3, %v5187_v26 }
 0x161   : > { %4220 = vmatmul.msk.f32.gmra.mxu3 %vm1087_vm3, %v4773_v32  ;;  %v2031_v23 = vadd.f32 0.18741608, %v2030_v34  ;;  %v5214_v44 = vsel %vm1027_vm2, %v997_v4, %v860_v58 }
 0x162   : > { %v2009_v11 = vadd.f32 %v4366_v25, %v2008_v55  ;;  %v2043_v49 = vmul.f32 %v2042_v60, %v5129_v36  ;;  %v1614_v20 = vpop.f32.mrf.mxu2  ;;  %v2066_v53 = vmul.f32 %v2065_v22, %v5184_v12  ;;  %v2077_v1 = vmul.f32 %v2076_v63, %v5184_v12 }
 0x163   : > { %v1750_v19 = vadd.f32 %v1614_v20, %v1439_v2  ;;  %v5222_v41 = vpop.f32.mrf.mxu1  ;;  %v2032_v48 = vmul.f32 %v2031_v23, %v5129_v36  ;;  %v1847_v55 = vmul.f32 0.5, %v5048_v56  ;;  %v998_v22 = vsel %vm316_vm0, %v404_v27, %v646_v59  ;;  %v405_v59 = vld [vmem:[#allocation2 + $0xd0] sm:$0xff] }
 0x164   : > { %v2013_v46 = vsel %vm2012_vm11, %v4366_v25, %v2009_v11  ;;  %v5211_v33 = vadd.f32 1.0, %v2043_v49  ;;  %v2067_v28 = vadd.f32 0.0036580483, %v2066_v53  ;;  %v2078_v29 = vadd.f32 0.014752088, %v2077_v1  ;;  %v648_v56 = vpop.permute.xlu1 %647  ;;  %v5253_v53 = vpop.f32.mrf.mxu3 }
 0x165   : > { %v2018_v10 = vsel %vm2015_vm10, %v2017_v14, %v2013_v46  ;;  %v5219_v30 = vadd.f32 %v4970_v62, %v1750_v19  ;;  %v5224_v25 = vpop.f32.mrf.mxu0  ;;  %v862_v63 = vpop.permute.xlu0 %861 }
 0x166   : > { %v2019_v37 = vmul.f32 %v2018_v10, %v1994_v45  ;;  %4367 = vrcp.f32 %v5211_v33  ;;  %4201 = vmatmul.msk.f32.gmra.mxu1 %vm1087_vm3, %v5162_v9  ;;  %v2068_v42 = vmul.f32 %v2067_v28, %v5184_v12  ;;  %v2079_v43 = vmul.f32 %v2078_v29, %v5184_v12 }
 0x167   : > { %v5232_v50 = vmul.f32 0.70710677, %v5219_v30  ;;  %v1442_v9 = vadd.f32 %v5182_v31, %v1268_v39  ;;  %v2033_v31 = vadd.f32 1.1283791, %v2032_v48  ;;  %v5251_v14 = vsel %vm1027_vm2, %v998_v22, %v862_v63 }
 0x168   : > { %v4279_v61 = vclamps-f32 %v2019_v37, 1.0  ;;  %4151 = vmatmul.msk.f32.gmra.mxu0 %vm1087_vm3, %v5214_v44  ;;  %v2069_v45 = vadd.f32 0.05243302, %v2068_v42  ;;  %v2080_v52 = vadd.f32 0.112945676, %v2079_v43  ;;  %4248 = vmatmul.msk.f32.gmra.mxu2 %vm1087_vm3, %v5214_v44  ;;  %v2056_v28 = vand.u32 2147483648, %v5211_v33  ;;  %v864_v37 = vpop.permute.xlu2 %863 }
 0x169   : > { %4221 = vmatmul.msk.f32.gmra.mxu3 %vm1087_vm3, %v4815_v5  ;;  %v2102_v36 = vmul.f32 %v5232_v50, %v5232_v50  ;;  %v2054_v10 = vand.u32 2147483647, %v5211_v33  ;;  %v2034_v42 = vmul.f32 %v2033_v31, %v5113_v21  ;;  %vm2050_vm13 = vweird.f32 %v5211_v33 }
 0x16a   : > { %v3863_v34 = vadd.f32 1.0, %v4279_v61  ;;  %v1617_v60 = vpop.f32.mrf.mxu2  ;;  %v2081_v2 = vmul.f32 %v2080_v52, %v5184_v12  ;;  %v2070_v39 = vmul.f32 %v2069_v45, %v5184_v12  ;;  %v1445_v63 = vadd.f32 %v5222_v41, %v5224_v25 }
 0x16b   : > { %v1751_v4 = vadd.f32 %v1617_v60, %v1442_v9  ;;  %v5247_v11 = vmin.f32 %v2102_v36, 16.0  ;;  %v5267_v48 = vpop.f32.mrf.mxu1  ;;  %v999_v36 = vsel %vm316_vm0, %v405_v59, %v648_v56  ;;  %vm5286_vm14 = vcmp.eq.f32.partialorder %v2054_v10, 8.507059e+37 }
 0x16c   : > { %v4368_v58 = vpop.eup %4367  ;;  %v3911_v8 = vmul.f32 %v3863_v34, %v1847_v55  ;;  %v2082_v20 = vadd.f32 0.4994258, %v2081_v2  ;;  %v2071_v43 = vadd.f32 0.18741608, %v2070_v39  ;;  %v406_v2 = vld [vmem:[#allocation2 + $0xd8] sm:$0xff]  ;;  %v5301_v41 = vpop.f32.mrf.mxu3  ;;  %v1848_v25 = vmul.f32 0.5, %v5110_v6 }
 0x16d   : > { %v2046_v49 = vmul.f32 %v4368_v58, %v5211_v33  ;;  %v2104_v1 = vmul.f32 2.1237322e-06, %v5247_v11  ;;  %v2115_v19 = vmul.f32 3.8918573e-05, %v5247_v11  ;;  %v5259_v46 = vadd.f32 %v4970_v62, %v1751_v4  ;;  %v5269_v45 = vpop.f32.mrf.mxu0  ;;  %v650_v4 = vpop.permute.xlu0 %649  ;;  %v485_v33 = vld [vmem:[#allocation2 + $0x1a1] sm:$0xff] }
 0x16e   : > { %3959 = vst [vmem:[%s5141_s26 + $0x8] sm:$0xff] %v3911_v8  ;;  %4202 = vmatmul.msk.f32.gmra.mxu1 %vm1087_vm3, %v5187_v26  ;;  %v2083_v29 = vmul.f32 %v2082_v20, %v5184_v12  ;;  %vm2051_vm12 = vweird.f32 %v4368_v58  ;;  %v2057_v8 = vor.u32 1.1754944e-38, %v2056_v28  ;;  %v2072_v31 = vmul.f32 %v2071_v43, %v5184_v12  ;;  %699 = vrot.lane.b32.xlu2 %v485_v33, %s4488_s24  ;;  %v407_v6 = vld [vmem:[#allocation2 + $0xe0] sm:$0xff] }
 0x16f   : > { %v2047_v23 = vsub.f32 1.0, %v2046_v49  ;;  %v2105_v27 = vadd.f32 0.00028619796, %v2104_v1  ;;  %v2116_v61 = vadd.f32 0.001143296, %v2115_v19  ;;  %vm2052_vm15 = vmor %vm2050_vm13, %vm2051_vm12  ;;  %v5299_v19 = vsel %vm1027_vm2, %v999_v36, %v864_v37 }
 0x170   : > { %4152 = vmatmul.msk.f32.gmra.mxu0 %vm1087_vm3, %v5251_v14  ;;  %v5275_v52 = vadd.f32 1.0, %v2083_v29  ;;  %v5278_v9 = vmul.f32 0.70710677, %v5259_v46  ;;  %4249 = vmatmul.msk.f32.gmra.mxu2 %vm1087_vm3, %v5251_v14  ;;  %v1000_v10 = vsel %vm316_vm0, %v406_v2, %v650_v4  ;;  %v652_v43 = vpop.permute.xlu2 %651 }
 0x171   : > { %4222 = vmatmul.msk.f32.gmra.mxu3 %vm1087_vm3, %v4831_v17  ;;  %v2048_v26 = vmul.f32 %v4368_v58, %v2047_v23  ;;  %v2106_v21 = vmul.f32 %v2105_v27, %v5247_v11  ;;  %v2117_v55 = vmul.f32 %v2116_v61, %v5247_v11  ;;  %v5317_v27 = vmul.f32 0.5, %v5156_v7 }
 0x172   : > { %4369 = vrcp.f32 %v5275_v52  ;;  %v2142_v56 = vmul.f32 %v5278_v9, %v5278_v9  ;;  %v2073_v61 = vadd.f32 1.1283791, %v2072_v31  ;;  %v1001_v2 = vsel %vm316_vm0, %v407_v6, %v652_v43 }
 0x173   : > { %v1620_v34 = vpop.f32.mrf.mxu2  ;;  %v2049_v60 = vadd.f32 %v4368_v58, %v2048_v26  ;;  %v2107_v39 = vadd.f32 0.0036580483, %v2106_v21  ;;  %v2118_v20 = vadd.f32 0.014752088, %v2117_v55  ;;  %v5320_v26 = vmul.f32 0.5, %v5219_v30  ;;  %v5335_v22 = vpop.f32.mrf.mxu1 }
 0x174   : > { %v1752_v1 = vadd.f32 %v1620_v34, %v1445_v63  ;;  %v5311_v59 = vmin.f32 %v2142_v56, 16.0  ;;  %v2094_v56 = vand.u32 2147483647, %v5275_v52  ;;  %vm2090_vm4 = vweird.f32 %v5275_v52 }
 0x175   : > { %v2053_v49 = vsel %vm2052_vm15, %v4368_v58, %v2049_v60  ;;  %v2108_v12 = vmul.f32 %v2107_v39, %v5247_v11  ;;  %v866_v58 = vpop.permute.xlu1 %865  ;;  %v2119_v29 = vmul.f32 %v2118_v20, %v5247_v11  ;;  %v5337_v63 = vpop.f32.mrf.mxu0 }
 0x176   : > { %v2058_v23 = vsel %vm5286_vm14, %v2057_v8, %v2053_v49  ;;  %4203 = vmatmul.msk.f32.gmra.mxu1 %vm1087_vm3, %v5214_v44  ;;  %v5314_v37 = vadd.f32 %v4970_v62, %v1752_v1  ;;  %v2144_v34 = vmul.f32 2.1237322e-06, %v5311_v59  ;;  %v5330_v7 = vsel %vm1027_vm2, %v1000_v10, %v866_v58  ;;  %v540_v58 = vld [vmem:[#allocation2 + $0x1aa] sm:$0xff] }
 0x177   : > { %v2059_v28 = vmul.f32 %v2058_v23, %v2034_v42  ;;  %v2109_v44 = vadd.f32 0.05243302, %v2108_v12  ;;  %v2120_v55 = vadd.f32 0.112945676, %v2119_v29  ;;  %v2155_v60 = vmul.f32 3.8918573e-05, %v5311_v59  ;;  %v5349_v29 = vpop.f32.mrf.mxu3  ;;  %917 = vrot.lane.b32.xlu2 %v540_v58, %s4487_s23 }
 0x178   : > { %4153 = vmatmul.msk.f32.gmra.mxu0 %vm1087_vm3, %v5299_v19  ;;  %v4370_v42 = vpop.eup %4369  ;;  %4250 = vmatmul.msk.f32.gmra.mxu2 %vm1087_vm3, %v5299_v19  ;;  %v2145_v8 = vadd.f32 0.00028619796, %v2144_v34  ;;  %v5342_v31 = vmul.f32 0.70710677, %v5314_v37  ;;  %v2096_v49 = vand.u32 2147483648, %v5275_v52  ;;  %vm2095_vm6 = vcmp.eq.f32.partialorder %v2094_v56, 8.507059e+37 }
 0x179   : > { %4223 = vmatmul.msk.f32.gmra.mxu3 %vm1087_vm3, %v4856_v35  ;;  %v4280_v21 = vclamps-f32 %v2059_v28, 1.0  ;;  %v2086_v30 = vmul.f32 %v4370_v42, %v5275_v52  ;;  %v2110_v36 = vmul.f32 %v2109_v44, %v5247_v11  ;;  %v2121_v33 = vmul.f32 %v2120_v55, %v5247_v11  ;;  %v868_v44 = vpop.permute.xlu0 %867 }
 0x17a   : > { %v2156_v20 = vadd.f32 0.001143296, %v2155_v60  ;;  %v2146_v12 = vmul.f32 %v2145_v8, %v5311_v59  ;;  %v2182_v10 = vmul.f32 %v5342_v31, %v5342_v31  ;;  %vm2091_vm1 = vweird.f32 %v4370_v42 }
 0x17b   : > { %v3864_v4 = vadd.f32 1.0, %v4280_v21  ;;  %v2087_v39 = vsub.f32 1.0, %v2086_v30  ;;  %v2122_v23 = vadd.f32 0.4994258, %v2121_v33  ;;  %v2111_v6 = vadd.f32 0.18741608, %v2110_v36  ;;  %vm2092_vm5 = vmor %vm2090_vm4, %vm2091_vm1  ;;  %v1453_v56 = vpop.f32.mrf.mxu1 }
 0x17c   : > { %v2157_v43 = vmul.f32 %v2156_v20, %v5311_v59  ;;  %v2147_v55 = vadd.f32 0.0036580483, %v2146_v12  ;;  %v5357_v34 = vmin.f32 %v2182_v10, 16.0  ;;  %v2097_v36 = vor.u32 1.1754944e-38, %v2096_v49  ;;  %v408_v20 = vld [vmem:[#allocation2 + $0xe8] sm:$0xff]  ;;  %v870_v10 = vpop.permute.xlu2 %869 }
 0x17d   : > { %v3912_v1 = vmul.f32 %v3864_v4, %v1848_v25  ;;  %v2088_v28 = vmul.f32 %v4370_v42, %v2087_v39  ;;  %v2074_v25 = vmul.f32 %v2073_v61, %v5169_v18  ;;  %v2123_v21 = vmul.f32 %v2122_v23, %v5247_v11  ;;  %v654_v52 = vpop.permute.xlu1 %653 }
 0x17e   : > { %4204 = vmatmul.msk.f32.gmra.mxu1 %vm1087_vm3, %v5251_v14  ;;  %v2158_v60 = vadd.f32 0.014752088, %v2157_v43  ;;  %v2148_v14 = vmul.f32 %v2147_v55, %v5311_v59  ;;  %v2184_v61 = vmul.f32 2.1237322e-06, %v5357_v34  ;;  %v2195_v4 = vmul.f32 3.8918573e-05, %v5357_v34  ;;  %v1280_v43 = vpop.f32.mrf.mxu0 }
 0x17f   : > { %3960 = vst [vmem:[%s5141_s26 + $0x10] sm:$0xff] %v3912_v1  ;;  %v2089_v30 = vadd.f32 %v4370_v42, %v2088_v28  ;;  %v5366_v18 = vadd.f32 1.0, %v2123_v21  ;;  %v2112_v8 = vmul.f32 %v2111_v6, %v5247_v11  ;;  %v5377_v23 = vmul.f32 0.5, %v5259_v46 }
 0x180   : > { %4154 = vmatmul.msk.f32.gmra.mxu0 %vm1087_vm3, %v5330_v7  ;;  %4251 = vmatmul.msk.f32.gmra.mxu2 %vm1087_vm3, %v5330_v7  ;;  %v2159_v39 = vmul.f32 %v2158_v60, %v5311_v59  ;;  %v1448_v12 = vadd.f32 %v5267_v48, %v5269_v45  ;;  %v2149_v28 = vadd.f32 0.05243302, %v2148_v14  ;;  %v5382_v11 = vsel %vm1027_vm2, %v1001_v2, %v868_v44  ;;  %v409_v45 = vld [vmem:[#allocation2 + $0xf0] sm:$0xff] }
 0x181   : > { %4224 = vmatmul.msk.f32.gmra.mxu3 %vm1087_vm3, %v4886_v54  ;;  %v2093_v33 = vsel %vm2092_vm5, %v4370_v42, %v2089_v30  ;;  %4371 = vrcp.f32 %v5366_v18  ;;  %v2185_v6 = vadd.f32 0.00028619796, %v2184_v61  ;;  %v2196_v21 = vadd.f32 0.001143296, %v2195_v4 }
 0x182   : > { %v1623_v49 = vpop.f32.mrf.mxu2  ;;  %v2098_v1 = vsel %vm2095_vm6, %v2097_v36, %v2093_v33  ;;  %v2160_v42 = vadd.f32 0.112945676, %v2159_v39  ;;  %v1002_v30 = vsel %vm316_vm0, %v408_v20, %v654_v52  ;;  %v2113_v46 = vadd.f32 1.1283791, %v2112_v8  ;;  %v5396_v52 = vpop.f32.mrf.mxu3 }
 0x183   : > { %v2099_v58 = vmul.f32 %v2098_v1, %v2074_v25  ;;  %v1753_v55 = vadd.f32 %v1623_v49, %v1448_v12  ;;  %v2150_v60 = vmul.f32 %v2149_v28, %v5311_v59  ;;  %v656_v25 = vpop.permute.xlu0 %655  ;;  %v2186_v14 = vmul.f32 %v2185_v6, %v5357_v34 }
 0x184   : > { %v2161_v48 = vmul.f32 %v2160_v42, %v5311_v59  ;;  %v2197_v2 = vmul.f32 %v2196_v21, %v5357_v34  ;;  %v1451_v44 = vadd.f32 %v5335_v22, %v5337_v63  ;;  %v5405_v49 = vadd.f32 %v1453_v56, %v1280_v43 }
 0x185   : > { %v4281_v36 = vclamps-f32 %v2099_v58, 1.0  ;;  %v5394_v61 = vadd.f32 %v4970_v62, %v1753_v55  ;;  %v2151_v33 = vadd.f32 0.18741608, %v2150_v60  ;;  %v2187_v22 = vadd.f32 0.0036580483, %v2186_v14  ;;  %v872_v21 = vpop.permute.xlu1 %871  ;;  %v1456_v14 = vpop.f32.mrf.mxu1 }
 0x186   : > { %4205 = vmatmul.msk.f32.gmra.mxu1 %vm1087_vm3, %v5299_v19  ;;  %v2162_v8 = vadd.f32 0.4994258, %v2161_v48  ;;  %v5403_v19 = vsel %vm1027_vm2, %v1002_v30, %v870_v10  ;;  %v2198_v63 = vadd.f32 0.014752088, %v2197_v2  ;;  %v1003_v20 = vsel %vm316_vm0, %v409_v45, %v656_v25  ;;  %v1283_v2 = vpop.f32.mrf.mxu0 }
 0x187   : > { %v3865_v4 = vadd.f32 1.0, %v4281_v36  ;;  %v4372_v39 = vpop.eup %4371  ;;  %v2114_v12 = vmul.f32 %v2113_v46, %v5232_v50  ;;  %v2152_v10 = vmul.f32 %v2151_v33, %v5311_v59  ;;  %v2188_v6 = vmul.f32 %v2187_v22, %v5357_v34  ;;  %v410_v36 = vld [vmem:[#allocation2 + $0xf8] sm:$0xff]  ;;  %v658_v46 = vpop.permute.xlu2 %657 }
 0x188   : > { %4155 = vmatmul.msk.f32.gmra.mxu0 %vm1087_vm3, %v5382_v11  ;;  %4252 = vmatmul.msk.f32.gmra.mxu2 %vm1087_vm3, %v5382_v11  ;;  %v2126_v58 = vmul.f32 %v4372_v39, %v5366_v18  ;;  %v2163_v42 = vmul.f32 %v2162_v8, %v5311_v59  ;;  %v2199_v56 = vmul.f32 %v2198_v63, %v5357_v34  ;;  %v5418_v43 = vmul.f32 0.70710677, %v5394_v61 }
 0x189   : > { %4225 = vmatmul.msk.f32.gmra.mxu3 %vm1087_vm3, %v4902_v3  ;;  %v3913_v1 = vmul.f32 %v3865_v4, %v5317_v27  ;;  %v2134_v27 = vand.u32 2147483647, %v5366_v18  ;;  %v2136_v50 = vand.u32 2147483648, %v5366_v18  ;;  %v2189_v59 = vadd.f32 0.05243302, %v2188_v6 }
 0x18a   : > { %v1626_v28 = vpop.f32.mrf.mxu2  ;;  %v2127_v55 = vsub.f32 1.0, %v2126_v58  ;;  %v5423_v60 = vadd.f32 1.0, %v2163_v42  ;;  %v2200_v48 = vadd.f32 0.112945676, %v2199_v56  ;;  %v2222_v45 = vmul.f32 %v5418_v43, %v5418_v43 }
 0x18b   : > { %3961 = vst [vmem:[%s5141_s26 + $0x18] sm:$0xff] %v3913_v1  ;;  %v1754_v30 = vadd.f32 %v1626_v28, %v1451_v44  ;;  %vm2131_vm7 = vweird.f32 %v4372_v39  ;;  %v5433_v44 = vsel %vm1027_vm2, %v1003_v20, %v872_v21  ;;  %vm2130_vm8 = vweird.f32 %v5366_v18  ;;  %v5454_v28 = vpop.f32.mrf.mxu3 }
 0x18c   : > { %v2128_v25 = vmul.f32 %v4372_v39, %v2127_v55  ;;  %v2153_v33 = vadd.f32 1.1283791, %v2152_v10  ;;  %4373 = vrcp.f32 %v5423_v60  ;;  %v1004_v8 = vsel %vm316_vm0, %v410_v36, %v658_v46  ;;  %vm2132_vm9 = vmor %vm2130_vm8, %vm2131_vm7 }
 0x18d   : > { %v5428_v4 = vadd.f32 %v4970_v62, %v1754_v30  ;;  %v2190_v63 = vmul.f32 %v2189_v59, %v5357_v34  ;;  %v2201_v1 = vmul.f32 %v2200_v48, %v5357_v34  ;;  %v5440_v62 = vmin.f32 %v2222_v45, 16.0 }
 0x18e   : > { %4206 = vmatmul.msk.f32.gmra.mxu1 %vm1087_vm3, %v5330_v7  ;;  %v2129_v22 = vadd.f32 %v4372_v39, %v2128_v25  ;;  %v874_v7 = vpop.permute.xlu0 %873  ;;  %vm2135_vm10 = vcmp.eq.f32.partialorder %v2134_v27, 8.507059e+37  ;;  %v2137_v18 = vor.u32 1.1754944e-38, %v2136_v50  ;;  %v5447_v20 = vadd.f32 %v1456_v14, %v1283_v2 }
 0x18f   : > { %v5450_v58 = vmul.f32 0.70710677, %v5428_v4  ;;  %v2191_v42 = vadd.f32 0.18741608, %v2190_v63  ;;  %v2202_v6 = vadd.f32 0.4994258, %v2201_v1  ;;  %v5461_v30 = vsel %vm1027_vm2, %v1004_v8, %v874_v7 }
 0x190   : > { %4156 = vmatmul.msk.f32.gmra.mxu0 %vm1087_vm3, %v5403_v19  ;;  %4253 = vmatmul.msk.f32.gmra.mxu2 %vm1087_vm3, %v5403_v19  ;;  %v2133_v10 = vsel %vm2132_vm9, %v4372_v39, %v2129_v22  ;;  %v2224_v56 = vmul.f32 2.1237322e-06, %v5440_v62  ;;  %v2235_v27 = vmul.f32 3.8918573e-05, %v5440_v62  ;;  %v2154_v46 = vmul.f32 %v2153_v33, %v5278_v9 }
 0x191   : > { %4226 = vmatmul.msk.f32.gmra.mxu3 %vm1087_vm3, %v4927_v15  ;;  %v2138_v55 = vsel %vm2135_vm10, %v2137_v18, %v2133_v10  ;;  %v2262_v50 = vmul.f32 %v5450_v58, %v5450_v58  ;;  %v2203_v39 = vmul.f32 %v2202_v6, %v5357_v34  ;;  %v2192_v45 = vmul.f32 %v2191_v42, %v5357_v34  ;;  %v5489_v10 = vld [vmem:[%s7187_s3] ss:$0 sm:$0xff] }
 0x192   : > { %v2139_v36 = vmul.f32 %v2138_v55, %v2114_v12  ;;  %v2225_v59 = vadd.f32 0.00028619796, %v2224_v56  ;;  %v4374_v48 = vpop.eup %4373  ;;  %v2236_v25 = vadd.f32 0.001143296, %v2235_v27  ;;  %v2174_v8 = vand.u32 2147483647, %v5423_v60  ;;  %v660_v56 = vpop.permute.xlu1 %659 }
 0x193   : > { %v1629_v21 = vpop.f32.mrf.mxu2  ;;  %v5466_v14 = vmin.f32 %v2262_v50, 16.0  ;;  %v2166_v63 = vmul.f32 %v4374_v48, %v5423_v60  ;;  %v2176_v12 = vand.u32 2147483648, %v5423_v60  ;;  %v5474_v9 = vadd.f32 1.0, %v2203_v39  ;;  %v411_v6 = vld [vmem:[#allocation2 + $0x100] sm:$0xff]  ;;  %v5497_v55 = vpop.f32.mrf.mxu3 }
 0x194   : > { %v1755_v2 = vadd.f32 %v1629_v21, %v5405_v49  ;;  %v4282_v22 = vclamps-f32 %v2139_v36, 1.0  ;;  %v2226_v33 = vmul.f32 %v2225_v59, %v5440_v62  ;;  %v2237_v34 = vmul.f32 %v2236_v25, %v5440_v62 }
 0x195   : > { %v2264_v1 = vmul.f32 2.1237322e-06, %v5466_v14  ;;  %v2167_v49 = vsub.f32 1.0, %v2166_v63  ;;  %vm2170_vm11 = vweird.f32 %v5423_v60  ;;  %v2275_v18 = vmul.f32 3.8918573e-05, %v5466_v14 }
 0x196   : > { %4207 = vmatmul.msk.f32.gmra.mxu1 %vm1087_vm3, %v5382_v11  ;;  %v3866_v7 = vadd.f32 1.0, %v4282_v22  ;;  %vm2171_vm12 = vweird.f32 %v4374_v48  ;;  %v2193_v11 = vadd.f32 1.1283791, %v2192_v45  ;;  %4375 = vrcp.f32 %v5474_v9 }
 0x197   : > { %v5492_v42 = vadd.f32 %v5489_v10, %v1755_v2  ;;  %v2168_v21 = vmul.f32 %v4374_v48, %v2167_v49  ;;  %v2227_v27 = vadd.f32 0.0036580483, %v2226_v33  ;;  %v2238_v50 = vadd.f32 0.014752088, %v2237_v34  ;;  %vm2172_vm14 = vmor %vm2170_vm11, %vm2171_vm12 }
 0x198   : > { %4157 = vmatmul.msk.f32.gmra.mxu0 %vm1087_vm3, %v5433_v44  ;;  %4254 = vmatmul.msk.f32.gmra.mxu2 %vm1087_vm3, %v5433_v44  ;;  %vm5499_vm13 = vcmp.eq.f32.partialorder %v2174_v8, 8.507059e+37  ;;  %v2177_v39 = vor.u32 1.1754944e-38, %v2176_v12  ;;  %v2265_v59 = vadd.f32 0.00028619796, %v2264_v1  ;;  %v2276_v45 = vadd.f32 0.001143296, %v2275_v18 }
 0x199   : > { %4266 = vmatmul.msk.f32.vlgmr.msra.gmra.mxu3 %vm1087_vm3, %v4815_v5  ;;  %v3914_v5 = vmul.f32 %v3866_v7, %v5320_v26  ;;  %v2169_v25 = vadd.f32 %v4374_v48, %v2168_v21  ;;  %v2228_v2 = vmul.f32 %v2227_v27, %v5440_v62  ;;  %v2239_v22 = vmul.f32 %v2238_v50, %v5440_v62 }
 0x19a   : > { %v1005_v26 = vsel %vm316_vm0, %v411_v6, %v660_v56  ;;  %v5511_v63 = vmul.f32 %v2193_v11, %v5342_v31  ;;  %v2266_v8 = vmul.f32 %v2265_v59, %v5466_v14  ;;  %v2277_v12 = vmul.f32 %v2276_v45, %v5466_v14 }
 0x19b   : > { %3962 = vst [vmem:[%s5141_s26 + $0x20] sm:$0xff] %v3914_v5  ;;  %v5516_v33 = vmul.f32 0.70710677, %v5492_v42  ;;  %v2173_v34 = vsel %vm2172_vm14, %v4374_v48, %v2169_v25  ;;  %v2214_v1 = vand.u32 2147483647, %v5474_v9  ;;  %v2216_v48 = vand.u32 2147483648, %v5474_v9 }
 0x19c   : > { %v2229_v7 = vadd.f32 0.05243302, %v2228_v2  ;;  %v2240_v49 = vadd.f32 0.112945676, %v2239_v22  ;;  %v4376_v60 = vpop.eup %4375  ;;  %v2178_v31 = vsel %vm5499_vm13, %v2177_v39, %v2173_v34  ;;  %v2267_v18 = vadd.f32 0.0036580483, %v2266_v8  ;;  %v1286_v2 = vpop.f32.mrf.mxu0 }
 0x19d   : > { %v2278_v11 = vadd.f32 0.014752088, %v2277_v12  ;;  %v2302_v6 = vmul.f32 %v5516_v33, %v5516_v33  ;;  %v2179_v56 = vmul.f32 %v2178_v31, %v2154_v46  ;;  %v2206_v5 = vmul.f32 %v4376_v60, %v5474_v9  ;;  %v5535_v46 = vpop.f32.mrf.mxu1  ;;  %v5544_v31 = vpop.f32.mrf.mxu3 }
 0x19e   : > { %4208 = vmatmul.msk.f32.gmra.mxu1 %vm1087_vm3, %v5403_v19  ;;  %v2230_v21 = vmul.f32 %v2229_v7, %v5440_v62  ;;  %v876_v19 = vpop.permute.xlu2 %875  ;;  %v2241_v27 = vmul.f32 %v2240_v49, %v5440_v62  ;;  %v2268_v50 = vmul.f32 %v2267_v18, %v5466_v14  ;;  %vm2211_vm15 = vweird.f32 %v4376_v60 }
 0x19f   : > { %v2279_v36 = vmul.f32 %v2278_v11, %v5466_v14  ;;  %v5537_v39 = vmin.f32 %v2302_v6, 16.0  ;;  %v4283_v59 = vclamps-f32 %v2179_v56, 1.0  ;;  %v2207_v45 = vsub.f32 1.0, %v2206_v5 }
 0x1a0   : > { %4158 = vmatmul.msk.f32.gmra.mxu0 %vm1087_vm3, %v5461_v30  ;;  %4255 = vmatmul.msk.f32.gmra.mxu2 %vm1087_vm3, %v5461_v30  ;;  %v2231_v25 = vadd.f32 0.18741608, %v2230_v21  ;;  %v2242_v22 = vadd.f32 0.4994258, %v2241_v27  ;;  %v2269_v8 = vadd.f32 0.05243302, %v2268_v50  ;;  %v5542_v34 = vsel %vm1027_vm2, %v1005_v26, %v876_v19 }
 0x1a1   : > { %4267 = vmatmul.msk.f32.gmra.mxu3 %vm1087_vm3, %v4831_v17  ;;  %v2280_v12 = vadd.f32 0.112945676, %v2279_v36  ;;  %v3867_v7 = vadd.f32 1.0, %v4283_v59  ;;  %v2208_v49 = vmul.f32 %v4376_v60, %v2207_v45  ;;  %v2304_v18 = vmul.f32 2.1237322e-06, %v5537_v39 }
 0x1a2   : > { %v1632_v17 = vpop.f32.mrf.mxu2  ;;  %v2243_v6 = vmul.f32 %v2242_v22, %v5440_v62  ;;  %v2270_v56 = vmul.f32 %v2269_v8, %v5466_v14  ;;  %v2315_v21 = vmul.f32 3.8918573e-05, %v5537_v39  ;;  %vm2210_vm1 = vweird.f32 %v5474_v9 }
 0x1a3   : > { %v1756_v11 = vadd.f32 %v1632_v17, %v5447_v20  ;;  %v2281_v5 = vmul.f32 %v2280_v12, %v5466_v14  ;;  %v3915_v26 = vmul.f32 %v3867_v7, %v5377_v23  ;;  %v2209_v19 = vadd.f32 %v4376_v60, %v2208_v49  ;;  %vm2212_vm4 = vmor %vm2210_vm1, %vm2211_vm15 }
 0x1a4   : > { %v2305_v27 = vadd.f32 0.00028619796, %v2304_v18  ;;  %v2217_v20 = vor.u32 1.1754944e-38, %v2216_v48  ;;  %v2232_v50 = vmul.f32 %v2231_v25, %v5440_v62  ;;  %v5558_v36 = vadd.f32 1.0, %v2243_v6  ;;  %v1289_v6 = vpop.f32.mrf.mxu0 }
 0x1a5   : > { %v2282_v59 = vadd.f32 0.4994258, %v2281_v5  ;;  %3963 = vst [vmem:[%s5141_s26 + $0x28] sm:$0xff] %v3915_v26  ;;  %v2213_v45 = vsel %vm2212_vm4, %v4376_v60, %v2209_v19  ;;  %vm2215_vm5 = vcmp.eq.f32.partialorder %v2214_v1, 8.507059e+37  ;;  %v2316_v17 = vadd.f32 0.001143296, %v2315_v21  ;;  %v1462_v12 = vpop.f32.mrf.mxu1  ;;  %v5589_v19 = vpop.f32.mrf.mxu3 }
 0x1a6   : > { %4209 = vmatmul.msk.f32.gmra.mxu1 %vm1087_vm3, %v5433_v44  ;;  %v2306_v23 = vmul.f32 %v2305_v27, %v5537_v39  ;;  %v2218_v9 = vsel %vm2215_vm5, %v2217_v20, %v2213_v45  ;;  %4377 = vrcp.f32 %v5558_v36  ;;  %v2271_v44 = vadd.f32 0.18741608, %v2270_v56 }
 0x1a7   : > { %v5566_v48 = vadd.f32 %v5489_v10, %v1756_v11  ;;  %v2219_v62 = vmul.f32 %v2218_v9, %v5511_v63  ;;  %v2283_v1 = vmul.f32 %v2282_v59, %v5466_v14  ;;  %v1852_v60 = vmul.f32 0.5, %v5314_v37 }
 0x1a8   : > { %4159 = vmatmul.msk.f32.gmra.mxu0 %vm1087_vm3, %v5542_v34  ;;  %4256 = vmatmul.msk.f32.gmra.mxu2 %vm1087_vm3, %v5542_v34  ;;  %v2233_v25 = vadd.f32 1.1283791, %v2232_v50  ;;  %v2307_v22 = vadd.f32 0.0036580483, %v2306_v23  ;;  %v2317_v8 = vmul.f32 %v2316_v17, %v5537_v39  ;;  %v2254_v49 = vand.u32 2147483647, %v5558_v36 }
 0x1a9   : > { %4268 = vmatmul.msk.f32.gmra.mxu3 %vm1087_vm3, %v4856_v35  ;;  %v4284_v7 = vclamps-f32 %v2219_v62, 1.0  ;;  %v2256_v18 = vand.u32 2147483648, %v5558_v36  ;;  %v5578_v11 = vadd.f32 1.0, %v2283_v1  ;;  %v2272_v63 = vmul.f32 %v2271_v44, %v5466_v14  ;;  %v412_v23 = vld [vmem:[#allocation2 + $0x108] sm:$0xff] }
 0x1aa   : > { %v1635_v35 = vpop.f32.mrf.mxu2  ;;  %v2308_v56 = vmul.f32 %v2307_v22, %v5537_v39  ;;  %v2318_v5 = vadd.f32 0.014752088, %v2317_v8  ;;  %v5583_v37 = vmul.f32 0.70710677, %v5566_v48  ;;  %v5586_v26 = vmul.f32 0.5, %v5394_v61  ;;  %v662_v61 = vpop.permute.xlu0 %661 }
 0x1ab   : > { %v3868_v21 = vadd.f32 1.0, %v4284_v7  ;;  %4379 = vrcp.f32 %v5578_v11  ;;  %v1460_v27 = vadd.f32 %v5535_v46, %v1286_v2  ;;  %v2234_v20 = vmul.f32 %v2233_v25, %v5418_v43  ;;  %v878_v2 = vpop.permute.xlu1 %877 }
 0x1ac   : > { %v4378_v14 = vpop.eup %4377  ;;  %v2309_v50 = vadd.f32 0.05243302, %v2308_v56  ;;  %v2319_v59 = vmul.f32 %v2318_v5, %v5537_v39  ;;  %v1463_v45 = vadd.f32 %v1462_v12, %v1289_v6  ;;  %vm2250_vm6 = vweird.f32 %v5558_v36 }
 0x1ad   : > { %v3916_v17 = vmul.f32 %v3868_v21, %v1852_v60  ;;  %v2246_v9 = vmul.f32 %v4378_v14, %v5558_v36  ;;  %v2342_v46 = vmul.f32 %v5583_v37, %v5583_v37  ;;  %vm5600_vm7 = vcmp.eq.f32.partialorder %v2254_v49, 8.507059e+37 }
 0x1ae   : > { %4210 = vmatmul.msk.f32.gmra.mxu1 %vm1087_vm3, %v5461_v30  ;;  %v2257_v43 = vor.u32 1.1754944e-38, %v2256_v18  ;;  %v2273_v44 = vadd.f32 1.1283791, %v2272_v63  ;;  %v2320_v62 = vadd.f32 0.112945676, %v2319_v59  ;;  %v1757_v25 = vadd.f32 %v1635_v35, %v1460_v27  ;;  %v5624_v59 = vpop.f32.mrf.mxu3 }
 0x1af   : > { %3964 = vst [vmem:[%s5141_s26 + $0x30] sm:$0xff] %v3916_v17  ;;  %v2247_v1 = vsub.f32 1.0, %v2246_v9  ;;  %v5607_v60 = vmin.f32 %v2342_v46, 16.0  ;;  %v1006_v22 = vsel %vm316_vm0, %v412_v23, %v662_v61  ;;  %vm2251_vm8 = vweird.f32 %v4378_v14 }
 0x1b0   : > { %v2310_v8 = vmul.f32 %v2309_v50, %v5537_v39  ;;  %v2321_v12 = vmul.f32 %v2320_v62, %v5537_v39  ;;  %v1061_v7 = vsel %vm1027_vm2, %v1006_v22, %v878_v2  ;;  %v5616_v63 = vadd.f32 %v5489_v10, %v1757_v25  ;;  %vm2252_vm9 = vmor %vm2250_vm6, %vm2251_vm8 }
 0x1b1   : > { %4269 = vmatmul.msk.f32.gmra.mxu3 %vm1087_vm3, %v4886_v54  ;;  %v4380_v49 = vpop.eup %4379  ;;  %v2248_v18 = vmul.f32 %v4378_v14, %v2247_v1  ;;  %v2344_v6 = vmul.f32 2.1237322e-06, %v5607_v60  ;;  %v2355_v54 = vmul.f32 3.8918573e-05, %v5607_v60  ;;  %4160 = vmatmul.msk.f32.gmra.mxu0 %vm1087_vm3, %v1061_v7  ;;  %v2274_v35 = vmul.f32 %v2273_v44, %v5450_v58 }
 0x1b2   : > { %4257 = vmatmul.msk.f32.gmra.mxu2 %vm1087_vm3, %v1061_v7  ;;  %v2286_v56 = vmul.f32 %v4380_v49, %v5578_v11  ;;  %v2294_v5 = vand.u32 2147483647, %v5578_v11  ;;  %v2322_v21 = vadd.f32 0.4994258, %v2321_v12  ;;  %v2296_v50 = vand.u32 2147483648, %v5578_v11 }
 0x1b3   : > { %v2249_v27 = vadd.f32 %v4378_v14, %v2248_v18  ;;  %v2345_v23 = vadd.f32 0.00028619796, %v2344_v6  ;;  %v2356_v61 = vadd.f32 0.001143296, %v2355_v54  ;;  %v1638_v17 = vpop.f32.mrf.mxu2  ;;  %v2311_v9 = vadd.f32 0.18741608, %v2310_v8 }
 0x1b4   : > { %v2287_v58 = vsub.f32 1.0, %v2286_v56  ;;  %v2323_v46 = vmul.f32 %v2322_v21, %v5537_v39  ;;  %v5633_v2 = vmul.f32 0.70710677, %v5616_v63  ;;  %vm2291_vm10 = vweird.f32 %v4380_v49  ;;  %v5651_v56 = vpop.f32.mrf.mxu1  ;;  %v5653_v21 = vpop.f32.mrf.mxu0 }
 0x1b5   : > { %v2253_v44 = vsel %vm2252_vm9, %v4378_v14, %v2249_v27  ;;  %v2346_v62 = vmul.f32 %v2345_v23, %v5607_v60  ;;  %v2357_v1 = vmul.f32 %v2356_v61, %v5607_v60  ;;  %v1758_v36 = vadd.f32 %v1638_v17, %v1463_v45 }
 0x1b6   : > { %4211 = vmatmul.msk.f32.gmra.mxu1 %vm1087_vm3, %v5542_v34  ;;  %v2258_v34 = vsel %vm5600_vm7, %v2257_v43, %v2253_v44  ;;  %v2288_v25 = vmul.f32 %v4380_v49, %v2287_v58  ;;  %v5639_v22 = vadd.f32 1.0, %v2323_v46  ;;  %v2382_v14 = vmul.f32 %v5633_v2, %v5633_v2 }
 0x1b7   : > { %v2259_v8 = vmul.f32 %v2258_v34, %v2234_v20  ;;  %v2347_v12 = vadd.f32 0.0036580483, %v2346_v62  ;;  %v2358_v18 = vadd.f32 0.014752088, %v2357_v1  ;;  %vm2290_vm11 = vweird.f32 %v5578_v11  ;;  %v5666_v62 = vpop.f32.mrf.mxu3 }
 0x1b8   : > { %v2289_v6 = vadd.f32 %v4380_v49, %v2288_v25  ;;  %v2297_v54 = vor.u32 1.1754944e-38, %v2296_v50  ;;  %4381 = vrcp.f32 %v5639_v22  ;;  %vm2292_vm12 = vmor %vm2290_vm11, %vm2291_vm10  ;;  %v2312_v45 = vmul.f32 %v2311_v9, %v5537_v39 }
 0x1b9   : > { %4270 = vmatmul.msk.f32.gmra.mxu3 %vm1087_vm3, %v4902_v3  ;;  %v4285_v30 = vclamps-f32 %v2259_v8, 1.0  ;;  %v2348_v43 = vmul.f32 %v2347_v12, %v5607_v60  ;;  %v2359_v3 = vmul.f32 %v2358_v18, %v5607_v60  ;;  %vm2295_vm13 = vcmp.eq.f32.partialorder %v2294_v5, 8.507059e+37  ;;  %v664_v8 = vpop.permute.xlu2 %663 }
 0x1ba   : > { %v2293_v20 = vsel %vm2292_vm12, %v4380_v49, %v2289_v6  ;;  %v5655_v27 = vmin.f32 %v2382_v14, 16.0  ;;  %v5658_v11 = vadd.f32 %v5489_v10, %v1758_v36  ;;  %v1854_v23 = vmul.f32 0.5, %v5428_v4  ;;  %v413_v36 = vld [vmem:[#allocation2 + $0x110] sm:$0xff] }
 0x1bb   : > { %v3869_v50 = vadd.f32 1.0, %v4285_v30  ;;  %v2298_v61 = vsel %vm2295_vm13, %v2297_v54, %v2293_v20  ;;  %v2349_v39 = vadd.f32 0.05243302, %v2348_v43  ;;  %v2360_v58 = vadd.f32 0.112945676, %v2359_v3  ;;  %v880_v20 = vpop.permute.xlu0 %879 }
 0x1bc   : > { %v2299_v17 = vmul.f32 %v2298_v61, %v2274_v35  ;;  %v2384_v49 = vmul.f32 2.1237322e-06, %v5655_v27  ;;  %v2395_v5 = vmul.f32 3.8918573e-05, %v5655_v27  ;;  %v2313_v46 = vadd.f32 1.1283791, %v2312_v45 }
 0x1bd   : > { %v3917_v9 = vmul.f32 %v3869_v50, %v5586_v26  ;;  %v2334_v44 = vand.u32 2147483647, %v5639_v22  ;;  %v5669_v4 = vmul.f32 0.70710677, %v5658_v11  ;;  %v2336_v12 = vand.u32 2147483648, %v5639_v22 }
 0x1be   : > { %4212 = vmatmul.msk.f32.gmra.mxu1 %vm1087_vm3, %v1061_v7  ;;  %v4382_v1 = vpop.eup %4381  ;;  %v4286_v34 = vclamps-f32 %v2299_v17, 1.0  ;;  %v2361_v7 = vmul.f32 %v2360_v58, %v5607_v60  ;;  %v2385_v35 = vadd.f32 0.00028619796, %v2384_v49  ;;  %v2396_v25 = vadd.f32 0.001143296, %v2395_v5 }
 0x1bf   : > { %3965 = vst [vmem:[%s5141_s26 + $0x38] sm:$0xff] %v3917_v9  ;;  %v2326_v26 = vmul.f32 %v4382_v1, %v5639_v22  ;;  %v2350_v18 = vmul.f32 %v2349_v39, %v5607_v60  ;;  %v2422_v14 = vmul.f32 %v5669_v4, %v5669_v4  ;;  %vm2331_vm14 = vweird.f32 %v4382_v1 }
 0x1c0   : > { %v3870_v6 = vadd.f32 1.0, %v4286_v34  ;;  %v2362_v54 = vadd.f32 0.4994258, %v2361_v7  ;;  %v2386_v30 = vmul.f32 %v2385_v35, %v5655_v27  ;;  %v2397_v45 = vmul.f32 %v2396_v25, %v5655_v27  ;;  %v1468_v35 = vpop.f32.mrf.mxu1  ;;  %v1295_v25 = vpop.f32.mrf.mxu0 }
 0x1c1   : > { %4271 = vmatmul.msk.f32.gmra.mxu3 %vm1087_vm3, %v4927_v15  ;;  %v2327_v43 = vsub.f32 1.0, %v2326_v26  ;;  %v5682_v15 = vmin.f32 %v2422_v14, 16.0  ;;  %v1007_v3 = vsel %vm316_vm0, %v413_v36, %v664_v8  ;;  %v2351_v5 = vadd.f32 0.18741608, %v2350_v18 }
 0x1c2   : > { %v3918_v61 = vmul.f32 %v3870_v6, %v1854_v23  ;;  %v2363_v39 = vmul.f32 %v2362_v54, %v5607_v60  ;;  %v2387_v17 = vadd.f32 0.0036580483, %v2386_v30  ;;  %v2398_v58 = vadd.f32 0.014752088, %v2397_v45 }
 0x1c3   : > { %v1641_v50 = vpop.f32.mrf.mxu2  ;;  %v2328_v49 = vmul.f32 %v4382_v1, %v2327_v43  ;;  %v2424_v9 = vmul.f32 2.1237322e-06, %v5682_v15  ;;  %v2435_v34 = vmul.f32 3.8918573e-05, %v5682_v15  ;;  %v1062_v23 = vsel %vm1027_vm2, %v1007_v3, %v880_v20  ;;  %v5703_v43 = vpop.f32.mrf.mxu3  ;;  %v414_v20 = vld [vmem:[#allocation2 + $0x118] sm:$0xff] }
 0x1c4   : > { %3966 = vst [vmem:[%s5141_s26 + $0x40] sm:$0xff] %v3918_v61  ;;  %v5689_v7 = vadd.f32 1.0, %v2363_v39  ;;  %v2388_v36 = vmul.f32 %v2387_v17, %v5655_v27  ;;  %v2399_v8 = vmul.f32 %v2398_v58, %v5655_v27  ;;  %vm2330_vm15 = vweird.f32 %v5639_v22  ;;  %4161 = vmatmul.msk.f32.gmra.mxu0 %vm1087_vm3, %v1062_v23  ;;  %4258 = vmatmul.msk.f32.gmra.mxu2 %vm1087_vm3, %v1062_v23 }
 0x1c5   : > { %v2329_v26 = vadd.f32 %v4382_v1, %v2328_v49  ;;  %v2425_v14 = vadd.f32 0.00028619796, %v2424_v9  ;;  %v2436_v18 = vadd.f32 0.001143296, %v2435_v34  ;;  %v2314_v6 = vmul.f32 %v2313_v46, %v5516_v33  ;;  %vm2332_vm1 = vmor %vm2330_vm15, %vm2331_vm14  ;;  %v666_v33 = vpop.permute.xlu1 %665 }
 0x1c6   : > { %vm2335_vm4 = vcmp.eq.f32.partialorder %v2334_v44, 8.507059e+37  ;;  %v2337_v54 = vor.u32 1.1754944e-38, %v2336_v12  ;;  %4383 = vrcp.f32 %v5689_v7  ;;  %4213 = vmatmul.msk.f32.gmra.mxu1 %vm1087_vm3, %v1062_v23  ;;  %v2389_v30 = vadd.f32 0.05243302, %v2388_v36 }
 0x1c7   : > { %v2333_v22 = vsel %vm2332_vm1, %v4382_v1, %v2329_v26  ;;  %v2400_v45 = vadd.f32 0.112945676, %v2399_v8  ;;  %v2426_v3 = vmul.f32 %v2425_v14, %v5682_v15  ;;  %v2352_v44 = vmul.f32 %v2351_v5, %v5607_v60  ;;  %v882_v1 = vpop.permute.xlu2 %881 }
 0x1c8   : > { %v2338_v46 = vsel %vm2335_vm4, %v2337_v54, %v2333_v22  ;;  %v2437_v12 = vmul.f32 %v2436_v18, %v5682_v15  ;;  %v2390_v39 = vmul.f32 %v2389_v30, %v5655_v27  ;;  %v1466_v58 = vadd.f32 %v5651_v56, %v5653_v21  ;;  %v1471_v30 = vpop.f32.mrf.mxu1 }
 0x1c9   : > { %4272 = vmatmul.msk.f32.gmra.mxu3 %vm1087_vm3, %v4957_v40  ;;  %v2339_v61 = vmul.f32 %v2338_v46, %v2314_v6  ;;  %v2401_v17 = vmul.f32 %v2400_v45, %v5655_v27  ;;  %v2427_v40 = vadd.f32 0.0036580483, %v2426_v3  ;;  %v1008_v9 = vsel %vm316_vm0, %v414_v20, %v666_v33  ;;  %v1298_v45 = vpop.f32.mrf.mxu0 }
 0x1ca   : > { %v2438_v49 = vadd.f32 0.014752088, %v2437_v12  ;;  %v1855_v34 = vmul.f32 0.5, %v5492_v42  ;;  %v1469_v26 = vadd.f32 %v1468_v35, %v1295_v25  ;;  %v1063_v18 = vsel %vm1027_vm2, %v1008_v9, %v882_v1 }
 0x1cb   : > { %v4287_v36 = vclamps-f32 %v2339_v61, 1.0  ;;  %v2402_v8 = vadd.f32 0.4994258, %v2401_v17  ;;  %v2428_v60 = vmul.f32 %v2427_v40, %v5682_v15  ;;  %v1644_v5 = vpop.f32.mrf.mxu2  ;;  %v1759_v6 = vadd.f32 %v1641_v50, %v1466_v58 }
 0x1cc   : > { %v4384_v23 = vpop.eup %4383  ;;  %v2439_v14 = vmul.f32 %v2438_v49, %v5682_v15  ;;  %v2353_v22 = vadd.f32 1.1283791, %v2352_v44  ;;  %v2391_v21 = vadd.f32 0.18741608, %v2390_v39  ;;  %4162 = vmatmul.msk.f32.gmra.mxu0 %vm1087_vm3, %v1063_v18  ;;  %4259 = vmatmul.msk.f32.gmra.mxu2 %vm1087_vm3, %v1063_v18  ;;  %v2374_v33 = vand.u32 2147483647, %v5689_v7  ;;  %v5729_v44 = vpop.f32.mrf.mxu3 }
 0x1cd   : > { %v3871_v54 = vadd.f32 1.0, %v4287_v36  ;;  %v2366_v56 = vmul.f32 %v4384_v23, %v5689_v7  ;;  %v2403_v42 = vmul.f32 %v2402_v8, %v5655_v27  ;;  %v2429_v35 = vadd.f32 0.05243302, %v2428_v60 }
 0x1ce   : > { %v2440_v25 = vadd.f32 0.112945676, %v2439_v14  ;;  %v5722_v3 = vadd.f32 %v5489_v10, %v1759_v6  ;;  %4214 = vmatmul.msk.f32.gmra.mxu1 %vm1087_vm3, %v1063_v18  ;;  %v2376_v46 = vand.u32 2147483648, %v5689_v7  ;;  %vm2371_vm5 = vweird.f32 %v4384_v23 }
 0x1cf   : > { %v3919_v50 = vmul.f32 %v3871_v54, %v1855_v34  ;;  %v2367_v20 = vsub.f32 1.0, %v2366_v56  ;;  %v5731_v12 = vadd.f32 1.0, %v2403_v42  ;;  %v2430_v61 = vmul.f32 %v2429_v35, %v5682_v15 }
 0x1d0   : > { %v2441_v39 = vmul.f32 %v2440_v25, %v5682_v15  ;;  %v2392_v40 = vmul.f32 %v2391_v21, %v5655_v27  ;;  %v1760_v1 = vadd.f32 %v1644_v5, %v1469_v26  ;;  %vm2370_vm6 = vweird.f32 %v5689_v7  ;;  %v1474_v35 = vpop.f32.mrf.mxu1 }
 0x1d1   : > { %4273 = vmatmul.msk.f32.gmra.mxu3 %vm1087_vm3, %v4975_v57  ;;  %3967 = vst [vmem:[%s5141_s26 + $0x48] sm:$0xff] %v3919_v50  ;;  %v2368_v17 = vmul.f32 %v4384_v23, %v2367_v20  ;;  %v5738_v57 = vmul.f32 0.70710677, %v5722_v3  ;;  %4385 = vrcp.f32 %v5731_v12  ;;  %v1472_v58 = vadd.f32 %v1471_v30, %v1298_v45  ;;  %vm2372_vm7 = vmor %vm2370_vm6, %vm2371_vm5 }
 0x1d2   : > { %v2431_v9 = vadd.f32 0.18741608, %v2430_v61  ;;  %v2442_v34 = vadd.f32 0.4994258, %v2441_v39  ;;  %v2354_v8 = vmul.f32 %v2353_v22, %v5583_v37  ;;  %vm2375_vm8 = vcmp.eq.f32.partialorder %v2374_v33, 8.507059e+37  ;;  %v1301_v22 = vpop.f32.mrf.mxu0 }
 0x1d3   : > { %v2369_v49 = vadd.f32 %v4384_v23, %v2368_v17  ;;  %v2462_v36 = vmul.f32 %v5738_v57, %v5738_v57  ;;  %v2377_v27 = vor.u32 1.1754944e-38, %v2376_v46  ;;  %v5747_v60 = vadd.f32 %v5489_v10, %v1760_v1  ;;  %v1647_v37 = vpop.f32.mrf.mxu2 }
 0x1d4   : > { %v2393_v7 = vadd.f32 1.1283791, %v2392_v40  ;;  %v2443_v26 = vmul.f32 %v2442_v34, %v5682_v15  ;;  %4163 = vmatmul.msk.f32.gmra.mxu0 %vm1087_vm3, %v5039_v51  ;;  %4260 = vmatmul.msk.f32.gmra.mxu2 %vm1087_vm3, %v5039_v51  ;;  %v2414_v6 = vand.u32 2147483647, %v5731_v12  ;;  %v2432_v54 = vmul.f32 %v2431_v9, %v5682_v15  ;;  %v5777_v46 = vpop.f32.mrf.mxu3 }
 0x1d5   : > { %v2373_v5 = vsel %vm2372_vm7, %v4384_v23, %v2369_v49  ;;  %v5750_v14 = vmin.f32 %v2462_v36, 16.0  ;;  %v5759_v23 = vmul.f32 0.70710677, %v5747_v60  ;;  %v1856_v56 = vmul.f32 0.5, %v5566_v48 }
 0x1d6   : > { %v2378_v18 = vsel %vm2375_vm8, %v2377_v27, %v2373_v5  ;;  %v5764_v42 = vadd.f32 1.0, %v2443_v26  ;;  %v2416_v45 = vand.u32 2147483648, %v5731_v12  ;;  %v1761_v50 = vadd.f32 %v1647_v37, %v1472_v58 }
 0x1d7   : > { %v2379_v21 = vmul.f32 %v2378_v18, %v2354_v8  ;;  %v2464_v51 = vmul.f32 2.1237322e-06, %v5750_v14  ;;  %v4386_v30 = vpop.eup %4385  ;;  %v2475_v15 = vmul.f32 3.8918573e-05, %v5750_v14  ;;  %v2502_v25 = vmul.f32 %v5759_v23, %v5759_v23 }
 0x1d8   : > { %v2406_v48 = vmul.f32 %v4386_v30, %v5731_v12  ;;  %v5775_v33 = vadd.f32 %v1474_v35, %v1301_v22  ;;  %v2394_v61 = vmul.f32 %v2393_v7, %v5633_v2  ;;  %vm5780_vm9 = vcmp.eq.f32.partialorder %v2414_v6, 8.507059e+37 }
 0x1d9   : > { %4274 = vmatmul.msk.f32.gmra.mxu3 %vm1087_vm3, %v5010_v13  ;;  %v4288_v20 = vclamps-f32 %v2379_v21, 1.0  ;;  %v5772_v13 = vmul.f32 0.5, %v5616_v63  ;;  %v2433_v17 = vadd.f32 1.1283791, %v2432_v54  ;;  %4387 = vrcp.f32 %v5764_v42 }
 0x1da   : > { %v2407_v1 = vsub.f32 1.0, %v2406_v48  ;;  %v2465_v58 = vadd.f32 0.00028619796, %v2464_v51  ;;  %v2476_v63 = vadd.f32 0.001143296, %v2475_v15  ;;  %vm2411_vm10 = vweird.f32 %v4386_v30 }
 0x1db   : > { %v3872_v40 = vadd.f32 1.0, %v4288_v20  ;;  %v2417_v49 = vor.u32 1.1754944e-38, %v2416_v45  ;;  %v5785_v9 = vmin.f32 %v2502_v25, 16.0  ;;  %v5788_v34 = vadd.f32 %v5489_v10, %v1761_v50 }
 0x1dc   : > { %v2408_v36 = vmul.f32 %v4386_v30, %v2407_v1  ;;  %v2466_v8 = vmul.f32 %v2465_v58, %v5750_v14  ;;  %v2477_v27 = vmul.f32 %v2476_v63, %v5750_v14  ;;  %4164 = vmatmul.msk.f32.gmra.mxu0 %vm1087_vm3, %v5064_v16  ;;  %vm2410_vm11 = vweird.f32 %v5731_v12  ;;  %4261 = vmatmul.msk.f32.gmra.mxu2 %vm1087_vm3, %v5064_v16  ;;  %v1304_v58 = vpop.f32.mrf.mxu0 }
 0x1dd   : > { %v3920_v2 = vmul.f32 %v3872_v40, %v1856_v56  ;;  %v2454_v5 = vand.u32 2147483647, %v5764_v42  ;;  %v2504_v7 = vmul.f32 2.1237322e-06, %v5785_v9  ;;  %v2515_v26 = vmul.f32 3.8918573e-05, %v5785_v9  ;;  %vm2412_vm12 = vmor %vm2410_vm11, %vm2411_vm10  ;;  %v5815_v40 = vpop.f32.mrf.mxu3 }
 0x1de   : > { %v2409_v37 = vadd.f32 %v4386_v30, %v2408_v36  ;;  %v2434_v18 = vmul.f32 %v2433_v17, %v5669_v4  ;;  %v2467_v6 = vadd.f32 0.0036580483, %v2466_v8  ;;  %v2478_v54 = vadd.f32 0.014752088, %v2477_v27 }
 0x1df   : > { %3968 = vst [vmem:[%s5141_s26 + $0x50] sm:$0xff] %v3920_v2  ;;  %v4388_v22 = vpop.eup %4387  ;;  %vm2450_vm13 = vweird.f32 %v5764_v42  ;;  %v2505_v12 = vadd.f32 0.00028619796, %v2504_v7  ;;  %v2516_v56 = vadd.f32 0.001143296, %v2515_v26  ;;  %v2456_v16 = vand.u32 2147483648, %v5764_v42  ;;  %v1477_v7 = vpop.f32.mrf.mxu1 }
 0x1e0   : > { %v5805_v21 = vmul.f32 0.70710677, %v5788_v34  ;;  %v2413_v51 = vsel %vm2412_vm12, %v4386_v30, %v2409_v37  ;;  %v2446_v45 = vmul.f32 %v4388_v22, %v5764_v42  ;;  %v2468_v35 = vmul.f32 %v2467_v6, %v5750_v14 }
 0x1e1   : > { %v2418_v4 = vsel %vm5780_vm9, %v2417_v49, %v2413_v51  ;;  %v2479_v15 = vmul.f32 %v2478_v54, %v5750_v14  ;;  %v2506_v25 = vmul.f32 %v2505_v12, %v5785_v9  ;;  %v2517_v50 = vmul.f32 %v2516_v56, %v5785_v9 }
 0x1e2   : > { %v2419_v20 = vmul.f32 %v2418_v4, %v2394_v61  ;;  %v2447_v48 = vsub.f32 1.0, %v2446_v45  ;;  %v2469_v17 = vadd.f32 0.05243302, %v2468_v35  ;;  %v2542_v30 = vmul.f32 %v5805_v21, %v5805_v21  ;;  %v1650_v61 = vpop.f32.mrf.mxu2 }
 0x1e3   : > { %vm2451_vm14 = vweird.f32 %v4388_v22  ;;  %v2480_v1 = vadd.f32 0.112945676, %v2479_v15  ;;  %v2507_v63 = vadd.f32 0.0036580483, %v2506_v25  ;;  %v2518_v39 = vadd.f32 0.014752088, %v2517_v50 }
 0x1e4   : > { %v4289_v49 = vclamps-f32 %v2419_v20, 1.0  ;;  %v2448_v2 = vmul.f32 %v4388_v22, %v2447_v48  ;;  %v2470_v36 = vmul.f32 %v2469_v17, %v5750_v14  ;;  %v5820_v8 = vmin.f32 %v2542_v30, 16.0  ;;  %4165 = vmatmul.msk.f32.gmra.mxu0 %vm1087_vm3, %v5093_v47  ;;  %4262 = vmatmul.msk.f32.gmra.mxu2 %vm1087_vm3, %v5093_v47  ;;  %vm2452_vm1 = vmor %vm2450_vm13, %vm2451_vm14 }
 0x1e5   : > { %vm5824_vm15 = vcmp.eq.f32.partialorder %v2454_v5, 8.507059e+37  ;;  %v2481_v26 = vmul.f32 %v2480_v1, %v5750_v14  ;;  %v2508_v37 = vmul.f32 %v2507_v63, %v5785_v9  ;;  %v2519_v6 = vmul.f32 %v2518_v39, %v5785_v9  ;;  %v430_v39 = vld [vmem:[#allocation2 + $0x198] sm:$0xff] }
 0x1e6   : > { %v3873_v54 = vadd.f32 1.0, %v4289_v49  ;;  %v2449_v12 = vadd.f32 %v4388_v22, %v2448_v2  ;;  %v2457_v56 = vor.u32 1.1754944e-38, %v2456_v16  ;;  %v2544_v51 = vmul.f32 2.1237322e-06, %v5820_v8  ;;  %v698_v49 = vpop.permute.xlu0 %697 }
 0x1e7   : > { %v2482_v5 = vadd.f32 0.4994258, %v2481_v26  ;;  %v2509_v45 = vadd.f32 0.05243302, %v2508_v37  ;;  %v2520_v35 = vadd.f32 0.112945676, %v2519_v6  ;;  %v1762_v4 = vadd.f32 %v1650_v61, %v5775_v33  ;;  %v5853_v61 = vpop.f32.mrf.mxu3 }
 0x1e8   : > { %v3921_v15 = vmul.f32 %v3873_v54, %v5772_v13  ;;  %v2453_v25 = vsel %vm2452_vm1, %v4388_v22, %v2449_v12  ;;  %v2471_v50 = vadd.f32 0.18741608, %v2470_v36  ;;  %v2545_v47 = vadd.f32 0.00028619796, %v2544_v51  ;;  %v1307_v54 = vpop.f32.mrf.mxu0  ;;  %v914_v51 = vpop.permute.xlu1 %913 }
 0x1e9   : > { %v2458_v20 = vsel %vm5824_vm15, %v2457_v56, %v2453_v25  ;;  %v2483_v16 = vmul.f32 %v2482_v5, %v5750_v14  ;;  %v2510_v48 = vmul.f32 %v2509_v45, %v5785_v9  ;;  %v2521_v42 = vmul.f32 %v2520_v35, %v5785_v9 }
 0x1ea   : > { %3969 = vst [vmem:[%s5141_s26 + $0x58] sm:$0xff] %v3921_v15  ;;  %v2459_v17 = vmul.f32 %v2458_v20, %v2434_v18  ;;  %v2546_v30 = vmul.f32 %v2545_v47, %v5820_v8  ;;  %v2555_v33 = vmul.f32 3.8918573e-05, %v5820_v8  ;;  %v5850_v63 = vadd.f32 %v5489_v10, %v1762_v4  ;;  %v1653_v25 = vpop.f32.mrf.mxu2 }
 0x1eb   : > { %v5847_v1 = vadd.f32 1.0, %v2483_v16  ;;  %v2511_v13 = vadd.f32 0.18741608, %v2510_v48  ;;  %v2522_v22 = vadd.f32 0.4994258, %v2521_v42  ;;  %v2472_v36 = vmul.f32 %v2471_v50, %v5750_v14 }
 0x1ec   : > { %v4290_v2 = vclamps-f32 %v2459_v17, 1.0  ;;  %v2547_v27 = vadd.f32 0.0036580483, %v2546_v30  ;;  %v2556_v18 = vadd.f32 0.001143296, %v2555_v33  ;;  %v1858_v26 = vmul.f32 0.5, %v5658_v11  ;;  %4263 = vmatmul.msk.f32.gmra.mxu2 %vm1087_vm3, %v4706_v38 }
 0x1ed   : > { %v5858_v37 = vadd.f32 %v5729_v44, %v5216_v24  ;;  %v5862_v6 = vadd.f32 %v5777_v46, %v5253_v53  ;;  %4389 = vrcp.f32 %v5847_v1  ;;  %v1478_v12 = vadd.f32 %v1477_v7, %v1304_v58  ;;  %v1480_v24 = vpop.f32.mrf.mxu1 }
 0x1ee   : > { %v3874_v14 = vadd.f32 1.0, %v4290_v2  ;;  %v2523_v56 = vmul.f32 %v2522_v22, %v5785_v9  ;;  %v1024_v11 = vsel %vm316_vm0, %v430_v39, %v698_v49  ;;  %v2512_v44 = vmul.f32 %v2511_v13, %v5785_v9  ;;  %v431_v39 = vld [vmem:[#allocation2 + $0x1a0] sm:$0xff]  ;;  %v700_v49 = vpop.permute.xlu2 %699 }
 0x1ef   : > { %v2548_v53 = vmul.f32 %v2547_v27, %v5820_v8  ;;  %v2557_v46 = vmul.f32 %v2556_v18, %v5820_v8  ;;  %v5873_v5 = vmul.f32 0.70710677, %v5850_v63  ;;  %v2473_v38 = vadd.f32 1.1283791, %v2472_v36 }
 0x1f0   : > { %v3922_v45 = vmul.f32 %v3874_v14, %v1858_v26  ;;  %v2494_v58 = vand.u32 2147483647, %v5847_v1  ;;  %v5876_v7 = vadd.f32 1.0, %v2523_v56  ;;  %v2496_v35 = vand.u32 2147483648, %v5847_v1 }
 0x1f1   : > { %v2558_v4 = vadd.f32 0.014752088, %v2557_v46  ;;  %v2582_v15 = vmul.f32 %v5873_v5, %v5873_v5  ;;  %v1079_v9 = vsel %vm1027_vm2, %v1024_v11, %v914_v51  ;;  %v5884_v50 = vmul.f32 0.5, %v5722_v3 }
 0x1f2   : > { %3970 = vst [vmem:[%s5141_s26 + $0x60] sm:$0xff] %v3922_v45  ;;  %v5887_v47 = vmul.f32 0.5, %v5747_v60  ;;  %4391 = vrcp.f32 %v5876_v7  ;;  %v5892_v20 = vadd.f32 %v5815_v40, %v5301_v41  ;;  %4275 = vmatmul.msk.f32.gmra.mxu3 %vm1087_vm3, %v1079_v9  ;;  %v2513_v48 = vadd.f32 1.1283791, %v2512_v44  ;;  %v916_v44 = vpop.permute.xlu0 %915 }
 0x1f3   : > { %v4390_v16 = vpop.eup %4389  ;;  %v2549_v42 = vadd.f32 0.05243302, %v2548_v53  ;;  %v2559_v17 = vmul.f32 %v2558_v4, %v5820_v8  ;;  %v5896_v30 = vmin.f32 %v2582_v15, 16.0  ;;  %v2474_v3 = vmul.f32 %v2473_v38, %v5738_v57  ;;  %v5909_v57 = vpop.f32.mrf.mxu3 }
 0x1f4   : > { %v2486_v60 = vmul.f32 %v4390_v16, %v5847_v1  ;;  %v5900_v33 = vadd.f32 %v1480_v24, %v1307_v54  ;;  %v1763_v13 = vadd.f32 %v1653_v25, %v1478_v12  ;;  %vm2490_vm4 = vweird.f32 %v5847_v1  ;;  %4264 = vmatmul.msk.f32.gmra.mxu2 %vm1087_vm3, %v4742_v0  ;;  %v5919_v12 = vpop.f32.mrf.mxu0 }
 0x1f5   : > { %vm5903_vm5 = vcmp.eq.f32.partialorder %v2494_v58, 8.507059e+37  ;;  %v2497_v40 = vor.u32 1.1754944e-38, %v2496_v35  ;;  %v2560_v22 = vadd.f32 0.112945676, %v2559_v17  ;;  %v2584_v36 = vmul.f32 2.1237322e-06, %v5896_v30 }
 0x1f6   : > { %v2487_v2 = vsub.f32 1.0, %v2486_v60  ;;  %v2595_v27 = vmul.f32 3.8918573e-05, %v5896_v30  ;;  %v5914_v18 = vadd.f32 %v5489_v10, %v1763_v13  ;;  %vm2491_vm6 = vweird.f32 %v4390_v16 }
 0x1f7   : > { %v2514_v26 = vmul.f32 %v2513_v48, %v5759_v23  ;;  %v2550_v54 = vmul.f32 %v2549_v42, %v5820_v8  ;;  %v2561_v14 = vmul.f32 %v2560_v22, %v5820_v8  ;;  %v2585_v11 = vadd.f32 0.00028619796, %v2584_v36  ;;  %v5925_v23 = vpop.f32.mrf.mxu1  ;;  %vm2492_vm7 = vmor %vm2490_vm4, %vm2491_vm6 }
 0x1f8   : > { %v4392_v0 = vpop.eup %4391  ;;  %v2488_v56 = vmul.f32 %v4390_v16, %v2487_v2  ;;  %v2596_v51 = vadd.f32 0.001143296, %v2595_v27  ;;  %v1025_v24 = vsel %vm316_vm0, %v431_v39, %v700_v49  ;;  %v2534_v10 = vand.u32 2147483647, %v5876_v7  ;;  %v1656_v49 = vpop.f32.mrf.mxu2 }
 0x1f9   : > { %v2526_v53 = vmul.f32 %v4392_v0, %v5876_v7  ;;  %v2536_v46 = vand.u32 2147483648, %v5876_v7  ;;  %v2562_v45 = vadd.f32 0.4994258, %v2561_v14  ;;  %v2586_v58 = vmul.f32 %v2585_v11, %v5896_v30 }
 0x1fa   : > { %v2489_v38 = vadd.f32 %v4390_v16, %v2488_v56  ;;  %v2597_v35 = vmul.f32 %v2596_v51, %v5896_v30  ;;  %v5930_v4 = vmul.f32 0.70710677, %v5914_v18  ;;  %v2551_v9 = vadd.f32 0.18741608, %v2550_v54 }
 0x1fb   : > { %v2527_v15 = vsub.f32 1.0, %v2526_v53  ;;  %v2563_v25 = vmul.f32 %v2562_v45, %v5820_v8  ;;  %v1080_v48 = vsel %vm1027_vm2, %v1025_v24, %v916_v44  ;;  %v2587_v17 = vadd.f32 0.0036580483, %v2586_v58  ;;  %v5952_v11 = vpop.f32.mrf.mxu3 }
 0x1fc   : > { %v2493_v42 = vsel %vm2492_vm7, %v4390_v16, %v2489_v38  ;;  %v2598_v60 = vadd.f32 0.014752088, %v2597_v35  ;;  %v2622_v13 = vmul.f32 %v5930_v4, %v5930_v4  ;;  %4276 = vmatmul.msk.f32.gmra.mxu3 %vm1087_vm3, %v1080_v48  ;;  %vm2531_vm8 = vweird.f32 %v4392_v0  ;;  %4265 = vmatmul.msk.f32.gmra.mxu2 %vm1087_vm3, %v4773_v32  ;;  %v5955_v51 = vpop.f32.mrf.mxu0  ;;  %v432_v35 = vld [vmem:[#allocation2 + $0x1a8] sm:$0xff] }
 0x1fd   : > { %v2498_v22 = vsel %vm5903_vm5, %v2497_v40, %v2493_v42  ;;  %v2528_v39 = vmul.f32 %v4392_v0, %v2527_v15  ;;  %v5942_v1 = vadd.f32 1.0, %v2563_v25  ;;  %v2588_v16 = vmul.f32 %v2587_v17, %v5896_v30  ;;  %v702_v15 = vpop.permute.xlu1 %701 }
 0x1fe   : > { %v2499_v2 = vmul.f32 %v2498_v22, %v2474_v3  ;;  %v2599_v36 = vmul.f32 %v2598_v60, %v5896_v30  ;;  %v5948_v27 = vmin.f32 %v2622_v13, 16.0  ;;  %vm2530_vm9 = vweird.f32 %v5876_v7 }
 0x1ff   : > { %v2529_v54 = vadd.f32 %v4392_v0, %v2528_v39  ;;  %v2537_v41 = vor.u32 1.1754944e-38, %v2536_v46  ;;  %4393 = vrcp.f32 %v5942_v1  ;;  %vm2532_vm10 = vmor %vm2530_vm9, %vm2531_vm8  ;;  %v2589_v14 = vadd.f32 0.05243302, %v2588_v16  ;;  %v5964_v58 = vpop.f32.mrf.mxu1 }
 0x200   : > { %v4291_v40 = vclamps-f32 %v2499_v2, 1.0  ;;  %v2600_v56 = vadd.f32 0.112945676, %v2599_v36  ;;  %v1764_v32 = vadd.f32 %v1656_v49, %v5900_v33  ;;  %vm2535_vm11 = vcmp.eq.f32.partialorder %v2534_v10, 8.507059e+37  ;;  %v918_v36 = vpop.permute.xlu2 %917 }
 0x201   : > { %v2533_v3 = vsel %vm2532_vm10, %v4392_v0, %v2529_v54  ;;  %v2624_v24 = vmul.f32 2.1237322e-06, %v5948_v27  ;;  %v2635_v44 = vmul.f32 3.8918573e-05, %v5948_v27  ;;  %v5961_v46 = vadd.f32 %v5853_v61, %v5349_v29  ;;  %v1659_v54 = vpop.f32.mrf.mxu2 }
 0x202   : > { %v3875_v7 = vadd.f32 1.0, %v4291_v40  ;;  %v2538_v53 = vsel %vm2535_vm11, %v2537_v41, %v2533_v3  ;;  %v2552_v45 = vmul.f32 %v2551_v9, %v5820_v8  ;;  %v2601_v33 = vmul.f32 %v2600_v56, %v5896_v30  ;;  %v5975_v8 = vld [vmem:[%s7187_s3] ss:$0 sm:$0xff] }
 0x203   : > { %v2539_v38 = vmul.f32 %v2538_v53, %v2514_v26  ;;  %v2625_v0 = vadd.f32 0.00028619796, %v2624_v24  ;;  %v2636_v10 = vadd.f32 0.001143296, %v2635_v44  ;;  %v5969_v48 = vmul.f32 0.5, %v5788_v34  ;;  %v5996_v53 = vpop.f32.mrf.mxu3 }
 0x204   : > { %v3923_v25 = vmul.f32 %v3875_v7, %v5884_v50  ;;  %v2590_v29 = vmul.f32 %v2589_v14, %v5896_v30  ;;  %v5978_v61 = vadd.f32 %v5975_v8, %v1764_v32  ;;  %v2602_v42 = vadd.f32 0.4994258, %v2601_v33 }
 0x205   : > { %v4394_v26 = vpop.eup %4393  ;;  %v4292_v9 = vclamps-f32 %v2539_v38, 1.0  ;;  %v2626_v17 = vmul.f32 %v2625_v0, %v5948_v27  ;;  %v2637_v50 = vmul.f32 %v2636_v10, %v5948_v27  ;;  %v2553_v34 = vadd.f32 1.1283791, %v2552_v45  ;;  %v1316_v0 = vpop.f32.mrf.mxu0 }
 0x206   : > { %3971 = vst [vmem:[%s5141_s26 + $0x68] sm:$0xff] %v3923_v25  ;;  %v2566_v60 = vmul.f32 %v4394_v26, %v5942_v1  ;;  %v2574_v13 = vand.u32 2147483647, %v5942_v1  ;;  %v1026_v22 = vsel %vm316_vm0, %v432_v35, %v702_v15  ;;  %v2603_v49 = vmul.f32 %v2602_v42, %v5896_v30 }
 0x207   : > { %v3876_v39 = vadd.f32 1.0, %v4292_v9  ;;  %v2627_v2 = vadd.f32 0.0036580483, %v2626_v17  ;;  %v2638_v16 = vadd.f32 0.014752088, %v2637_v50  ;;  %v2576_v40 = vand.u32 2147483648, %v5942_v1 }
 0x208   : > { %v2567_v41 = vsub.f32 1.0, %v2566_v60  ;;  %v2591_v14 = vadd.f32 0.18741608, %v2590_v29  ;;  %v5989_v56 = vmul.f32 0.70710677, %v5978_v61  ;;  %v5992_v3 = vadd.f32 1.0, %v2603_v49 }
 0x209   : > { %v3924_v32 = vmul.f32 %v3876_v39, %v5887_v47  ;;  %v2628_v24 = vmul.f32 %v2627_v2, %v5948_v27  ;;  %v2639_v44 = vmul.f32 %v2638_v16, %v5948_v27  ;;  %vm2571_vm0 = vweird.f32 %v4394_v26 }
 0x20a   : > { %v2568_v7 = vmul.f32 %v4394_v26, %v2567_v41  ;;  %v2662_v45 = vmul.f32 %v5989_v56, %v5989_v56  ;;  %v1081_v38 = vsel %vm1027_vm2, %v1026_v22, %v918_v36  ;;  %vm2570_vm12 = vweird.f32 %v5942_v1 }
 0x20b   : > { %3972 = vst [vmem:[%s5141_s26 + $0x70] sm:$0xff] %v3924_v32  ;;  %v1484_v47 = vadd.f32 %v5925_v23, %v5919_v12  ;;  %v6007_v33 = vadd.f32 %v5909_v57, %v5396_v52  ;;  %4395 = vrcp.f32 %v5992_v3  ;;  %4277 = vmatmul.msk.f32.gmra.mxu3 %vm1087_vm3, %v1081_v38  ;;  %v2629_v35 = vadd.f32 0.05243302, %v2628_v24  ;;  %vm2572_vm2 = vmor %vm2570_vm12, %vm2571_vm0  ;;  %v1489_v23 = vpop.f32.mrf.mxu1 }
 0x20c   : > { %v2569_v10 = vadd.f32 %v4394_v26, %v2568_v7  ;;  %v2640_v15 = vadd.f32 0.112945676, %v2639_v44  ;;  %v6011_v25 = vmin.f32 %v2662_v45, 16.0  ;;  %v2554_v29 = vmul.f32 %v2553_v34, %v5805_v21  ;;  %v6039_v45 = vpop.f32.mrf.mxu3 }
 0x20d   : > { %v2577_v1 = vor.u32 1.1754944e-38, %v2576_v40  ;;  %v2592_v12 = vmul.f32 %v2591_v14, %v5896_v30  ;;  %v1765_v52 = vadd.f32 %v1659_v54, %v1484_v47  ;;  %vm2575_vm13 = vcmp.eq.f32.partialorder %v2574_v13, 8.507059e+37 }
 0x20e   : > { %v2573_v57 = vsel %vm2572_vm2, %v4394_v26, %v2569_v10  ;;  %v2641_v9 = vmul.f32 %v2640_v15, %v5948_v27  ;;  %v2664_v42 = vmul.f32 2.1237322e-06, %v6011_v25  ;;  %v6019_v50 = vmul.f32 0.5, %v5850_v63  ;;  %v1662_v63 = vpop.f32.mrf.mxu2  ;;  %v6043_v15 = vpop.f32.mrf.mxu0 }
 0x20f   : > { %v2578_v17 = vsel %vm2575_vm13, %v2577_v1, %v2573_v57  ;;  %v2675_v60 = vmul.f32 3.8918573e-05, %v6011_v25  ;;  %v6023_v21 = vadd.f32 %v5975_v8, %v1765_v52  ;;  %v2630_v30 = vmul.f32 %v2629_v35, %v5948_v27 }
 0x210   : > { %v2579_v34 = vmul.f32 %v2578_v17, %v2554_v29  ;;  %v2642_v22 = vadd.f32 0.4994258, %v2641_v9  ;;  %v2665_v39 = vadd.f32 0.00028619796, %v2664_v42  ;;  %v2593_v13 = vadd.f32 1.1283791, %v2592_v12 }
 0x211   : > { %v4396_v26 = vpop.eup %4395  ;;  %v1487_v49 = vadd.f32 %v5964_v58, %v5955_v51  ;;  %v2676_v2 = vadd.f32 0.001143296, %v2675_v60  ;;  %v6029_v16 = vmul.f32 0.70710677, %v6023_v21  ;;  %v2614_v41 = vand.u32 2147483647, %v5992_v3 }
 0x212   : > { %v4293_v36 = vclamps-f32 %v2579_v34, 1.0  ;;  %v2606_v54 = vmul.f32 %v4396_v26, %v5992_v3  ;;  %v2616_v40 = vand.u32 2147483648, %v5992_v3  ;;  %v2643_v14 = vmul.f32 %v2642_v22, %v5948_v27 }
 0x213   : > { %v2666_v32 = vmul.f32 %v2665_v39, %v6011_v25  ;;  %v2677_v24 = vmul.f32 %v2676_v2, %v6011_v25  ;;  %v2702_v51 = vmul.f32 %v6029_v16, %v6029_v16  ;;  %v2631_v7 = vadd.f32 0.18741608, %v2630_v30  ;;  %v1492_v9 = vpop.f32.mrf.mxu1 }
 0x214   : > { %v3877_v58 = vadd.f32 1.0, %v4293_v36  ;;  %v2607_v44 = vsub.f32 1.0, %v2606_v54  ;;  %v1766_v38 = vadd.f32 %v1662_v63, %v1487_v49  ;;  %v6041_v47 = vadd.f32 1.0, %v2643_v14 }
 0x215   : > { %v2667_v10 = vadd.f32 0.0036580483, %v2666_v32  ;;  %v2678_v35 = vadd.f32 0.014752088, %v2677_v24  ;;  %v6045_v29 = vmin.f32 %v2702_v51, 16.0  ;;  %vm2611_vm3 = vweird.f32 %v4396_v26 }
 0x216   : > { %v3925_v1 = vmul.f32 %v3877_v58, %v5969_v48  ;;  %v2608_v12 = vmul.f32 %v4396_v26, %v2607_v44  ;;  %v1490_v52 = vadd.f32 %v1489_v23, %v1316_v0  ;;  %v2594_v57 = vmul.f32 %v2593_v13, %v5873_v5 }
 0x217   : > { %vm2610_vm14 = vweird.f32 %v5992_v3  ;;  %4397 = vrcp.f32 %v6041_v47  ;;  %v6052_v42 = vadd.f32 %v5975_v8, %v1766_v38  ;;  %v2668_v60 = vmul.f32 %v2667_v10, %v6011_v25 }
 0x218   : > { %3973 = vst [vmem:[%s5141_s26 + $0x78] sm:$0xff] %v3925_v1  ;;  %v2609_v17 = vadd.f32 %v4396_v26, %v2608_v12  ;;  %v2679_v34 = vmul.f32 %v2678_v35, %v6011_v25  ;;  %v2704_v48 = vmul.f32 2.1237322e-06, %v6045_v29  ;;  %vm2612_vm15 = vmor %vm2610_vm14, %vm2611_vm3  ;;  %vm2615_vm1 = vcmp.eq.f32.partialorder %v2614_v41, 8.507059e+37  ;;  %v1322_v12 = vpop.f32.mrf.mxu0 }
 0x219   : > { %v2617_v0 = vor.u32 1.1754944e-38, %v2616_v40  ;;  %v2632_v5 = vmul.f32 %v2631_v7, %v5948_v27  ;;  %v2715_v3 = vmul.f32 3.8918573e-05, %v6045_v29  ;;  %v2669_v30 = vadd.f32 0.05243302, %v2668_v60  ;;  %v6078_v7 = vpop.f32.mrf.mxu3 }
 0x21a   : > { %v2613_v23 = vsel %vm2612_vm15, %v4396_v26, %v2609_v17  ;;  %v2680_v22 = vadd.f32 0.112945676, %v2679_v34  ;;  %v2705_v39 = vadd.f32 0.00028619796, %v2704_v48  ;;  %v6061_v49 = vmul.f32 0.5, %v5914_v18  ;;  %v1665_v26 = vpop.f32.mrf.mxu2 }
 0x21b   : > { %v2618_v13 = vsel %vm2615_vm1, %v2617_v0, %v2613_v23  ;;  %v2716_v2 = vadd.f32 0.001143296, %v2715_v3  ;;  %v6064_v63 = vmul.f32 0.70710677, %v6052_v42  ;;  %v6067_v54 = vmul.f32 0.5, %v5978_v61  ;;  %v1495_v0 = vpop.f32.mrf.mxu1 }
 0x21c   : > { %v2619_v36 = vmul.f32 %v2618_v13, %v2594_v57  ;;  %v2681_v27 = vmul.f32 %v2680_v22, %v6011_v25  ;;  %v2706_v41 = vmul.f32 %v2705_v39, %v6045_v29  ;;  %v2633_v14 = vadd.f32 1.1283791, %v2632_v5 }
 0x21d   : > { %v4398_v40 = vpop.eup %4397  ;;  %v2654_v32 = vand.u32 2147483647, %v6041_v47  ;;  %v2717_v18 = vmul.f32 %v2716_v2, %v6045_v29  ;;  %v2742_v24 = vmul.f32 %v6064_v63, %v6064_v63  ;;  %v2656_v61 = vand.u32 2147483648, %v6041_v47 }
 0x21e   : > { %v4294_v51 = vclamps-f32 %v2619_v36, 1.0  ;;  %v2646_v58 = vmul.f32 %v4398_v40, %v6041_v47  ;;  %v2670_v44 = vmul.f32 %v2669_v30, %v6011_v25  ;;  %v6082_v38 = vadd.f32 %v5952_v11, %v5454_v28 }
 0x21f   : > { %v2682_v10 = vadd.f32 0.4994258, %v2681_v27  ;;  %v2707_v35 = vadd.f32 0.0036580483, %v2706_v41  ;;  %v2718_v1 = vadd.f32 0.014752088, %v2717_v18  ;;  %v1767_v34 = vadd.f32 %v1665_v26, %v1490_v52 }
 0x220   : > { %v3878_v57 = vadd.f32 1.0, %v4294_v51  ;;  %v2647_v17 = vsub.f32 1.0, %v2646_v58  ;;  %v6084_v60 = vmin.f32 %v2742_v24, 16.0  ;;  %vm2651_vm4 = vweird.f32 %v4398_v40 }
 0x221   : > { %v2683_v48 = vmul.f32 %v2682_v10, %v6011_v25  ;;  %v2708_v5 = vmul.f32 %v2707_v35, %v6045_v29  ;;  %v2719_v3 = vmul.f32 %v2718_v1, %v6045_v29  ;;  %v2671_v23 = vadd.f32 0.18741608, %v2670_v44  ;;  %v6105_v35 = vpop.f32.mrf.mxu3  ;;  %v1325_v1 = vpop.f32.mrf.mxu0 }
 0x222   : > { %v3926_v28 = vmul.f32 %v3878_v57, %v6019_v50  ;;  %v2648_v11 = vmul.f32 %v4398_v40, %v2647_v17  ;;  %v2744_v30 = vmul.f32 2.1237322e-06, %v6084_v60  ;;  %v1493_v39 = vadd.f32 %v1492_v9, %v6043_v15  ;;  %v1668_v24 = vpop.f32.mrf.mxu2 }
 0x223   : > { %v6091_v22 = vadd.f32 1.0, %v2683_v48  ;;  %v2709_v13 = vadd.f32 0.05243302, %v2708_v5  ;;  %v2720_v52 = vadd.f32 0.112945676, %v2719_v3  ;;  %vm2650_vm5 = vweird.f32 %v6041_v47 }
 0x224   : > { %3974 = vst [vmem:[%s5141_s26 + $0x80] sm:$0xff] %v3926_v28  ;;  %v2649_v2 = vadd.f32 %v4398_v40, %v2648_v11  ;;  %v2745_v36 = vadd.f32 0.00028619796, %v2744_v30  ;;  %v2755_v27 = vmul.f32 3.8918573e-05, %v6084_v60  ;;  %v2634_v41 = vmul.f32 %v2633_v14, %v5930_v4  ;;  %vm2652_vm6 = vmor %vm2650_vm5, %vm2651_vm4  ;;  %v1498_v28 = vpop.f32.mrf.mxu1 }
 0x225   : > { %v2657_v50 = vor.u32 1.1754944e-38, %v2656_v61  ;;  %4399 = vrcp.f32 %v6091_v22  ;;  %v1819_v26 = vadd.f32 %v5975_v8, %v1767_v34  ;;  %vm2655_vm7 = vcmp.eq.f32.partialorder %v2654_v32, 8.507059e+37 }
 0x226   : > { %v2653_v18 = vsel %vm2652_vm6, %v4398_v40, %v2649_v2  ;;  %v2721_v15 = vmul.f32 %v2720_v52, %v6045_v29  ;;  %v2746_v9 = vmul.f32 %v2745_v36, %v6084_v60  ;;  %v2672_v51 = vmul.f32 %v2671_v23, %v6011_v25 }
 0x227   : > { %v2658_v47 = vsel %vm2655_vm7, %v2657_v50, %v2653_v18  ;;  %v2710_v58 = vmul.f32 %v2709_v13, %v6045_v29  ;;  %v2756_v4 = vadd.f32 0.001143296, %v2755_v27  ;;  %v1496_v61 = vadd.f32 %v1495_v0, %v1322_v12 }
 0x228   : > { %v2659_v14 = vmul.f32 %v2658_v47, %v2634_v41  ;;  %v2722_v44 = vadd.f32 0.4994258, %v2721_v15  ;;  %v2747_v10 = vadd.f32 0.0036580483, %v2746_v9  ;;  %v6108_v40 = vmul.f32 0.5, %v6023_v21 }
 0x229   : > { %v2757_v32 = vmul.f32 %v2756_v4, %v6084_v60  ;;  %v6111_v57 = vmul.f32 0.70710677, %v1819_v26  ;;  %v1768_v17 = vadd.f32 %v1668_v24, %v1493_v39  ;;  %v6115_v48 = vmul.f32 0.5, %v6052_v42 }
 0x22a   : > { %v4295_v34 = vclamps-f32 %v2659_v14, 1.0  ;;  %v2723_v25 = vmul.f32 %v2722_v44, %v6045_v29  ;;  %v2748_v12 = vmul.f32 %v2747_v10, %v6084_v60  ;;  %v2673_v5 = vadd.f32 1.1283791, %v2672_v51 }
 0x22b   : > { %v4400_v0 = vpop.eup %4399  ;;  %v2711_v3 = vadd.f32 0.18741608, %v2710_v58  ;;  %v2758_v21 = vadd.f32 0.014752088, %v2757_v32  ;;  %v2782_v11 = vmul.f32 %v6111_v57, %v6111_v57  ;;  %v2694_v39 = vand.u32 2147483647, %v6091_v22  ;;  %v6152_v32 = vpop.f32.mrf.mxu3 }
 0x22c   : > { %v3879_v23 = vadd.f32 1.0, %v4295_v34  ;;  %v2686_v30 = vmul.f32 %v4400_v0, %v6091_v22  ;;  %v6122_v13 = vadd.f32 %v1498_v28, %v1325_v1  ;;  %v6124_v42 = vadd.f32 1.0, %v2723_v25 }
 0x22d   : > { %v2759_v52 = vmul.f32 %v2758_v21, %v6084_v60  ;;  %v6127_v2 = vmin.f32 %v2782_v11, 16.0  ;;  %v6130_v36 = vadd.f32 %v5975_v8, %v1768_v17  ;;  %v2749_v50 = vadd.f32 0.05243302, %v2748_v12 }
 0x22e   : > { %v3927_v27 = vmul.f32 %v3879_v23, %v6061_v49  ;;  %v2687_v41 = vsub.f32 1.0, %v2686_v30  ;;  %v6133_v18 = vmul.f32 0.5, %v1819_v26  ;;  %v2674_v15 = vmul.f32 %v2673_v5, %v5989_v56 }
 0x22f   : > { %v2696_v9 = vand.u32 2147483648, %v6091_v22  ;;  %v2712_v24 = vmul.f32 %v2711_v3, %v6045_v29  ;;  %4401 = vrcp.f32 %v6124_v42  ;;  %vm2691_vm8 = vweird.f32 %v4400_v0  ;;  %v1671_v29 = vpop.f32.mrf.mxu2 }
 0x230   : > { %3975 = vst [vmem:[%s5141_s26 + $0x88] sm:$0xff] %v3927_v27  ;;  %v2688_v47 = vmul.f32 %v4400_v0, %v2687_v41  ;;  %v2760_v51 = vadd.f32 0.112945676, %v2759_v52  ;;  %v2784_v58 = vmul.f32 2.1237322e-06, %v6127_v2  ;;  %vm2690_vm9 = vweird.f32 %v6091_v22 }
 0x231   : > { %vm6142_vm10 = vcmp.eq.f32.partialorder %v2694_v39, 8.507059e+37  ;;  %v2795_v56 = vmul.f32 3.8918573e-05, %v6127_v2  ;;  %v6148_v26 = vmul.f32 0.70710677, %v6130_v36  ;;  %v2750_v14 = vmul.f32 %v2749_v50, %v6084_v60  ;;  %vm2692_vm11 = vmor %vm2690_vm9, %vm2691_vm8 }
 0x232   : > { %v2689_v4 = vadd.f32 %v4400_v0, %v2688_v47  ;;  %v2761_v44 = vmul.f32 %v2760_v51, %v6084_v60  ;;  %v2785_v10 = vadd.f32 0.00028619796, %v2784_v58  ;;  %v2697_v22 = vor.u32 1.1754944e-38, %v2696_v9 }
 0x233   : > { %v2713_v1 = vadd.f32 1.1283791, %v2712_v24  ;;  %v2796_v17 = vadd.f32 0.001143296, %v2795_v56  ;;  %v2822_v34 = vmul.f32 %v6148_v26, %v6148_v26  ;;  %v1769_v3 = vadd.f32 %v1671_v29, %v1496_v61 }
 0x234   : > { %v2693_v25 = vsel %vm2692_vm11, %v4400_v0, %v2689_v4  ;;  %v2762_v12 = vadd.f32 0.4994258, %v2761_v44  ;;  %v2786_v5 = vmul.f32 %v2785_v10, %v6127_v2  ;;  %v2734_v11 = vand.u32 2147483647, %v6124_v42  ;;  %v1328_v44 = vpop.f32.mrf.mxu0 }
 0x235   : > { %v4402_v28 = vpop.eup %4401  ;;  %v2698_v21 = vsel %vm6142_vm10, %v2697_v22, %v2693_v25  ;;  %v2797_v23 = vmul.f32 %v2796_v17, %v6127_v2  ;;  %v6161_v30 = vmin.f32 %v2822_v34, 16.0  ;;  %v2736_v27 = vand.u32 2147483648, %v6124_v42 }
 0x236   : > { %v2699_v39 = vmul.f32 %v2698_v21, %v2674_v15  ;;  %v2726_v52 = vmul.f32 %v4402_v28, %v6124_v42  ;;  %v2751_v0 = vadd.f32 0.18741608, %v2750_v14  ;;  %v2763_v41 = vmul.f32 %v2762_v12, %v6084_v60  ;;  %v1501_v12 = vpop.f32.mrf.mxu1  ;;  %v6183_v21 = vpop.f32.mrf.mxu3 }
 0x237   : > { %v2787_v50 = vadd.f32 0.0036580483, %v2786_v5  ;;  %v2798_v61 = vadd.f32 0.014752088, %v2797_v23  ;;  %v2824_v9 = vmul.f32 2.1237322e-06, %v6161_v30  ;;  %v6169_v58 = vadd.f32 %v5975_v8, %v1769_v3 }
 0x238   : > { %v4296_v24 = vclamps-f32 %v2699_v39, 1.0  ;;  %v2727_v47 = vsub.f32 1.0, %v2726_v52  ;;  %v2835_v51 = vmul.f32 3.8918573e-05, %v6161_v30  ;;  %v6171_v49 = vadd.f32 1.0, %v2763_v41 }
 0x239   : > { %v2788_v15 = vmul.f32 %v2787_v50, %v6127_v2  ;;  %v2799_v56 = vmul.f32 %v2798_v61, %v6127_v2  ;;  %v2825_v29 = vadd.f32 0.00028619796, %v2824_v9  ;;  %vm2731_vm0 = vweird.f32 %v4402_v28 }
 0x23a   : > { %v3880_v4 = vadd.f32 1.0, %v4296_v24  ;;  %v2728_v14 = vmul.f32 %v4402_v28, %v2727_v47  ;;  %v2836_v10 = vadd.f32 0.001143296, %v2835_v51  ;;  %v2714_v22 = vmul.f32 %v2713_v1, %v6029_v16 }
 0x23b   : > { %vm2730_vm12 = vweird.f32 %v6124_v42  ;;  %vm6177_vm2 = vcmp.eq.f32.partialorder %v2734_v11, 8.507059e+37  ;;  %4403 = vrcp.f32 %v6171_v49  ;;  %v2789_v5 = vadd.f32 0.05243302, %v2788_v15 }
 0x23c   : > { %v3928_v34 = vmul.f32 %v3880_v4, %v6067_v54  ;;  %v2729_v25 = vadd.f32 %v4402_v28, %v2728_v14  ;;  %v2800_v3 = vadd.f32 0.112945676, %v2799_v56  ;;  %vm2732_vm13 = vmor %vm2730_vm12, %vm2731_vm0  ;;  %v2737_v23 = vor.u32 1.1754944e-38, %v2736_v27 }
 0x23d   : > { %v2752_v16 = vmul.f32 %v2751_v0, %v6084_v60  ;;  %v2826_v42 = vmul.f32 %v2825_v29, %v6161_v30  ;;  %v2837_v1 = vmul.f32 %v2836_v10, %v6161_v30  ;;  %v2790_v39 = vmul.f32 %v2789_v5, %v6127_v2  ;;  %v1674_v0 = vpop.f32.mrf.mxu2 }
 0x23e   : > { %3976 = vst [vmem:[%s5141_s26 + $0x90] sm:$0xff] %v3928_v34  ;;  %v2733_v11 = vsel %vm2732_vm13, %v4402_v28, %v2729_v25  ;;  %v2801_v54 = vmul.f32 %v2800_v3, %v6127_v2  ;;  %v6192_v52 = vmul.f32 0.70710677, %v6169_v58  ;;  %v6196_v50 = vadd.f32 %v1501_v12, %v1328_v44 }
 0x23f   : > { %v2738_v41 = vsel %vm6177_vm2, %v2737_v23, %v2733_v11  ;;  %v2827_v27 = vadd.f32 0.0036580483, %v2826_v42  ;;  %v2838_v60 = vadd.f32 0.014752088, %v2837_v1  ;;  %v2791_v9 = vadd.f32 0.18741608, %v2790_v39  ;;  %v1331_v23 = vpop.f32.mrf.mxu0 }
 0x240   : > { %v2739_v61 = vmul.f32 %v2738_v41, %v2714_v22  ;;  %v2802_v24 = vadd.f32 0.4994258, %v2801_v54  ;;  %v2862_v28 = vmul.f32 %v6192_v52, %v6192_v52  ;;  %v2753_v51 = vadd.f32 1.1283791, %v2752_v16  ;;  %v1504_v54 = vpop.f32.mrf.mxu1 }
 0x241   : > { %v4404_v47 = vpop.eup %4403  ;;  %v2774_v15 = vand.u32 2147483647, %v6171_v49  ;;  %v2828_v56 = vmul.f32 %v2827_v27, %v6161_v30  ;;  %v2839_v29 = vmul.f32 %v2838_v60, %v6161_v30  ;;  %v2776_v44 = vand.u32 2147483648, %v6171_v49 }
 0x242   : > { %v4297_v4 = vclamps-f32 %v2739_v61, 1.0  ;;  %v2766_v14 = vmul.f32 %v4404_v47, %v6171_v49  ;;  %v1770_v10 = vadd.f32 %v1674_v0, %v6122_v13  ;;  %v2803_v22 = vmul.f32 %v2802_v24, %v6127_v2 }
 0x243   : > { %v2829_v17 = vadd.f32 0.05243302, %v2828_v56  ;;  %v2840_v34 = vadd.f32 0.112945676, %v2839_v29  ;;  %v6207_v25 = vmin.f32 %v2862_v28, 16.0  ;;  %vm2771_vm3 = vweird.f32 %v4404_v47 }
 0x244   : > { %v3881_v12 = vadd.f32 1.0, %v4297_v4  ;;  %v2767_v5 = vsub.f32 1.0, %v2766_v14  ;;  %v2792_v3 = vmul.f32 %v2791_v9, %v6127_v2  ;;  %v6210_v16 = vadd.f32 1.0, %v2803_v22  ;;  %v1710_v2 = vpop.f32.mrf.mxu3 }
 0x245   : > { %v2830_v42 = vmul.f32 %v2829_v17, %v6161_v30  ;;  %v2841_v1 = vmul.f32 %v2840_v34, %v6161_v30  ;;  %v2864_v13 = vmul.f32 2.1237322e-06, %v6207_v25  ;;  %v2875_v41 = vmul.f32 3.8918573e-05, %v6207_v25 }
 0x246   : > { %v3929_v11 = vmul.f32 %v3881_v12, %v6108_v40  ;;  %v2768_v39 = vmul.f32 %v4404_v47, %v2767_v5  ;;  %v6218_v27 = vadd.f32 %v5975_v8, %v1770_v10  ;;  %v2754_v60 = vmul.f32 %v2753_v51, %v6064_v63 }
 0x247   : > { %vm2770_vm14 = vweird.f32 %v6171_v49  ;;  %4405 = vrcp.f32 %v6210_v16  ;;  %v6223_v0 = vadd.f32 %v1504_v54, %v1331_v23  ;;  %vm2775_vm15 = vcmp.eq.f32.partialorder %v2774_v15, 8.507059e+37 }
 0x248   : > { %3977 = vst [vmem:[%s5141_s26 + $0x98] sm:$0xff] %v3929_v11  ;;  %v2769_v61 = vadd.f32 %v4404_v47, %v2768_v39  ;;  %v2831_v40 = vadd.f32 0.18741608, %v2830_v42  ;;  %v2842_v9 = vadd.f32 0.4994258, %v2841_v1  ;;  %vm2772_vm1 = vmor %vm2770_vm14, %vm2771_vm3  ;;  %v2777_v24 = vor.u32 1.1754944e-38, %v2776_v44 }
 0x249   : > { %v2865_v28 = vadd.f32 0.00028619796, %v2864_v13  ;;  %v2876_v56 = vadd.f32 0.001143296, %v2875_v41  ;;  %v1782_v29 = vadd.f32 %v1710_v2, %v5858_v37  ;;  %v2793_v63 = vadd.f32 1.1283791, %v2792_v3 }
 0x24a   : > { %v2773_v4 = vsel %vm2772_vm1, %v4404_v47, %v2769_v61  ;;  %v2843_v49 = vmul.f32 %v2842_v9, %v6161_v30  ;;  %v6230_v51 = vmul.f32 0.70710677, %v6218_v27  ;;  %v2832_v10 = vmul.f32 %v2831_v40, %v6161_v30 }
 0x24b   : > { %v2778_v14 = vsel %vm2775_vm15, %v2777_v24, %v2773_v4  ;;  %v2866_v15 = vmul.f32 %v2865_v28, %v6207_v25  ;;  %v2877_v22 = vmul.f32 %v2876_v56, %v6207_v25  ;;  %v2814_v44 = vand.u32 2147483647, %v6210_v16 }
 0x24c   : > { %v2779_v17 = vmul.f32 %v2778_v14, %v2754_v60  ;;  %v6237_v34 = vmul.f32 0.5, %v6130_v36  ;;  %v6239_v37 = vadd.f32 1.0, %v2843_v49  ;;  %v2902_v3 = vmul.f32 %v6230_v51, %v6230_v51 }
 0x24d   : > { %v4406_v47 = vpop.eup %4405  ;;  %v2867_v12 = vadd.f32 0.0036580483, %v2866_v15  ;;  %v2878_v5 = vadd.f32 0.014752088, %v2877_v22  ;;  %v6244_v30 = vadd.f32 %v5975_v8, %v1782_v29  ;;  %v2794_v42 = vmul.f32 %v2793_v63, %v6111_v57 }
 0x24e   : > { %v4298_v23 = vclamps-f32 %v2779_v17, 1.0  ;;  %v2806_v1 = vmul.f32 %v4406_v47, %v6210_v16  ;;  %v6249_v13 = vmul.f32 0.5, %v6169_v58  ;;  %vm2810_vm4 = vweird.f32 %v6210_v16 }
 0x24f   : > { %v2816_v36 = vand.u32 2147483648, %v6210_v16  ;;  %v2833_v11 = vadd.f32 1.1283791, %v2832_v10  ;;  %4407 = vrcp.f32 %v6239_v37  ;;  %v2868_v41 = vmul.f32 %v2867_v12, %v6207_v25 }
 0x250   : > { %v3882_v39 = vadd.f32 1.0, %v4298_v23  ;;  %v2807_v54 = vsub.f32 1.0, %v2806_v1  ;;  %v2879_v2 = vmul.f32 %v2878_v5, %v6207_v25  ;;  %vm2811_vm5 = vweird.f32 %v4406_v47 }
 0x251   : > { %vm6256_vm6 = vcmp.eq.f32.partialorder %v2814_v44, 8.507059e+37  ;;  %v6260_v58 = vmin.f32 %v2902_v3, 16.0  ;;  %v6263_v60 = vmul.f32 0.70710677, %v6244_v30  ;;  %v2869_v9 = vadd.f32 0.05243302, %v2868_v41  ;;  %vm2812_vm7 = vmor %vm2810_vm4, %vm2811_vm5  ;;  %v1677_v44 = vpop.f32.mrf.mxu2 }
 0x252   : > { %v3930_v61 = vmul.f32 %v3882_v39, %v6115_v48  ;;  %v2808_v40 = vmul.f32 %v4406_v47, %v2807_v54  ;;  %v2880_v24 = vadd.f32 0.112945676, %v2879_v2  ;;  %v2817_v28 = vor.u32 1.1754944e-38, %v2816_v36 }
 0x253   : > { %v2904_v56 = vmul.f32 2.1237322e-06, %v6260_v58  ;;  %v2915_v29 = vmul.f32 3.8918573e-05, %v6260_v58  ;;  %v3382_v4 = vmul.f32 %v6263_v60, %v6263_v60  ;;  %v2834_v49 = vmul.f32 %v2833_v11, %v6148_v26 }
 0x254   : > { %3978 = vst [vmem:[%s5141_s26 + $0xa0] sm:$0xff] %v3930_v61  ;;  %v2809_v63 = vadd.f32 %v4406_v47, %v2808_v40  ;;  %v2854_v14 = vand.u32 2147483647, %v6239_v37  ;;  %v2881_v10 = vmul.f32 %v2880_v24, %v6207_v25  ;;  %vm2850_vm8 = vweird.f32 %v6239_v37 }
 0x255   : > { %v4408_v48 = vpop.eup %4407  ;;  %v2905_v15 = vadd.f32 0.00028619796, %v2904_v56  ;;  %v2916_v22 = vadd.f32 0.001143296, %v2915_v29  ;;  %v6278_v17 = vmin.f32 %v3382_v4, 16.0  ;;  %v2856_v26 = vand.u32 2147483648, %v6239_v37 }
 0x256   : > { %v2813_v12 = vsel %vm2812_vm7, %v4406_v47, %v2809_v63  ;;  %v2846_v5 = vmul.f32 %v4408_v48, %v6239_v37  ;;  %v2870_v3 = vmul.f32 %v2869_v9, %v6207_v25  ;;  %v2882_v1 = vadd.f32 0.4994258, %v2881_v10 }
 0x257   : > { %v2818_v23 = vsel %vm6256_vm6, %v2817_v28, %v2813_v12  ;;  %v2906_v16 = vmul.f32 %v2905_v15, %v6260_v58  ;;  %v2917_v36 = vmul.f32 %v2916_v22, %v6260_v58  ;;  %v3384_v54 = vmul.f32 2.1237322e-06, %v6278_v17  ;;  %v1713_v15 = vpop.f32.mrf.mxu3 }
 0x258   : > { %v2819_v11 = vmul.f32 %v2818_v23, %v2794_v42  ;;  %v2847_v39 = vsub.f32 1.0, %v2846_v5  ;;  %v1771_v47 = vadd.f32 %v1677_v44, %v6196_v50  ;;  %v2883_v41 = vmul.f32 %v2882_v1, %v6207_v25 }
 0x259   : > { %v2907_v2 = vadd.f32 0.0036580483, %v2906_v16  ;;  %v2918_v61 = vadd.f32 0.014752088, %v2917_v36  ;;  %v3395_v40 = vmul.f32 3.8918573e-05, %v6278_v17  ;;  %vm2851_vm9 = vweird.f32 %v4408_v48 }
 0x25a   : > { %v4299_v9 = vclamps-f32 %v2819_v11, 1.0  ;;  %v2848_v57 = vmul.f32 %v4408_v48, %v2847_v39  ;;  %v3385_v24 = vadd.f32 0.00028619796, %v3384_v54  ;;  %v2871_v28 = vadd.f32 0.18741608, %v2870_v3  ;;  %vm2852_vm10 = vmor %vm2850_vm8, %vm2851_vm9  ;;  %v1334_v3 = vpop.f32.mrf.mxu0 }
 0x25b   : > { %v6291_v56 = vadd.f32 1.0, %v2883_v41  ;;  %v2908_v42 = vmul.f32 %v2907_v2, %v6260_v58  ;;  %v2919_v29 = vmul.f32 %v2918_v61, %v6260_v58  ;;  %v3396_v10 = vadd.f32 0.001143296, %v3395_v40 }
 0x25c   : > { %v3883_v4 = vadd.f32 1.0, %v4299_v9  ;;  %v2849_v63 = vadd.f32 %v4408_v48, %v2848_v57  ;;  %v3386_v50 = vmul.f32 %v3385_v24, %v6278_v17  ;;  %vm2855_vm11 = vcmp.eq.f32.partialorder %v2854_v14, 8.507059e+37 }
 0x25d   : > { %v2857_v22 = vor.u32 1.1754944e-38, %v2856_v26  ;;  %4409 = vrcp.f32 %v6291_v56  ;;  %v6300_v44 = vadd.f32 %v5975_v8, %v1771_v47  ;;  %v2909_v23 = vadd.f32 0.05243302, %v2908_v42  ;;  %v1507_v26 = vpop.f32.mrf.mxu1 }
 0x25e   : > { %v3931_v12 = vmul.f32 %v3883_v4, %v6133_v18  ;;  %v2853_v5 = vsel %vm2852_vm10, %v4408_v48, %v2849_v63  ;;  %v2920_v1 = vadd.f32 0.112945676, %v2919_v29  ;;  %v2872_v36 = vmul.f32 %v2871_v28, %v6207_v25 }
 0x25f   : > { %v2858_v16 = vsel %vm2855_vm11, %v2857_v22, %v2853_v5  ;;  %v3387_v11 = vadd.f32 0.0036580483, %v3386_v50  ;;  %v1783_v37 = vadd.f32 %v1713_v15, %v5862_v6  ;;  %v2910_v39 = vmul.f32 %v2909_v23, %v6260_v58 }
 0x260   : > { %3979 = vst [vmem:[%s5141_s26 + $0xa8] sm:$0xff] %v3931_v12  ;;  %v2859_v14 = vmul.f32 %v2858_v16, %v2834_v49  ;;  %v2921_v54 = vmul.f32 %v2920_v1, %v6260_v58  ;;  %v3397_v47 = vmul.f32 %v3396_v10, %v6278_v17  ;;  %v6309_v18 = vadd.f32 %v1507_v26, %v1334_v3 }
 0x261   : > { %v6312_v48 = vmul.f32 0.5, %v6218_v27  ;;  %v3388_v41 = vmul.f32 %v3387_v11, %v6278_v17  ;;  %v6316_v25 = vmul.f32 0.70710677, %v6300_v44  ;;  %v2911_v2 = vadd.f32 0.18741608, %v2910_v39 }
 0x262   : > { %v4300_v6 = vclamps-f32 %v2859_v14, 1.0  ;;  %v2922_v49 = vadd.f32 0.4994258, %v2921_v54  ;;  %v6319_v61 = vmul.f32 0.5, %v6244_v30  ;;  %v3398_v57 = vadd.f32 0.014752088, %v3397_v47 }
 0x263   : > { %v4410_v40 = vpop.eup %4409  ;;  %v3389_v9 = vadd.f32 0.05243302, %v3388_v41  ;;  %v2942_v24 = vmul.f32 %v6316_v25, %v6316_v25  ;;  %v6324_v27 = vadd.f32 %v5975_v8, %v1783_v37  ;;  %v2873_v42 = vadd.f32 1.1283791, %v2872_v36 }
 0x264   : > { %v3884_v28 = vadd.f32 1.0, %v4300_v6  ;;  %v2886_v29 = vmul.f32 %v4410_v40, %v6291_v56  ;;  %v2912_v4 = vmul.f32 %v2911_v2, %v6260_v58  ;;  %v2894_v63 = vand.u32 2147483647, %v6291_v56 }
 0x265   : > { %v2923_v30 = vmul.f32 %v2922_v49, %v6260_v58  ;;  %v3399_v50 = vmul.f32 %v3398_v57, %v6278_v17  ;;  %v6331_v10 = vmin.f32 %v2942_v24, 16.0  ;;  %v3390_v5 = vmul.f32 %v3389_v9, %v6278_v17 }
 0x266   : > { %v3932_v15 = vmul.f32 %v3884_v28, %v6237_v34  ;;  %v2887_v22 = vsub.f32 1.0, %v2886_v29  ;;  %v2913_v12 = vadd.f32 1.1283791, %v2912_v4  ;;  %v2896_v3 = vand.u32 2147483648, %v6291_v56  ;;  %v1680_v34 = vpop.f32.mrf.mxu2 }
 0x267   : > { %v6336_v23 = vadd.f32 1.0, %v2923_v30  ;;  %v3400_v1 = vadd.f32 0.112945676, %v3399_v50  ;;  %v6339_v16 = vmul.f32 0.70710677, %v6324_v27  ;;  %vm2891_vm0 = vweird.f32 %v4410_v40 }
 0x268   : > { %3980 = vst [vmem:[%s5141_s26 + $0xb0] sm:$0xff] %v3932_v15  ;;  %v2888_v58 = vmul.f32 %v4410_v40, %v2887_v22  ;;  %v2944_v36 = vmul.f32 2.1237322e-06, %v6331_v10  ;;  %v2955_v11 = vmul.f32 3.8918573e-05, %v6331_v10  ;;  %v2874_v37 = vmul.f32 %v2873_v42, %v6192_v52 }
 0x269   : > { %vm2890_vm12 = vweird.f32 %v6291_v56  ;;  %vm2895_vm2 = vcmp.eq.f32.partialorder %v2894_v63, 8.507059e+37  ;;  %4411 = vrcp.f32 %v6336_v23  ;;  %v3391_v26 = vadd.f32 0.18741608, %v3390_v5 }
 0x26a   : > { %v2889_v14 = vadd.f32 %v4410_v40, %v2888_v58  ;;  %v3401_v39 = vmul.f32 %v3400_v1, %v6278_v17  ;;  %v2945_v54 = vadd.f32 0.00028619796, %v2944_v36  ;;  %vm2892_vm13 = vmor %vm2890_vm12, %vm2891_vm0  ;;  %v2897_v47 = vor.u32 1.1754944e-38, %v2896_v3 }
 0x26b   : > { %v2956_v41 = vadd.f32 0.001143296, %v2955_v11  ;;  %v3422_v6 = vmul.f32 %v6339_v16, %v6339_v16  ;;  %v1772_v2 = vadd.f32 %v1680_v34, %v6223_v0  ;;  %v2914_v52 = vmul.f32 %v2913_v12, %v6230_v51 }
 0x26c   : > { %v2893_v49 = vsel %vm2892_vm13, %v4410_v40, %v2889_v14  ;;  %v3402_v56 = vadd.f32 0.4994258, %v3401_v39  ;;  %v2946_v9 = vmul.f32 %v2945_v54, %v6331_v10  ;;  %v2934_v24 = vand.u32 2147483647, %v6336_v23 }
 0x26d   : > { %v2898_v57 = vsel %vm2895_vm2, %v2897_v47, %v2893_v49  ;;  %v2957_v28 = vmul.f32 %v2956_v41, %v6331_v10  ;;  %v6355_v42 = vmin.f32 %v3422_v6, 16.0  ;;  %v3392_v4 = vmul.f32 %v3391_v26, %v6278_v17 }
 0x26e   : > { %v2899_v29 = vmul.f32 %v2898_v57, %v2874_v37  ;;  %v3403_v63 = vmul.f32 %v3402_v56, %v6278_v17  ;;  %v2947_v30 = vadd.f32 0.0036580483, %v2946_v9  ;;  %vm2930_vm3 = vweird.f32 %v6336_v23  ;;  %v1716_v37 = vpop.f32.mrf.mxu3 }
 0x26f   : > { %v4412_v0 = vpop.eup %4411  ;;  %v2958_v51 = vadd.f32 0.014752088, %v2957_v28  ;;  %v3424_v40 = vmul.f32 2.1237322e-06, %v6355_v42  ;;  %v3435_v50 = vmul.f32 3.8918573e-05, %v6355_v42  ;;  %v6371_v39 = vadd.f32 %v5975_v8, %v1772_v2 }
 0x270   : > { %v4301_v15 = vclamps-f32 %v2899_v29, 1.0  ;;  %v2926_v22 = vmul.f32 %v4412_v0, %v6336_v23  ;;  %v2936_v12 = vand.u32 2147483648, %v6336_v23  ;;  %v6364_v5 = vadd.f32 1.0, %v3403_v63 }
 0x271   : > { %v2948_v3 = vmul.f32 %v2947_v30, %v6331_v10  ;;  %v2959_v17 = vmul.f32 %v2958_v51, %v6331_v10  ;;  %v3425_v1 = vadd.f32 0.00028619796, %v3424_v40  ;;  %v3436_v58 = vadd.f32 0.001143296, %v3435_v50 }
 0x272   : > { %v3885_v36 = vadd.f32 1.0, %v4301_v15  ;;  %v2927_v11 = vsub.f32 1.0, %v2926_v22  ;;  %v3393_v34 = vadd.f32 1.1283791, %v3392_v4  ;;  %4413 = vrcp.f32 %v6364_v5  ;;  %v6400_v22 = vld [vmem:[%s7187_s3] ss:$0 sm:$0xff] }
 0x273   : > { %vm2931_vm14 = vweird.f32 %v4412_v0  ;;  %v2949_v14 = vadd.f32 0.05243302, %v2948_v3  ;;  %v3426_v26 = vmul.f32 %v3425_v1, %v6355_v42  ;;  %v2960_v41 = vadd.f32 0.112945676, %v2959_v17 }
 0x274   : > { %v3933_v54 = vmul.f32 %v3885_v36, %v6249_v13  ;;  %v2928_v47 = vmul.f32 %v4412_v0, %v2927_v11  ;;  %v3437_v6 = vmul.f32 %v3436_v58, %v6355_v42  ;;  %vm6375_vm15 = vcmp.eq.f32.partialorder %v2934_v24, 8.507059e+37  ;;  %vm2932_vm1 = vmor %vm2930_vm3, %vm2931_vm14 }
 0x275   : > { %v2950_v56 = vmul.f32 %v2949_v14, %v6331_v10  ;;  %v3427_v9 = vadd.f32 0.0036580483, %v3426_v26  ;;  %v1784_v57 = vadd.f32 %v1716_v37, %v5892_v20  ;;  %v2937_v29 = vor.u32 1.1754944e-38, %v2936_v12 }
 0x276   : > { %3981 = vst [vmem:[%s5141_s26 + $0xb8] sm:$0xff] %v3933_v54  ;;  %v2929_v28 = vadd.f32 %v4412_v0, %v2928_v47  ;;  %v2961_v8 = vmul.f32 %v2960_v41, %v6331_v10  ;;  %v3438_v2 = vadd.f32 0.014752088, %v3437_v6  ;;  %v3394_v13 = vmul.f32 %v3393_v34, %v6263_v60 }
 0x277   : > { %v2951_v24 = vadd.f32 0.18741608, %v2950_v56  ;;  %v3428_v4 = vmul.f32 %v3427_v9, %v6355_v42  ;;  %v6389_v63 = vmul.f32 0.70710677, %v6371_v39  ;;  %v3414_v51 = vand.u32 2147483647, %v6364_v5 }
 0x278   : > { %v4414_v30 = vpop.eup %4413  ;;  %v2933_v20 = vsel %vm2932_vm1, %v4412_v0, %v2929_v28  ;;  %v2962_v40 = vadd.f32 0.4994258, %v2961_v8  ;;  %v3439_v50 = vmul.f32 %v3438_v2, %v6355_v42  ;;  %v3416_v60 = vand.u32 2147483648, %v6364_v5 }
 0x279   : > { %v2938_v15 = vsel %vm6375_vm15, %v2937_v29, %v2933_v20  ;;  %v3406_v23 = vmul.f32 %v4414_v30, %v6364_v5  ;;  %v6403_v12 = vadd.f32 %v6400_v22, %v1784_v57  ;;  %v3429_v17 = vadd.f32 0.05243302, %v3428_v4 }
 0x27a   : > { %v2939_v0 = vmul.f32 %v2938_v15, %v2914_v52  ;;  %v2963_v3 = vmul.f32 %v2962_v40, %v6331_v10  ;;  %v3440_v1 = vadd.f32 0.112945676, %v3439_v50  ;;  %vm3410_vm4 = vweird.f32 %v6364_v5 }
 0x27b   : > { %v3407_v58 = vsub.f32 1.0, %v3406_v23  ;;  %v2952_v36 = vmul.f32 %v2951_v24, %v6331_v10  ;;  %v2982_v11 = vmul.f32 %v6389_v63, %v6389_v63  ;;  %v3430_v14 = vmul.f32 %v3429_v17, %v6355_v42 }
 0x27c   : > { %v4302_v34 = vclamps-f32 %v2939_v0, 1.0  ;;  %v6410_v37 = vadd.f32 1.0, %v2963_v3  ;;  %v3441_v26 = vmul.f32 %v3440_v1, %v6355_v42  ;;  %vm3411_vm5 = vweird.f32 %v4414_v30  ;;  %v1683_v0 = vpop.f32.mrf.mxu2  ;;  %v1719_v3 = vpop.f32.mrf.mxu3 }
 0x27d   : > { %v3408_v52 = vmul.f32 %v4414_v30, %v3407_v58  ;;  %vm6414_vm6 = vcmp.eq.f32.partialorder %v3414_v51, 8.507059e+37  ;;  %v6418_v47 = vmin.f32 %v2982_v11, 16.0  ;;  %v3417_v10 = vor.u32 1.1754944e-38, %v3416_v60  ;;  %vm3412_vm7 = vmor %vm3410_vm4, %vm3411_vm5 }
 0x27e   : > { %v3886_v41 = vadd.f32 1.0, %v4302_v34  ;;  %4415 = vrcp.f32 %v6410_v37  ;;  %v6422_v6 = vmul.f32 0.70710677, %v6403_v12  ;;  %v2953_v56 = vadd.f32 1.1283791, %v2952_v36 }
 0x27f   : > { %v3409_v49 = vadd.f32 %v4414_v30, %v3408_v52  ;;  %v3431_v9 = vadd.f32 0.18741608, %v3430_v14  ;;  %v3442_v57 = vadd.f32 0.4994258, %v3441_v26  ;;  %v2974_v29 = vand.u32 2147483647, %v6410_v37 }
 0x280   : > { %v3934_v28 = vmul.f32 %v3886_v41, %v6312_v48  ;;  %v2984_v8 = vmul.f32 2.1237322e-06, %v6418_v47  ;;  %v2995_v2 = vmul.f32 3.8918573e-05, %v6418_v47  ;;  %v2976_v4 = vand.u32 2147483648, %v6410_v37 }
 0x281   : > { %v3413_v24 = vsel %vm3412_vm7, %v4414_v30, %v3409_v49  ;;  %v3432_v20 = vmul.f32 %v3431_v9, %v6355_v42  ;;  %v3443_v51 = vmul.f32 %v3442_v57, %v6355_v42  ;;  %v3462_v50 = vmul.f32 %v6422_v6, %v6422_v6 }
 0x282   : > { %3982 = vst [vmem:[%s5141_s26 + $0xc0] sm:$0xff] %v3934_v28  ;;  %v3418_v48 = vsel %vm6414_vm6, %v3417_v10, %v3413_v24  ;;  %v2985_v40 = vadd.f32 0.00028619796, %v2984_v8  ;;  %v2996_v5 = vadd.f32 0.001143296, %v2995_v2  ;;  %v6439_v23 = vmul.f32 0.5, %v6300_v44 }
 0x283   : > { %v3419_v15 = vmul.f32 %v3418_v48, %v3394_v13  ;;  %v2954_v30 = vmul.f32 %v2953_v56, %v6316_v25  ;;  %v6442_v60 = vadd.f32 1.0, %v3443_v51  ;;  %vm2970_vm8 = vweird.f32 %v6410_v37  ;;  %v1510_v48 = vpop.f32.mrf.mxu1 }
 0x284   : > { %v4416_v42 = vpop.eup %4415  ;;  %v2986_v17 = vmul.f32 %v2985_v40, %v6418_v47  ;;  %v2997_v1 = vmul.f32 %v2996_v5, %v6418_v47  ;;  %v6447_v58 = vmin.f32 %v3462_v50, 16.0  ;;  %vm6450_vm9 = vcmp.eq.f32.partialorder %v2974_v29, 8.507059e+37 }
 0x285   : > { %v4314_v36 = vclamps-f32 %v3419_v15, 1.0  ;;  %v2966_v13 = vmul.f32 %v4416_v42, %v6410_v37  ;;  %v2977_v25 = vor.u32 1.1754944e-38, %v2976_v4  ;;  %v3433_v11 = vadd.f32 1.1283791, %v3432_v20 }
 0x286   : > { %4417 = vrcp.f32 %v6442_v60  ;;  %v1773_v34 = vadd.f32 %v1683_v0, %v6309_v18  ;;  %v1785_v14 = vadd.f32 %v1719_v3, %v5961_v46  ;;  %v2987_v54 = vadd.f32 0.0036580483, %v2986_v17  ;;  %v1337_v46 = vpop.f32.mrf.mxu0 }
 0x287   : > { %v3898_v26 = vadd.f32 1.0, %v4314_v36  ;;  %v2967_v52 = vsub.f32 1.0, %v2966_v13  ;;  %v2998_v41 = vadd.f32 0.014752088, %v2997_v1  ;;  %vm2971_vm10 = vweird.f32 %v4416_v42 }
 0x288   : > { %v3454_v10 = vand.u32 2147483647, %v6442_v60  ;;  %v3464_v49 = vmul.f32 2.1237322e-06, %v6447_v58  ;;  %v3475_v56 = vmul.f32 3.8918573e-05, %v6447_v58  ;;  %v2988_v28 = vmul.f32 %v2987_v54, %v6418_v47  ;;  %vm2972_vm0 = vmor %vm2970_vm8, %vm2971_vm10 }
 0x289   : > { %v3946_v9 = vmul.f32 %v3898_v26, %v6319_v61  ;;  %v2968_v57 = vmul.f32 %v4416_v42, %v2967_v52  ;;  %v2999_v18 = vmul.f32 %v2998_v41, %v6418_v47  ;;  %v3434_v29 = vmul.f32 %v3433_v11, %v6339_v16 }
 0x28a   : > { %v3465_v8 = vadd.f32 0.00028619796, %v3464_v49  ;;  %v3476_v2 = vadd.f32 0.001143296, %v3475_v56  ;;  %v6465_v24 = vadd.f32 %v6400_v22, %v1773_v34  ;;  %vm3450_vm11 = vweird.f32 %v6442_v60 }
 0x28b   : > { %3994 = vst [vmem:[%s5141_s26 + $0x120] sm:$0xff] %v3946_v9  ;;  %v2969_v4 = vadd.f32 %v4416_v42, %v2968_v57  ;;  %v2989_v20 = vadd.f32 0.05243302, %v2988_v28  ;;  %v3000_v51 = vadd.f32 0.112945676, %v2999_v18  ;;  %v3456_v40 = vand.u32 2147483648, %v6442_v60 }
 0x28c   : > { %v4418_v61 = vpop.eup %4417  ;;  %v3466_v16 = vmul.f32 %v3465_v8, %v6447_v58  ;;  %v3477_v5 = vmul.f32 %v3476_v2, %v6447_v58  ;;  %v6476_v50 = vmul.f32 0.70710677, %v6465_v24  ;;  %vm6479_vm12 = vcmp.eq.f32.partialorder %v3454_v10, 8.507059e+37 }
 0x28d   : > { %v2973_v15 = vsel %vm2972_vm0, %v4416_v42, %v2969_v4  ;;  %v3446_v0 = vmul.f32 %v4418_v61, %v6442_v60  ;;  %v2990_v17 = vmul.f32 %v2989_v20, %v6418_v47  ;;  %v3001_v1 = vmul.f32 %v3000_v51, %v6418_v47 }
 0x28e   : > { %v2978_v37 = vsel %vm6450_vm9, %v2977_v25, %v2973_v15  ;;  %v3467_v36 = vadd.f32 0.0036580483, %v3466_v16  ;;  %v3478_v13 = vadd.f32 0.014752088, %v3477_v5  ;;  %v3022_v42 = vmul.f32 %v6476_v50, %v6476_v50  ;;  %v1340_v2 = vpop.f32.mrf.mxu0 }
 0x28f   : > { %v2979_v11 = vmul.f32 %v2978_v37, %v2954_v30  ;;  %v3447_v34 = vsub.f32 1.0, %v3446_v0  ;;  %v6490_v26 = vadd.f32 %v6400_v22, %v1785_v14  ;;  %vm3451_vm2 = vweird.f32 %v4418_v61 }
 0x290   : > { %v3002_v52 = vadd.f32 0.4994258, %v3001_v1  ;;  %v3468_v54 = vmul.f32 %v3467_v36, %v6447_v58  ;;  %v3479_v41 = vmul.f32 %v3478_v13, %v6447_v58  ;;  %v2991_v10 = vadd.f32 0.18741608, %v2990_v17  ;;  %vm3452_vm13 = vmor %vm3450_vm11, %vm3451_vm2  ;;  %v1513_v17 = vpop.f32.mrf.mxu1 }
 0x291   : > { %v4303_v44 = vclamps-f32 %v2979_v11, 1.0  ;;  %v3448_v25 = vmul.f32 %v4418_v61, %v3447_v34  ;;  %v6494_v49 = vmin.f32 %v3022_v42, 16.0  ;;  %v3457_v56 = vor.u32 1.1754944e-38, %v3456_v40 }
 0x292   : > { %v3003_v30 = vmul.f32 %v3002_v52, %v6418_v47  ;;  %v3469_v9 = vadd.f32 0.05243302, %v3468_v54  ;;  %v3480_v57 = vadd.f32 0.112945676, %v3479_v41  ;;  %v6499_v8 = vmul.f32 0.70710677, %v6490_v26 }
 0x293   : > { %v3887_v28 = vadd.f32 1.0, %v4303_v44  ;;  %v3449_v18 = vadd.f32 %v4418_v61, %v3448_v25  ;;  %v3024_v14 = vmul.f32 2.1237322e-06, %v6494_v49  ;;  %v3035_v40 = vmul.f32 3.8918573e-05, %v6494_v49 }
 0x294   : > { %v6504_v4 = vadd.f32 1.0, %v3003_v30  ;;  %v3470_v20 = vmul.f32 %v3469_v9, %v6447_v58  ;;  %v3481_v51 = vmul.f32 %v3480_v57, %v6447_v58  ;;  %v2992_v15 = vmul.f32 %v2991_v10, %v6418_v47 }
 0x295   : > { %v3935_v16 = vmul.f32 %v3887_v28, %v6439_v23  ;;  %v3453_v5 = vsel %vm3452_vm13, %v4418_v61, %v3449_v18  ;;  %v3025_v0 = vadd.f32 0.00028619796, %v3024_v14  ;;  %v6513_v60 = vadd.f32 %v5996_v53, %v5497_v55  ;;  %v1686_v53 = vpop.f32.mrf.mxu2 }
 0x296   : > { %v1511_v37 = vadd.f32 %v1510_v48, %v1337_v46  ;;  %v3458_v1 = vsel %vm6479_vm12, %v3457_v56, %v3453_v5  ;;  %4419 = vrcp.f32 %v6504_v4  ;;  %v6519_v13 = vadd.f32 %v1513_v17, %v1340_v2  ;;  %v1722_v56 = vpop.f32.mrf.mxu3 }
 0x297   : > { %3983 = vst [vmem:[%s5141_s26 + $0xc8] sm:$0xff] %v3935_v16  ;;  %v3459_v36 = vmul.f32 %v3458_v1, %v3434_v29  ;;  %v3471_v23 = vadd.f32 0.18741608, %v3470_v20  ;;  %v3482_v61 = vadd.f32 0.4994258, %v3481_v51  ;;  %v1883_v47 = vmul.f32 0.5, %v6324_v27 }
 0x298   : > { %v3026_v11 = vmul.f32 %v3025_v0, %v6494_v49  ;;  %v3036_v34 = vadd.f32 0.001143296, %v3035_v40  ;;  %v3502_v55 = vmul.f32 %v6499_v8, %v6499_v8  ;;  %v6526_v48 = vmul.f32 0.5, %v6371_v39 }
 0x299   : > { %v4315_v46 = vclamps-f32 %v3459_v36, 1.0  ;;  %v2993_v3 = vadd.f32 1.1283791, %v2992_v15  ;;  %v3483_v29 = vmul.f32 %v3482_v61, %v6447_v58  ;;  %v3472_v42 = vmul.f32 %v3471_v23, %v6447_v58 }
 0x29a   : > { %v3027_v52 = vadd.f32 0.0036580483, %v3026_v11  ;;  %v3037_v54 = vmul.f32 %v3036_v34, %v6494_v49  ;;  %v6531_v27 = vmin.f32 %v3502_v55, 16.0  ;;  %v3014_v44 = vand.u32 2147483647, %v6504_v4 }
 0x29b   : > { %v3899_v41 = vadd.f32 1.0, %v4315_v46  ;;  %v6534_v25 = vadd.f32 1.0, %v3483_v29  ;;  %v1774_v10 = vadd.f32 %v1686_v53, %v1511_v37  ;;  %v2994_v18 = vmul.f32 %v2993_v3, %v6389_v63 }
 0x29c   : > { %v4420_v39 = vpop.eup %4419  ;;  %v3028_v30 = vmul.f32 %v3027_v52, %v6494_v49  ;;  %v3038_v9 = vadd.f32 0.014752088, %v3037_v54  ;;  %v3504_v57 = vmul.f32 2.1237322e-06, %v6531_v27  ;;  %v3515_v58 = vmul.f32 3.8918573e-05, %v6531_v27 }
 0x29d   : > { %v3947_v28 = vmul.f32 %v3899_v41, %v1883_v47  ;;  %v3006_v14 = vmul.f32 %v4420_v39, %v6504_v4  ;;  %vm3010_vm3 = vweird.f32 %v6504_v4  ;;  %v3016_v2 = vand.u32 2147483648, %v6504_v4 }
 0x29e   : > { %v3473_v20 = vadd.f32 1.1283791, %v3472_v42  ;;  %4421 = vrcp.f32 %v6534_v25  ;;  %v1786_v51 = vadd.f32 %v1722_v56, %v6007_v33  ;;  %v3029_v16 = vadd.f32 0.05243302, %v3028_v30 }
 0x29f   : > { %3995 = vst [vmem:[%s5141_s26 + $0x128] sm:$0xff] %v3947_v28  ;;  %v3007_v40 = vsub.f32 1.0, %v3006_v14  ;;  %v3039_v5 = vmul.f32 %v3038_v9, %v6494_v49  ;;  %v3505_v15 = vadd.f32 0.00028619796, %v3504_v57  ;;  %vm3011_vm14 = vweird.f32 %v4420_v39 }
 0x2a0   : > { %vm6547_vm15 = vcmp.eq.f32.partialorder %v3014_v44, 8.507059e+37  ;;  %v3516_v0 = vadd.f32 0.001143296, %v3515_v58  ;;  %v6552_v17 = vadd.f32 %v6400_v22, %v1774_v10  ;;  %v3030_v1 = vmul.f32 %v3029_v16, %v6494_v49  ;;  %vm3012_vm1 = vmor %vm3010_vm3, %vm3011_vm14 }
 0x2a1   : > { %v3008_v37 = vmul.f32 %v4420_v39, %v3007_v40  ;;  %v3040_v36 = vadd.f32 0.112945676, %v3039_v5  ;;  %v3506_v33 = vmul.f32 %v3505_v15, %v6531_v27  ;;  %v3017_v23 = vor.u32 1.1754944e-38, %v3016_v2 }
 0x2a2   : > { %v3517_v61 = vmul.f32 %v3516_v0, %v6531_v27  ;;  %v6558_v47 = vmul.f32 0.70710677, %v6552_v17  ;;  %v6561_v11 = vadd.f32 %v6400_v22, %v1786_v51  ;;  %v3474_v55 = vmul.f32 %v3473_v20, %v6422_v6 }
 0x2a3   : > { %v3009_v34 = vadd.f32 %v4420_v39, %v3008_v37  ;;  %v3041_v53 = vmul.f32 %v3040_v36, %v6494_v49  ;;  %v3507_v46 = vadd.f32 0.0036580483, %v3506_v33  ;;  %vm3490_vm4 = vweird.f32 %v6534_v25 }
 0x2a4   : > { %v4422_v3 = vpop.eup %4421  ;;  %v3518_v29 = vadd.f32 0.014752088, %v3517_v61  ;;  %v3062_v42 = vmul.f32 %v6558_v47, %v6558_v47  ;;  %v6572_v52 = vmul.f32 0.70710677, %v6561_v11  ;;  %v3494_v41 = vand.u32 2147483647, %v6534_v25 }
 0x2a5   : > { %v3013_v54 = vsel %vm3012_vm1, %v4420_v39, %v3009_v34  ;;  %v3486_v6 = vmul.f32 %v4422_v3, %v6534_v25  ;;  %v3031_v44 = vadd.f32 0.18741608, %v3030_v1  ;;  %v3042_v4 = vadd.f32 0.4994258, %v3041_v53 }
 0x2a6   : > { %v3018_v10 = vsel %vm6547_vm15, %v3017_v23, %v3013_v54  ;;  %v3508_v56 = vmul.f32 %v3507_v46, %v6531_v27  ;;  %v3519_v30 = vmul.f32 %v3518_v29, %v6531_v27  ;;  %v3496_v58 = vand.u32 2147483648, %v6534_v25 }
 0x2a7   : > { %v3019_v9 = vmul.f32 %v3018_v10, %v2994_v18  ;;  %v3487_v57 = vsub.f32 1.0, %v3486_v6  ;;  %v6581_v28 = vmin.f32 %v3062_v42, 16.0  ;;  %v3043_v39 = vmul.f32 %v3042_v4, %v6494_v49 }
 0x2a8   : > { %v3509_v14 = vadd.f32 0.05243302, %v3508_v56  ;;  %v3520_v2 = vadd.f32 0.112945676, %v3519_v30  ;;  %v3542_v20 = vmul.f32 %v6572_v52, %v6572_v52  ;;  %vm3491_vm5 = vweird.f32 %v4422_v3  ;;  %v1689_v56 = vpop.f32.mrf.mxu2 }
 0x2a9   : > { %v4304_v51 = vclamps-f32 %v3019_v9, 1.0  ;;  %v3488_v40 = vmul.f32 %v4422_v3, %v3487_v57  ;;  %v3064_v16 = vmul.f32 2.1237322e-06, %v6581_v28  ;;  %v3032_v5 = vmul.f32 %v3031_v44, %v6494_v49  ;;  %vm3492_vm6 = vmor %vm3490_vm4, %vm3491_vm5 }
 0x2aa   : > { %v6588_v18 = vadd.f32 1.0, %v3043_v39  ;;  %v3510_v15 = vmul.f32 %v3509_v14, %v6531_v27  ;;  %v3521_v63 = vmul.f32 %v3520_v2, %v6531_v27  ;;  %v3075_v36 = vmul.f32 3.8918573e-05, %v6581_v28 }
 0x2ab   : > { %v3888_v0 = vadd.f32 1.0, %v4304_v51  ;;  %v3489_v37 = vadd.f32 %v4422_v3, %v3488_v40  ;;  %v3065_v1 = vadd.f32 0.00028619796, %v3064_v16  ;;  %vm3495_vm7 = vcmp.eq.f32.partialorder %v3494_v41, 8.507059e+37 }
 0x2ac   : > { %v3497_v33 = vor.u32 1.1754944e-38, %v3496_v58  ;;  %4423 = vrcp.f32 %v6588_v18  ;;  %v6596_v49 = vmin.f32 %v3542_v20, 16.0  ;;  %v3511_v34 = vadd.f32 0.18741608, %v3510_v15 }
 0x2ad   : > { %v3936_v23 = vmul.f32 %v3888_v0, %v6526_v48  ;;  %v3493_v61 = vsel %vm3492_vm6, %v4422_v3, %v3489_v37  ;;  %v3522_v53 = vadd.f32 0.4994258, %v3521_v63  ;;  %v1884_v46 = vmul.f32 0.5, %v6403_v12  ;;  %v1725_v37 = vpop.f32.mrf.mxu3 }
 0x2ae   : > { %v3498_v29 = vsel %vm3495_vm7, %v3497_v33, %v3493_v61  ;;  %v3033_v42 = vadd.f32 1.1283791, %v3032_v5  ;;  %v3066_v54 = vmul.f32 %v3065_v1, %v6581_v28  ;;  %v3054_v6 = vand.u32 2147483647, %v6588_v18 }
 0x2af   : > { %3984 = vst [vmem:[%s5141_s26 + $0xd0] sm:$0xff] %v3936_v23  ;;  %v3499_v25 = vmul.f32 %v3498_v29, %v3474_v55  ;;  %v3523_v41 = vmul.f32 %v3522_v53, %v6531_v27  ;;  %v3076_v44 = vadd.f32 0.001143296, %v3075_v36  ;;  %v3512_v10 = vmul.f32 %v3511_v34, %v6531_v27 }
 0x2b0   : > { %v3067_v4 = vadd.f32 0.0036580483, %v3066_v54  ;;  %v3544_v48 = vmul.f32 2.1237322e-06, %v6596_v49  ;;  %v3555_v3 = vmul.f32 3.8918573e-05, %v6596_v49  ;;  %v3034_v20 = vmul.f32 %v3033_v42, %v6476_v50 }
 0x2b1   : > { %v4316_v12 = vclamps-f32 %v3499_v25, 1.0  ;;  %v6608_v30 = vmul.f32 0.5, %v6465_v24  ;;  %v6610_v9 = vadd.f32 1.0, %v3523_v41  ;;  %v3077_v55 = vmul.f32 %v3076_v44, %v6581_v28 }
 0x2b2   : > { %v4424_v57 = vpop.eup %4423  ;;  %v3056_v58 = vand.u32 2147483648, %v6588_v18  ;;  %v3068_v39 = vmul.f32 %v3067_v4, %v6581_v28  ;;  %v3545_v27 = vadd.f32 0.00028619796, %v3544_v48  ;;  %v3556_v14 = vadd.f32 0.001143296, %v3555_v3 }
 0x2b3   : > { %v3900_v2 = vadd.f32 1.0, %v4316_v12  ;;  %v3046_v51 = vmul.f32 %v4424_v57, %v6588_v18  ;;  %v1775_v24 = vadd.f32 %v1689_v56, %v6519_v13  ;;  %vm3050_vm8 = vweird.f32 %v6588_v18 }
 0x2b4   : > { %vm6619_vm9 = vcmp.eq.f32.partialorder %v3054_v6, 8.507059e+37  ;;  %v3513_v16 = vadd.f32 1.1283791, %v3512_v10  ;;  %4425 = vrcp.f32 %v6610_v9  ;;  %v3069_v63 = vadd.f32 0.05243302, %v3068_v39  ;;  %v1516_v39 = vpop.f32.mrf.mxu1 }
 0x2b5   : > { %v3948_v5 = vmul.f32 %v3900_v2, %v1884_v46  ;;  %v3047_v15 = vsub.f32 1.0, %v3046_v51  ;;  %v3078_v0 = vadd.f32 0.014752088, %v3077_v55  ;;  %vm3051_vm10 = vweird.f32 %v4424_v57 }
 0x2b6   : > { %v3057_v50 = vor.u32 1.1754944e-38, %v3056_v58  ;;  %v3546_v1 = vmul.f32 %v3545_v27, %v6596_v49  ;;  %v3557_v13 = vmul.f32 %v3556_v14, %v6596_v49  ;;  %v3070_v33 = vmul.f32 %v3069_v63, %v6581_v28  ;;  %vm3052_vm0 = vmor %vm3050_vm8, %vm3051_vm10 }
 0x2b7   : > { %3996 = vst [vmem:[%s5141_s26 + $0x130] sm:$0xff] %v3948_v5  ;;  %v3048_v36 = vmul.f32 %v4424_v57, %v3047_v15  ;;  %v3079_v23 = vmul.f32 %v3078_v0, %v6581_v28  ;;  %v6630_v61 = vadd.f32 %v6400_v22, %v1775_v24  ;;  %v3514_v34 = vmul.f32 %v3513_v16, %v6499_v8 }
 0x2b8   : > { %v3547_v53 = vadd.f32 0.0036580483, %v3546_v1  ;;  %v3558_v46 = vadd.f32 0.014752088, %v3557_v13  ;;  %v1787_v29 = vadd.f32 %v1725_v37, %v6082_v38  ;;  %vm3530_vm11 = vweird.f32 %v6610_v9  ;;  %v1343_v38 = vpop.f32.mrf.mxu0 }
 0x2b9   : > { %v3049_v42 = vadd.f32 %v4424_v57, %v3048_v36  ;;  %v3534_v54 = vand.u32 2147483647, %v6610_v9  ;;  %v3080_v25 = vadd.f32 0.112945676, %v3079_v23  ;;  %v3536_v41 = vand.u32 2147483648, %v6610_v9 }
 0x2ba   : > { %v4426_v6 = vpop.eup %4425  ;;  %v3548_v44 = vmul.f32 %v3547_v53, %v6596_v49  ;;  %v3559_v8 = vmul.f32 %v3558_v46, %v6596_v49  ;;  %v6643_v10 = vmul.f32 0.70710677, %v6630_v61  ;;  %v3071_v3 = vadd.f32 0.18741608, %v3070_v33 }
 0x2bb   : > { %v3053_v4 = vsel %vm3052_vm0, %v4424_v57, %v3049_v42  ;;  %v3526_v48 = vmul.f32 %v4426_v6, %v6610_v9  ;;  %v6647_v56 = vadd.f32 %v6400_v22, %v1787_v29  ;;  %v3081_v12 = vmul.f32 %v3080_v25, %v6581_v28 }
 0x2bc   : > { %v3058_v18 = vsel %vm6619_vm9, %v3057_v50, %v3053_v4  ;;  %v3549_v55 = vadd.f32 0.05243302, %v3548_v44  ;;  %v3560_v58 = vadd.f32 0.112945676, %v3559_v8  ;;  %vm6652_vm12 = vcmp.eq.f32.partialorder %v3534_v54, 8.507059e+37 }
 0x2bd   : > { %v3059_v27 = vmul.f32 %v3058_v18, %v3034_v20  ;;  %v3527_v14 = vsub.f32 1.0, %v3526_v48  ;;  %v3102_v57 = vmul.f32 %v6643_v10, %v6643_v10  ;;  %vm3531_vm2 = vweird.f32 %v4426_v6 }
 0x2be   : > { %v3082_v51 = vadd.f32 0.4994258, %v3081_v12  ;;  %v3550_v24 = vmul.f32 %v3549_v55, %v6596_v49  ;;  %v3561_v40 = vmul.f32 %v3560_v58, %v6596_v49  ;;  %v3072_v15 = vmul.f32 %v3071_v3, %v6581_v28  ;;  %vm3532_vm13 = vmor %vm3530_vm11, %vm3531_vm2  ;;  %v1692_v12 = vpop.f32.mrf.mxu2  ;;  %v1519_v55 = vpop.f32.mrf.mxu1 }
 0x2bf   : > { %v4305_v16 = vclamps-f32 %v3059_v27, 1.0  ;;  %v3528_v5 = vmul.f32 %v4426_v6, %v3527_v14  ;;  %v6661_v63 = vmin.f32 %v3102_v57, 16.0  ;;  %v6665_v50 = vmul.f32 0.70710677, %v6647_v56 }
 0x2c0   : > { %v3083_v20 = vmul.f32 %v3082_v51, %v6581_v28  ;;  %v3551_v0 = vadd.f32 0.18741608, %v3550_v24  ;;  %v3562_v37 = vadd.f32 0.4994258, %v3561_v40  ;;  %v3537_v23 = vor.u32 1.1754944e-38, %v3536_v41 }
 0x2c1   : > { %v3889_v1 = vadd.f32 1.0, %v4305_v16  ;;  %v3529_v13 = vadd.f32 %v4426_v6, %v3528_v5  ;;  %v3104_v36 = vmul.f32 2.1237322e-06, %v6661_v63  ;;  %v3115_v33 = vmul.f32 3.8918573e-05, %v6661_v63 }
 0x2c2   : > { %v6672_v53 = vadd.f32 1.0, %v3083_v20  ;;  %v3563_v28 = vmul.f32 %v3562_v37, %v6596_v49  ;;  %v3582_v46 = vmul.f32 %v6665_v50, %v6665_v50  ;;  %v6680_v44 = vadd.f32 %v6039_v45, %v5544_v31 }
 0x2c3   : > { %v3937_v29 = vmul.f32 %v3889_v1, %v6608_v30  ;;  %v3533_v42 = vsel %vm3532_vm13, %v4426_v6, %v3529_v13  ;;  %v3105_v54 = vadd.f32 0.00028619796, %v3104_v36  ;;  %v3116_v25 = vadd.f32 0.001143296, %v3115_v33  ;;  %v1346_v30 = vpop.f32.mrf.mxu0 }
 0x2c4   : > { %v3538_v9 = vsel %vm6652_vm12, %v3537_v23, %v3533_v42  ;;  %v3073_v41 = vadd.f32 1.1283791, %v3072_v15  ;;  %4427 = vrcp.f32 %v6672_v53  ;;  %v6687_v8 = vadd.f32 %v6078_v7, %v5589_v19 }
 0x2c5   : > { %3985 = vst [vmem:[%s5141_s26 + $0xd8] sm:$0xff] %v3937_v29  ;;  %v3539_v4 = vmul.f32 %v3538_v9, %v3514_v34  ;;  %v3552_v6 = vmul.f32 %v3551_v0, %v6596_v49  ;;  %v6691_v48 = vadd.f32 1.0, %v3563_v28  ;;  %v3096_v31 = vand.u32 2147483648, %v6672_v53 }
 0x2c6   : > { %v3106_v45 = vmul.f32 %v3105_v54, %v6661_v63  ;;  %v3117_v3 = vmul.f32 %v3116_v25, %v6661_v63  ;;  %v6696_v18 = vmin.f32 %v3582_v46, 16.0  ;;  %v1517_v58 = vadd.f32 %v1516_v39, %v1343_v38  ;;  %v1728_v46 = vpop.f32.mrf.mxu3 }
 0x2c7   : > { %v4317_v19 = vclamps-f32 %v3539_v4, 1.0  ;;  %v3094_v7 = vand.u32 2147483647, %v6672_v53  ;;  %4429 = vrcp.f32 %v6691_v48  ;;  %v1885_v49 = vmul.f32 0.5, %v6490_v26 }
 0x2c8   : > { %v6701_v34 = vadd.f32 %v1519_v55, %v1346_v30  ;;  %v3074_v27 = vmul.f32 %v3073_v41, %v6558_v47  ;;  %v3107_v14 = vadd.f32 0.0036580483, %v3106_v45  ;;  %v3118_v57 = vadd.f32 0.014752088, %v3117_v3 }
 0x2c9   : > { %v3901_v2 = vadd.f32 1.0, %v4317_v19  ;;  %v3584_v51 = vmul.f32 2.1237322e-06, %v6696_v18  ;;  %v1776_v24 = vadd.f32 %v1692_v12, %v1517_v58  ;;  %v3097_v38 = vor.u32 1.1754944e-38, %v3096_v31 }
 0x2ca   : > { %v4428_v40 = vpop.eup %4427  ;;  %v3553_v39 = vadd.f32 1.1283791, %v3552_v6  ;;  %v3108_v16 = vmul.f32 %v3107_v14, %v6661_v63  ;;  %v3595_v5 = vmul.f32 3.8918573e-05, %v6696_v18  ;;  %vm6708_vm3 = vcmp.eq.f32.partialorder %v3094_v7, 8.507059e+37 }
 0x2cb   : > { %v3949_v15 = vmul.f32 %v3901_v2, %v1885_v49  ;;  %v3086_v26 = vmul.f32 %v4428_v40, %v6672_v53  ;;  %v3576_v47 = vand.u32 2147483648, %v6691_v48  ;;  %v3119_v0 = vmul.f32 %v3118_v57, %v6661_v63 }
 0x2cc   : > { %vm3090_vm14 = vweird.f32 %v6672_v53  ;;  %v3109_v37 = vadd.f32 0.05243302, %v3108_v16  ;;  %v3585_v1 = vadd.f32 0.00028619796, %v3584_v51  ;;  %v3596_v13 = vadd.f32 0.001143296, %v3595_v5 }
 0x2cd   : > { %v4430_v36 = vpop.eup %4429  ;;  %3997 = vst [vmem:[%s5141_s26 + $0x138] sm:$0xff] %v3949_v15  ;;  %v3087_v33 = vsub.f32 1.0, %v3086_v26  ;;  %vm3570_vm15 = vweird.f32 %v6691_v48  ;;  %v3120_v23 = vadd.f32 0.112945676, %v3119_v0  ;;  %v6718_v28 = vadd.f32 %v6400_v22, %v1776_v24 }
 0x2ce   : > { %v3566_v29 = vmul.f32 %v4430_v36, %v6691_v48  ;;  %v3574_v42 = vand.u32 2147483647, %v6691_v48  ;;  %v3110_v54 = vmul.f32 %v3109_v37, %v6661_v63  ;;  %v3586_v25 = vmul.f32 %v3585_v1, %v6696_v18 }
 0x2cf   : > { %v3088_v9 = vmul.f32 %v4428_v40, %v3087_v33  ;;  %vm3091_vm1 = vweird.f32 %v4428_v40  ;;  %v3121_v41 = vmul.f32 %v3120_v23, %v6661_v63  ;;  %v3597_v4 = vmul.f32 %v3596_v13, %v6696_v18  ;;  %v1349_v13 = vpop.f32.mrf.mxu0 }
 0x2d0   : > { %v3567_v30 = vsub.f32 1.0, %v3566_v29  ;;  %v3577_v6 = vor.u32 1.1754944e-38, %v3576_v47  ;;  %v3587_v31 = vadd.f32 0.0036580483, %v3586_v25  ;;  %v1788_v45 = vadd.f32 %v1728_v46, %v6513_v60  ;;  %vm3092_vm4 = vmor %vm3090_vm14, %vm3091_vm1  ;;  %v1522_v46 = vpop.f32.mrf.mxu1  ;;  %v1695_v25 = vpop.f32.mrf.mxu2 }
 0x2d1   : > { %v3089_v3 = vadd.f32 %v4428_v40, %v3088_v9  ;;  %v3122_v12 = vadd.f32 0.4994258, %v3121_v41  ;;  %v3598_v55 = vadd.f32 0.014752088, %v3597_v4  ;;  %v6728_v58 = vmul.f32 0.70710677, %v6718_v28 }
 0x2d2   : > { %v3568_v19 = vmul.f32 %v4430_v36, %v3567_v30  ;;  %vm3571_vm5 = vweird.f32 %v4430_v36  ;;  %v3111_v7 = vadd.f32 0.18741608, %v3110_v54  ;;  %v3588_v49 = vmul.f32 %v3587_v31, %v6696_v18 }
 0x2d3   : > { %v3093_v14 = vsel %vm3092_vm4, %v4428_v40, %v3089_v3  ;;  %v3123_v2 = vmul.f32 %v3122_v12, %v6661_v63  ;;  %v3599_v57 = vmul.f32 %v3598_v55, %v6696_v18  ;;  %v3142_v60 = vmul.f32 %v6728_v58, %v6728_v58  ;;  %vm3572_vm6 = vmor %vm3570_vm15, %vm3571_vm5 }
 0x2d4   : > { %v3098_v51 = vsel %vm6708_vm3, %v3097_v38, %v3093_v14  ;;  %v3569_v24 = vadd.f32 %v4430_v36, %v3568_v19  ;;  %v3589_v16 = vadd.f32 0.05243302, %v3588_v49  ;;  %v6740_v53 = vadd.f32 %v6400_v22, %v1788_v45 }
 0x2d5   : > { %v3099_v5 = vmul.f32 %v3098_v51, %v3074_v27  ;;  %v6744_v40 = vadd.f32 1.0, %v3123_v2  ;;  %v3600_v15 = vadd.f32 0.112945676, %v3599_v57  ;;  %v6746_v26 = vmin.f32 %v3142_v60, 16.0 }
 0x2d6   : > { %v3554_v47 = vmul.f32 %v3553_v39, %v6572_v52  ;;  %v3573_v0 = vsel %vm3572_vm6, %v4430_v36, %v3569_v24  ;;  %vm3575_vm7 = vcmp.eq.f32.partialorder %v3574_v42, 8.507059e+37  ;;  %v3590_v38 = vmul.f32 %v3589_v16, %v6696_v18 }
 0x2d7   : > { %v1874_v20 = vmul.f32 0.5, %v6552_v17  ;;  %v4306_v37 = vclamps-f32 %v3099_v5, 1.0  ;;  %v3578_v1 = vsel %vm3575_vm7, %v3577_v6, %v3573_v0  ;;  %4431 = vrcp.f32 %v6744_v40  ;;  %v1731_v6 = vpop.f32.mrf.mxu3 }
 0x2d8   : > { %v3579_v48 = vmul.f32 %v3578_v1, %v3554_v47  ;;  %v3112_v27 = vmul.f32 %v3111_v7, %v6661_v63  ;;  %v3591_v33 = vadd.f32 0.18741608, %v3590_v38  ;;  %v6754_v23 = vmul.f32 0.70710677, %v6740_v53 }
 0x2d9   : > { %v3890_v52 = vadd.f32 1.0, %v4306_v37  ;;  %v3601_v39 = vmul.f32 %v3600_v15, %v6696_v18  ;;  %v3144_v36 = vmul.f32 2.1237322e-06, %v6746_v26  ;;  %v3155_v17 = vmul.f32 3.8918573e-05, %v6746_v26 }
 0x2da   : > { %v1886_v29 = vmul.f32 0.5, %v6561_v11  ;;  %v4318_v42 = vclamps-f32 %v3579_v48, 1.0  ;;  %v6760_v54 = vadd.f32 %v1522_v46, %v1349_v13  ;;  %v6763_v63 = vmul.f32 0.5, %v6630_v61 }
 0x2db   : > { %v3938_v9 = vmul.f32 %v3890_v52, %v1874_v20  ;;  %v3602_v41 = vadd.f32 0.4994258, %v3601_v39  ;;  %v3145_v4 = vadd.f32 0.00028619796, %v3144_v36  ;;  %v3156_v30 = vadd.f32 0.001143296, %v3155_v17 }
 0x2dc   : > { %v3902_v31 = vadd.f32 1.0, %v4318_v42  ;;  %v3113_v45 = vadd.f32 1.1283791, %v3112_v27  ;;  %v3592_v3 = vmul.f32 %v3591_v33, %v6696_v18  ;;  %v3622_v11 = vmul.f32 %v6754_v23, %v6754_v23 }
 0x2dd   : > { %v4432_v12 = vpop.eup %4431  ;;  %3986 = vst [vmem:[%s5141_s26 + $0xe0] sm:$0xff] %v3938_v9  ;;  %v3603_v55 = vmul.f32 %v3602_v41, %v6696_v18  ;;  %v3146_v61 = vmul.f32 %v3145_v4, %v6746_v26  ;;  %v3157_v19 = vmul.f32 %v3156_v30, %v6746_v26  ;;  %v1777_v7 = vadd.f32 %v1695_v25, %v6701_v34 }
 0x2de   : > { %v3950_v49 = vmul.f32 %v3902_v31, %v1886_v29  ;;  %v3126_v14 = vmul.f32 %v4432_v12, %v6744_v40  ;;  %v3134_v2 = vand.u32 2147483647, %v6744_v40  ;;  %v1789_v57 = vadd.f32 %v1731_v6, %v6680_v44 }
 0x2df   : > { %v6776_v60 = vadd.f32 1.0, %v3603_v55  ;;  %v3147_v51 = vadd.f32 0.0036580483, %v3146_v61  ;;  %v3158_v24 = vadd.f32 0.014752088, %v3157_v19  ;;  %v6778_v16 = vmin.f32 %v3622_v11, 16.0 }
 0x2e0   : > { %3998 = vst [vmem:[%s5141_s26 + $0x140] sm:$0xff] %v3950_v49  ;;  %v3114_v18 = vmul.f32 %v3113_v45, %v6643_v10  ;;  %v3127_v5 = vsub.f32 1.0, %v3126_v14  ;;  %v3136_v15 = vand.u32 2147483648, %v6744_v40  ;;  %v6784_v34 = vmul.f32 0.5, %v6647_v56 }
 0x2e1   : > { %vm3131_vm8 = vweird.f32 %v4432_v12  ;;  %v3593_v47 = vadd.f32 1.1283791, %v3592_v3  ;;  %4433 = vrcp.f32 %v6776_v60  ;;  %v6788_v44 = vadd.f32 %v6400_v22, %v1777_v7 }
 0x2e2   : > { %v3128_v0 = vmul.f32 %v4432_v12, %v3127_v5  ;;  %v3148_v38 = vmul.f32 %v3147_v51, %v6746_v26  ;;  %v3159_v20 = vmul.f32 %v3158_v24, %v6746_v26  ;;  %v3624_v10 = vmul.f32 2.1237322e-06, %v6778_v16 }
 0x2e3   : > { %vm3130_vm9 = vweird.f32 %v6744_v40  ;;  %vm6794_vm10 = vcmp.eq.f32.partialorder %v3134_v2, 8.507059e+37  ;;  %v3635_v56 = vmul.f32 3.8918573e-05, %v6778_v16  ;;  %v6800_v1 = vadd.f32 %v6400_v22, %v1789_v57 }
 0x2e4   : > { %v3129_v13 = vadd.f32 %v4432_v12, %v3128_v0  ;;  %v3149_v48 = vadd.f32 0.05243302, %v3148_v38  ;;  %v3160_v27 = vadd.f32 0.112945676, %v3159_v20  ;;  %v3625_v33 = vadd.f32 0.00028619796, %v3624_v10  ;;  %vm3132_vm11 = vmor %vm3130_vm9, %vm3131_vm8 }
 0x2e5   : > { %v3137_v46 = vor.u32 1.1754944e-38, %v3136_v15  ;;  %v3594_v52 = vmul.f32 %v3593_v47, %v6665_v50  ;;  %v3636_v39 = vadd.f32 0.001143296, %v3635_v56  ;;  %v6805_v40 = vmul.f32 0.70710677, %v6788_v44 }
 0x2e6   : > { %v3133_v36 = vsel %vm3132_vm11, %v4432_v12, %v3129_v13  ;;  %v3150_v17 = vmul.f32 %v3149_v48, %v6746_v26  ;;  %v3161_v29 = vmul.f32 %v3160_v27, %v6746_v26  ;;  %v3626_v22 = vmul.f32 %v3625_v33, %v6778_v16  ;;  %v1352_v48 = vpop.f32.mrf.mxu0 }
 0x2e7   : > { %v4434_v42 = vpop.eup %4433  ;;  %v3138_v25 = vsel %vm6794_vm10, %v3137_v46, %v3133_v36  ;;  %v3637_v9 = vmul.f32 %v3636_v39, %v6778_v16  ;;  %v3182_v50 = vmul.f32 %v6805_v40, %v6805_v40  ;;  %v6816_v41 = vmul.f32 0.70710677, %v6800_v1 }
 0x2e8   : > { %v3139_v4 = vmul.f32 %v3138_v25, %v3114_v18  ;;  %v3606_v30 = vmul.f32 %v4434_v42, %v6776_v60  ;;  %v3614_v6 = vand.u32 2147483647, %v6776_v60  ;;  %v3151_v31 = vadd.f32 0.18741608, %v3150_v17  ;;  %v1698_v18 = vpop.f32.mrf.mxu2  ;;  %v1525_v17 = vpop.f32.mrf.mxu1 }
 0x2e9   : > { %vm3610_vm0 = vweird.f32 %v6776_v60  ;;  %v3162_v45 = vadd.f32 0.4994258, %v3161_v29  ;;  %v3627_v3 = vadd.f32 0.0036580483, %v3626_v22  ;;  %v3638_v11 = vadd.f32 0.014752088, %v3637_v9 }
 0x2ea   : > { %v4307_v12 = vclamps-f32 %v3139_v4, 1.0  ;;  %v3607_v55 = vsub.f32 1.0, %v3606_v30  ;;  %v3616_v61 = vand.u32 2147483648, %v6776_v60  ;;  %v6822_v19 = vmin.f32 %v3182_v50, 16.0 }
 0x2eb   : > { %v3163_v7 = vmul.f32 %v3162_v45, %v6746_v26  ;;  %v3628_v49 = vmul.f32 %v3627_v3, %v6778_v16  ;;  %v3639_v14 = vmul.f32 %v3638_v11, %v6778_v16  ;;  %v3662_v2 = vmul.f32 %v6816_v41, %v6816_v41 }
 0x2ec   : > { %v3891_v57 = vadd.f32 1.0, %v4307_v12  ;;  %v3608_v51 = vmul.f32 %v4434_v42, %v3607_v55  ;;  %vm3611_vm12 = vweird.f32 %v4434_v42  ;;  %v3184_v24 = vmul.f32 2.1237322e-06, %v6822_v19 }
 0x2ed   : > { %v3152_v5 = vmul.f32 %v3151_v31, %v6746_v26  ;;  %v6831_v15 = vadd.f32 1.0, %v3163_v7  ;;  %v3629_v47 = vadd.f32 0.05243302, %v3628_v49  ;;  %v3640_v0 = vadd.f32 0.112945676, %v3639_v14  ;;  %vm3612_vm13 = vmor %vm3610_vm0, %vm3611_vm12 }
 0x2ee   : > { %v3939_v38 = vmul.f32 %v3891_v57, %v6763_v63  ;;  %v3609_v20 = vadd.f32 %v4434_v42, %v3608_v51  ;;  %vm3615_vm2 = vcmp.eq.f32.partialorder %v3614_v6, 8.507059e+37  ;;  %v3185_v10 = vadd.f32 0.00028619796, %v3184_v24  ;;  %v6857_v31 = vld [vmem:[%s7187_s3] ss:$0 sm:$0xff] }
 0x2ef   : > { %v3617_v37 = vor.u32 1.1754944e-38, %v3616_v61  ;;  %4435 = vrcp.f32 %v6831_v15  ;;  %v6837_v56 = vmin.f32 %v3662_v2, 16.0  ;;  %v1778_v13 = vadd.f32 %v1698_v18, %v6760_v54 }
 0x2f0   : > { %3987 = vst [vmem:[%s5141_s26 + $0xe8] sm:$0xff] %v3939_v38  ;;  %v3613_v26 = vsel %vm3612_vm13, %v4434_v42, %v3609_v20  ;;  %v3630_v27 = vmul.f32 %v3629_v47, %v6778_v16  ;;  %v3641_v63 = vmul.f32 %v3640_v0, %v6778_v16  ;;  %v3186_v33 = vmul.f32 %v3185_v10, %v6822_v19  ;;  %v1734_v47 = vpop.f32.mrf.mxu3 }
 0x2f1   : > { %v3618_v46 = vsel %vm3615_vm2, %v3617_v37, %v3613_v26  ;;  %v6845_v60 = vmul.f32 0.5, %v6718_v28  ;;  %v3153_v39 = vadd.f32 1.1283791, %v3152_v5  ;;  %v3195_v36 = vmul.f32 3.8918573e-05, %v6822_v19 }
 0x2f2   : > { %v3619_v29 = vmul.f32 %v3618_v46, %v3594_v52  ;;  %v3631_v22 = vadd.f32 0.18741608, %v3630_v27  ;;  %v3642_v54 = vadd.f32 0.4994258, %v3641_v63  ;;  %v3187_v25 = vadd.f32 0.0036580483, %v3186_v33 }
 0x2f3   : > { %v6848_v42 = vadd.f32 %v1525_v17, %v1352_v48  ;;  %v3196_v9 = vadd.f32 0.001143296, %v3195_v36  ;;  %v3664_v50 = vmul.f32 2.1237322e-06, %v6837_v56  ;;  %v3675_v4 = vmul.f32 3.8918573e-05, %v6837_v56 }
 0x2f4   : > { %v4319_v30 = vclamps-f32 %v3619_v29, 1.0  ;;  %v3643_v6 = vmul.f32 %v3642_v54, %v6778_v16  ;;  %v3188_v28 = vmul.f32 %v3187_v25, %v6822_v19  ;;  %v6860_v52 = vadd.f32 %v6857_v31, %v1778_v13 }
 0x2f5   : > { %v4436_v45 = vpop.eup %4435  ;;  %v3632_v3 = vmul.f32 %v3631_v22, %v6778_v16  ;;  %v3197_v11 = vmul.f32 %v3196_v9, %v6822_v19  ;;  %v3665_v12 = vadd.f32 0.00028619796, %v3664_v50  ;;  %v3676_v55 = vadd.f32 0.001143296, %v3675_v4 }
 0x2f6   : > { %v3903_v61 = vadd.f32 1.0, %v4319_v30  ;;  %v3154_v7 = vmul.f32 %v3153_v39, %v6728_v58  ;;  %v3166_v49 = vmul.f32 %v4436_v45, %v6831_v15  ;;  %v3174_v14 = vand.u32 2147483647, %v6831_v15 }
 0x2f7   : > { %v6867_v2 = vadd.f32 1.0, %v3643_v6  ;;  %v3189_v57 = vadd.f32 0.05243302, %v3188_v28  ;;  %v3198_v51 = vadd.f32 0.014752088, %v3197_v11  ;;  %v3666_v24 = vmul.f32 %v3665_v12, %v6837_v56 }
 0x2f8   : > { %v3951_v16 = vmul.f32 %v3903_v61, %v6784_v34  ;;  %v3167_v18 = vsub.f32 1.0, %v3166_v49  ;;  %vm3170_vm3 = vweird.f32 %v6831_v15  ;;  %v3677_v5 = vmul.f32 %v3676_v55, %v6837_v56 }
 0x2f9   : > { %vm3171_vm14 = vweird.f32 %v4436_v45  ;;  %v3176_v58 = vand.u32 2147483648, %v6831_v15  ;;  %v3633_v0 = vadd.f32 1.1283791, %v3632_v3  ;;  %4437 = vrcp.f32 %v6867_v2 }
 0x2fa   : > { %3999 = vst [vmem:[%s5141_s26 + $0x148] sm:$0xff] %v3951_v16  ;;  %v3168_v38 = vmul.f32 %v4436_v45, %v3167_v18  ;;  %v3190_v20 = vmul.f32 %v3189_v57, %v6822_v19  ;;  %v3199_v10 = vmul.f32 %v3198_v51, %v6822_v19  ;;  %v3667_v37 = vadd.f32 0.0036580483, %v3666_v24  ;;  %vm3172_vm1 = vmor %vm3170_vm3, %vm3171_vm14 }
 0x2fb   : > { %vm6878_vm15 = vcmp.eq.f32.partialorder %v3174_v14, 8.507059e+37  ;;  %v3678_v13 = vadd.f32 0.014752088, %v3677_v5  ;;  %v6883_v26 = vmul.f32 0.70710677, %v6860_v52  ;;  %v1790_v48 = vadd.f32 %v1734_v47, %v6687_v8 }
 0x2fc   : > { %v3169_v27 = vadd.f32 %v4436_v45, %v3168_v38  ;;  %v3191_v63 = vadd.f32 0.18741608, %v3190_v20  ;;  %v3200_v33 = vadd.f32 0.112945676, %v3199_v10  ;;  %v3668_v46 = vmul.f32 %v3667_v37, %v6837_v56 }
 0x2fd   : > { %v3177_v39 = vor.u32 1.1754944e-38, %v3176_v58  ;;  %v3634_v36 = vmul.f32 %v3633_v0, %v6754_v23  ;;  %v3679_v17 = vmul.f32 %v3678_v13, %v6837_v56  ;;  %v3222_v29 = vmul.f32 %v6883_v26, %v6883_v26  ;;  %v1701_v58 = vpop.f32.mrf.mxu2 }
 0x2fe   : > { %v3173_v22 = vsel %vm3172_vm1, %v4436_v45, %v3169_v27  ;;  %vm3650_vm4 = vweird.f32 %v6867_v2  ;;  %v3654_v8 = vand.u32 2147483647, %v6867_v2  ;;  %v3201_v54 = vmul.f32 %v3200_v33, %v6822_v19 }
 0x2ff   : > { %v3669_v25 = vadd.f32 0.05243302, %v3668_v46  ;;  %v4438_v9 = vpop.eup %4437  ;;  %v3178_v15 = vsel %vm6878_vm15, %v3177_v39, %v3173_v22  ;;  %v3656_v50 = vand.u32 2147483648, %v6867_v2  ;;  %v3680_v23 = vadd.f32 0.112945676, %v3679_v17 }
 0x300   : > { %v6900_v4 = vmin.f32 %v3222_v29, 16.0  ;;  %v3179_v30 = vmul.f32 %v3178_v15, %v3154_v7  ;;  %v3646_v6 = vmul.f32 %v4438_v9, %v6867_v2  ;;  %v3192_v28 = vmul.f32 %v3191_v63, %v6822_v19 }
 0x301   : > { %v6905_v45 = vadd.f32 %v6857_v31, %v1790_v48  ;;  %v3202_v3 = vadd.f32 0.4994258, %v3201_v54  ;;  %v3670_v11 = vmul.f32 %v3669_v25, %v6837_v56  ;;  %v3681_v12 = vmul.f32 %v3680_v23, %v6837_v56 }
 0x302   : > { %v3224_v55 = vmul.f32 2.1237322e-06, %v6900_v4  ;;  %v4308_v61 = vclamps-f32 %v3179_v30, 1.0  ;;  %v3647_v49 = vsub.f32 1.0, %v3646_v6  ;;  %vm3651_vm5 = vweird.f32 %v4438_v9 }
 0x303   : > { %v3235_v14 = vmul.f32 3.8918573e-05, %v6900_v4  ;;  %v3203_v7 = vmul.f32 %v3202_v3, %v6822_v19  ;;  %v3671_v57 = vadd.f32 0.18741608, %v3670_v11  ;;  %v3682_v51 = vadd.f32 0.4994258, %v3681_v12  ;;  %vm3652_vm7 = vmor %vm3650_vm4, %vm3651_vm5 }
 0x304   : > { %v3225_v24 = vadd.f32 0.00028619796, %v3224_v55  ;;  %v3892_v16 = vadd.f32 1.0, %v4308_v61  ;;  %v3648_v18 = vmul.f32 %v4438_v9, %v3647_v49  ;;  %v6913_v47 = vmul.f32 0.70710677, %v6905_v45 }
 0x305   : > { %v3236_v5 = vadd.f32 0.001143296, %v3235_v14  ;;  %vm6915_vm6 = vcmp.eq.f32.partialorder %v3654_v8, 8.507059e+37  ;;  %v6919_v38 = vadd.f32 1.0, %v3203_v7  ;;  %v3683_v20 = vmul.f32 %v3682_v51, %v6837_v56 }
 0x306   : > { %v3226_v19 = vmul.f32 %v3225_v24, %v6900_v4  ;;  %v3940_v10 = vmul.f32 %v3892_v16, %v6845_v60  ;;  %v3649_v37 = vadd.f32 %v4438_v9, %v3648_v18  ;;  %v3672_v34 = vmul.f32 %v3671_v57, %v6837_v56  ;;  %v1737_v16 = vpop.f32.mrf.mxu3 }
 0x307   : > { %v3237_v13 = vmul.f32 %v3236_v5, %v6900_v4  ;;  %v3657_v48 = vor.u32 1.1754944e-38, %v3656_v50  ;;  %v3193_v27 = vadd.f32 1.1283791, %v3192_v28  ;;  %4439 = vrcp.f32 %v6919_v38 }
 0x308   : > { %v1779_v63 = vadd.f32 %v1701_v58, %v6848_v42  ;;  %3988 = vst [vmem:[%s5141_s26 + $0xf0] sm:$0xff] %v3940_v10  ;;  %v3653_v33 = vsel %vm3652_vm7, %v4438_v9, %v3649_v37  ;;  %v6932_v46 = vadd.f32 1.0, %v3683_v20  ;;  %v3227_v60 = vadd.f32 0.0036580483, %v3226_v19 }
 0x309   : > { %v3702_v56 = vmul.f32 %v6913_v47, %v6913_v47  ;;  %v3658_v39 = vsel %vm6915_vm6, %v3657_v48, %v3653_v33  ;;  %v3216_v2 = vand.u32 2147483648, %v6919_v38  ;;  %v3238_v17 = vadd.f32 0.014752088, %v3237_v13 }
 0x30a   : > { %v3659_v29 = vmul.f32 %v3658_v39, %v3634_v36  ;;  %v3214_v22 = vand.u32 2147483647, %v6919_v38  ;;  %v3673_v8 = vadd.f32 1.1283791, %v3672_v34  ;;  %4441 = vrcp.f32 %v6932_v46 }
 0x30b   : > { %v1562_v42 = vadd.f32 %v6105_v35, %v5624_v59  ;;  %v1888_v54 = vmul.f32 0.5, %v6740_v53  ;;  %v3228_v25 = vmul.f32 %v3227_v60, %v6900_v4  ;;  %v3239_v9 = vmul.f32 %v3238_v17, %v6900_v4 }
 0x30c   : > { %v4320_v15 = vclamps-f32 %v3659_v29, 1.0  ;;  %v3194_v50 = vmul.f32 %v3193_v27, %v6805_v40  ;;  %v6947_v23 = vmin.f32 %v3702_v56, 16.0  ;;  %v6950_v36 = vadd.f32 %v6857_v31, %v1779_v63 }
 0x30d   : > { %v4440_v30 = vpop.eup %4439  ;;  %vm3210_vm8 = vweird.f32 %v6919_v38  ;;  %v3217_v6 = vor.u32 1.1754944e-38, %v3216_v2  ;;  %v3229_v28 = vadd.f32 0.05243302, %v3228_v25  ;;  %v3240_v59 = vadd.f32 0.112945676, %v3239_v9  ;;  %v1528_v9 = vpop.f32.mrf.mxu1 }
 0x30e   : > { %v3904_v35 = vadd.f32 1.0, %v4320_v15  ;;  %v3206_v53 = vmul.f32 %v4440_v30, %v6919_v38  ;;  %vm6954_vm9 = vcmp.eq.f32.partialorder %v3214_v22, 8.507059e+37  ;;  %v3674_v40 = vmul.f32 %v3673_v8, %v6816_v41  ;;  %v1355_v22 = vpop.f32.mrf.mxu0 }
 0x30f   : > { %v3704_v11 = vmul.f32 2.1237322e-06, %v6947_v23  ;;  %v3694_v12 = vand.u32 2147483647, %v6932_v46  ;;  %v3230_v55 = vmul.f32 %v3229_v28, %v6900_v4  ;;  %v3241_v61 = vmul.f32 %v3240_v59, %v6900_v4 }
 0x310   : > { %v3715_v49 = vmul.f32 3.8918573e-05, %v6947_v23  ;;  %v4442_v14 = vpop.eup %4441  ;;  %v3952_v7 = vmul.f32 %v3904_v35, %v1888_v54  ;;  %v3207_v57 = vsub.f32 1.0, %v3206_v53  ;;  %v6965_v24 = vmul.f32 0.70710677, %v6950_v36 }
 0x311   : > { %v3705_v51 = vadd.f32 0.00028619796, %v3704_v11  ;;  %vm3211_vm10 = vweird.f32 %v4440_v30  ;;  %v3686_v41 = vmul.f32 %v4442_v14, %v6932_v46  ;;  %v3696_v18 = vand.u32 2147483648, %v6932_v46  ;;  %v1704_v11 = vpop.f32.mrf.mxu2 }
 0x312   : > { %v3242_v5 = vadd.f32 0.4994258, %v3241_v61  ;;  %4000 = vst [vmem:[%s5141_s26 + $0x150] sm:$0xff] %v3952_v7  ;;  %v3208_v58 = vmul.f32 %v4440_v30, %v3207_v57  ;;  %v3716_v20 = vadd.f32 0.001143296, %v3715_v49  ;;  %v3262_v19 = vmul.f32 %v6965_v24, %v6965_v24  ;;  %vm3212_vm11 = vmor %vm3210_vm8, %vm3211_vm10 }
 0x313   : > { %v3706_v0 = vmul.f32 %v3705_v51, %v6947_v23  ;;  %v3687_v10 = vsub.f32 1.0, %v3686_v41  ;;  %v3231_v37 = vadd.f32 0.18741608, %v3230_v55  ;;  %v1791_v13 = vadd.f32 %v1737_v16, %v1562_v42 }
 0x314   : > { %v3243_v34 = vmul.f32 %v3242_v5, %v6900_v4  ;;  %v3209_v48 = vadd.f32 %v4440_v30, %v3208_v58  ;;  %v3717_v63 = vmul.f32 %v3716_v20, %v6947_v23  ;;  %v6975_v33 = vmin.f32 %v3262_v19, 16.0 }
 0x315   : > { %v3707_v27 = vadd.f32 0.0036580483, %v3706_v0  ;;  %v3688_v60 = vmul.f32 %v4442_v14, %v3687_v10  ;;  %vm3690_vm0 = vweird.f32 %v6932_v46  ;;  %vm3691_vm12 = vweird.f32 %v4442_v14 }
 0x316   : > { %v6981_v56 = vadd.f32 1.0, %v3243_v34  ;;  %v3213_v39 = vsel %vm3212_vm11, %v4440_v30, %v3209_v48  ;;  %v3718_v17 = vadd.f32 0.014752088, %v3717_v63  ;;  %v3264_v29 = vmul.f32 2.1237322e-06, %v6975_v33  ;;  %vm3692_vm13 = vmor %vm3690_vm0, %vm3691_vm12 }
 0x317   : > { %v3708_v2 = vmul.f32 %v3707_v27, %v6947_v23  ;;  %v3218_v8 = vsel %vm6954_vm9, %v3217_v6, %v3213_v39  ;;  %v3689_v42 = vadd.f32 %v4442_v14, %v3688_v60  ;;  %vm3695_vm2 = vcmp.eq.f32.partialorder %v3694_v12, 8.507059e+37 }
 0x318   : > { %4443 = vrcp.f32 %v6981_v56  ;;  %v3219_v38 = vmul.f32 %v3218_v8, %v3194_v50  ;;  %v3697_v46 = vor.u32 1.1754944e-38, %v3696_v18  ;;  %v3232_v54 = vmul.f32 %v3231_v37, %v6900_v4 }
 0x319   : > { %v6990_v25 = vadd.f32 %v6857_v31, %v1791_v13  ;;  %v3693_v15 = vsel %vm3692_vm13, %v4442_v14, %v3689_v42  ;;  %v3709_v30 = vadd.f32 0.05243302, %v3708_v2  ;;  %v3719_v28 = vmul.f32 %v3718_v17, %v6947_v23 }
 0x31a   : > { %v3265_v59 = vadd.f32 0.00028619796, %v3264_v29  ;;  %v1529_v35 = vadd.f32 %v1528_v9, %v1355_v22  ;;  %v1877_v6 = vmul.f32 0.5, %v6788_v44  ;;  %v4309_v53 = vclamps-f32 %v3219_v38, 1.0 }
 0x31b   : > { %v3698_v3 = vsel %vm3695_vm2, %v3697_v46, %v3693_v15  ;;  %v1889_v50 = vmul.f32 0.5, %v6800_v1  ;;  %v3720_v55 = vadd.f32 0.112945676, %v3719_v28  ;;  %v3710_v49 = vmul.f32 %v3709_v30, %v6947_v23  ;;  %v1358_v15 = vpop.f32.mrf.mxu0 }
 0x31c   : > { %v3699_v12 = vmul.f32 %v3698_v3, %v3674_v40  ;;  %v3266_v4 = vmul.f32 %v3265_v59, %v6975_v33  ;;  %v3893_v61 = vadd.f32 1.0, %v4309_v53  ;;  %v3275_v14 = vmul.f32 3.8918573e-05, %v6975_v33 }
 0x31d   : > { %v6999_v7 = vmul.f32 0.70710677, %v6990_v25  ;;  %v3233_v51 = vadd.f32 1.1283791, %v3232_v54  ;;  %v3721_v16 = vmul.f32 %v3720_v55, %v6947_v23  ;;  %v1780_v41 = vadd.f32 %v1704_v11, %v1529_v35  ;;  %v1531_v11 = vpop.f32.mrf.mxu1  ;;  %v1740_v55 = vpop.f32.mrf.mxu3 }
 0x31e   : > { %v4444_v57 = vpop.eup %4443  ;;  %v4321_v44 = vclamps-f32 %v3699_v12, 1.0  ;;  %v3941_v1 = vmul.f32 %v3893_v61, %v1877_v6  ;;  %v3267_v18 = vadd.f32 0.0036580483, %v3266_v4  ;;  %v3276_v5 = vadd.f32 0.001143296, %v3275_v14 }
 0x31f   : > { %v3246_v40 = vmul.f32 %v4444_v57, %v6981_v56  ;;  %v3254_v0 = vand.u32 2147483647, %v6981_v56  ;;  %v3256_v20 = vand.u32 2147483648, %v6981_v56  ;;  %v3722_v19 = vadd.f32 0.4994258, %v3721_v16 }
 0x320   : > { %v3905_v58 = vadd.f32 1.0, %v4321_v44  ;;  %3989 = vst [vmem:[%s5141_s26 + $0xf8] sm:$0xff] %v3941_v1  ;;  %v3711_v37 = vadd.f32 0.18741608, %v3710_v49  ;;  %v3277_v34 = vmul.f32 %v3276_v5, %v6975_v33  ;;  %v3742_v13 = vmul.f32 %v6999_v7, %v6999_v7 }
 0x321   : > { %v3247_v10 = vsub.f32 1.0, %v3246_v40  ;;  %vm3251_vm3 = vweird.f32 %v4444_v57  ;;  %v3723_v27 = vmul.f32 %v3722_v19, %v6947_v23  ;;  %v7011_v63 = vadd.f32 %v6857_v31, %v1780_v41 }
 0x322   : > { %v3953_v48 = vmul.f32 %v3905_v58, %v1889_v50  ;;  %v3268_v39 = vmul.f32 %v3267_v18, %v6975_v33  ;;  %v3278_v2 = vadd.f32 0.014752088, %v3277_v34  ;;  %v7014_v17 = vmin.f32 %v3742_v13, 16.0 }
 0x323   : > { %v3248_v60 = vmul.f32 %v4444_v57, %v3247_v10  ;;  %v3234_v29 = vmul.f32 %v3233_v51, %v6883_v26  ;;  %vm3250_vm14 = vweird.f32 %v6981_v56  ;;  %vm7019_vm15 = vcmp.eq.f32.partialorder %v3254_v0, 8.507059e+37  ;;  %v1707_v0 = vpop.f32.mrf.mxu2 }
 0x324   : > { %4001 = vst [vmem:[%s5141_s26 + $0x158] sm:$0xff] %v3953_v48  ;;  %v7023_v8 = vadd.f32 1.0, %v3723_v27  ;;  %v3279_v38 = vmul.f32 %v3278_v2, %v6975_v33  ;;  %v3744_v46 = vmul.f32 2.1237322e-06, %v7014_v17  ;;  %v3755_v54 = vmul.f32 3.8918573e-05, %v7014_v17  ;;  %vm3252_vm1 = vmor %vm3250_vm14, %vm3251_vm3 }
 0x325   : > { %v3249_v42 = vadd.f32 %v4444_v57, %v3248_v60  ;;  %v3257_v9 = vor.u32 1.1754944e-38, %v3256_v20  ;;  %v3712_v26 = vmul.f32 %v3711_v37, %v6947_v23  ;;  %v7032_v56 = vmul.f32 0.70710677, %v7011_v63 }
 0x326   : > { %4445 = vrcp.f32 %v7023_v8  ;;  %v3269_v28 = vadd.f32 0.05243302, %v3268_v39  ;;  %v3280_v59 = vadd.f32 0.112945676, %v3279_v38  ;;  %v3745_v35 = vadd.f32 0.00028619796, %v3744_v46 }
 0x327   : > { %v3253_v30 = vsel %vm3252_vm1, %v4444_v57, %v3249_v42  ;;  %v3756_v53 = vadd.f32 0.001143296, %v3755_v54  ;;  %v1565_v3 = vadd.f32 %v6152_v32, %v5666_v62  ;;  %v1532_v4 = vadd.f32 %v1531_v11, %v1358_v15 }
 0x328   : > { %v3258_v6 = vsel %vm7019_vm15, %v3257_v9, %v3253_v30  ;;  %v3281_v23 = vmul.f32 %v3280_v59, %v6975_v33  ;;  %v3746_v12 = vmul.f32 %v3745_v35, %v7014_v17  ;;  %v1878_v61 = vmul.f32 0.5, %v6860_v52 }
 0x329   : > { %v3259_v50 = vmul.f32 %v3258_v6, %v3234_v29  ;;  %v3757_v49 = vmul.f32 %v3756_v53, %v7014_v17  ;;  %v3302_v14 = vmul.f32 %v7032_v56, %v7032_v56  ;;  %v3713_v44 = vadd.f32 1.1283791, %v3712_v26 }
 0x32a   : > { %v3270_v51 = vmul.f32 %v3269_v28, %v6975_v33  ;;  %v3282_v62 = vadd.f32 0.4994258, %v3281_v23  ;;  %v3747_v16 = vadd.f32 0.0036580483, %v3746_v12  ;;  %v1792_v40 = vadd.f32 %v1740_v55, %v1565_v3 }
 0x32b   : > { %v4310_v57 = vclamps-f32 %v3259_v50, 1.0  ;;  %v3758_v41 = vadd.f32 0.014752088, %v3757_v49  ;;  %v7045_v1 = vmin.f32 %v3302_v14, 16.0  ;;  %v3734_v52 = vand.u32 2147483647, %v7023_v8 }
 0x32c   : > { %v4446_v32 = vpop.eup %4445  ;;  %v3736_v58 = vand.u32 2147483648, %v7023_v8  ;;  %v3283_v20 = vmul.f32 %v3282_v62, %v6975_v33  ;;  %v3748_v19 = vmul.f32 %v3747_v16, %v7014_v17  ;;  %v3271_v48 = vadd.f32 0.18741608, %v3270_v51 }
 0x32d   : > { %v3894_v18 = vadd.f32 1.0, %v4310_v57  ;;  %v3726_v5 = vmul.f32 %v4446_v32, %v7023_v8  ;;  %v3759_v10 = vmul.f32 %v3758_v41, %v7014_v17  ;;  %v3304_v37 = vmul.f32 2.1237322e-06, %v7045_v1 }
 0x32e   : > { %v3315_v27 = vmul.f32 3.8918573e-05, %v7045_v1  ;;  %v7055_v60 = vadd.f32 1.0, %v3283_v20  ;;  %v7058_v2 = vadd.f32 %v6857_v31, %v1792_v40  ;;  %v1781_v29 = vadd.f32 %v1707_v0, %v1532_v4 }
 0x32f   : > { %v3942_v34 = vmul.f32 %v3894_v18, %v1878_v61  ;;  %v3727_v13 = vsub.f32 1.0, %v3726_v5  ;;  %v3760_v39 = vadd.f32 0.112945676, %v3759_v10  ;;  %vm3731_vm4 = vweird.f32 %v4446_v32  ;;  %v1743_v61 = vpop.f32.mrf.mxu3 }
 0x330   : > { %v3305_v42 = vadd.f32 0.00028619796, %v3304_v37  ;;  %v3316_v38 = vadd.f32 0.001143296, %v3315_v27  ;;  %v3714_v46 = vmul.f32 %v3713_v44, %v6913_v47  ;;  %vm3730_vm5 = vweird.f32 %v7023_v8 }
 0x331   : > { %3990 = vst [vmem:[%s5141_s26 + $0x100] sm:$0xff] %v3942_v34  ;;  %v3728_v22 = vmul.f32 %v4446_v32, %v3727_v13  ;;  %4447 = vrcp.f32 %v7055_v60  ;;  %v3749_v54 = vadd.f32 0.05243302, %v3748_v19  ;;  %vm3735_vm6 = vcmp.eq.f32.partialorder %v3734_v52, 8.507059e+37  ;;  %vm3732_vm7 = vmor %vm3730_vm5, %vm3731_vm4 }
 0x332   : > { %v3761_v26 = vmul.f32 %v3760_v39, %v7014_v17  ;;  %v3306_v15 = vmul.f32 %v3305_v42, %v7045_v1  ;;  %v3737_v30 = vor.u32 1.1754944e-38, %v3736_v58  ;;  %v3317_v28 = vmul.f32 %v3316_v38, %v7045_v1 }
 0x333   : > { %v3729_v9 = vadd.f32 %v4446_v32, %v3728_v22  ;;  %v7068_v59 = vmul.f32 0.70710677, %v7058_v2  ;;  %v7071_v47 = vadd.f32 %v6857_v31, %v1781_v29  ;;  %v3272_v35 = vmul.f32 %v3271_v48, %v6975_v33 }
 0x334   : > { %v3762_v6 = vadd.f32 0.4994258, %v3761_v26  ;;  %v3307_v53 = vadd.f32 0.0036580483, %v3306_v15  ;;  %v3750_v11 = vmul.f32 %v3749_v54, %v7014_v17  ;;  %v3318_v50 = vadd.f32 0.014752088, %v3317_v28 }
 0x335   : > { %v3733_v8 = vsel %vm3732_vm7, %v4446_v32, %v3729_v9  ;;  %v3782_v23 = vmul.f32 %v7068_v59, %v7068_v59  ;;  %v1568_v12 = vadd.f32 %v6183_v21, %v5703_v43  ;;  %v1890_v14 = vmul.f32 0.5, %v6905_v45 }
 0x336   : > { %v3738_v3 = vsel %vm3735_vm6, %v3737_v30, %v3733_v8  ;;  %v3763_v4 = vmul.f32 %v3762_v6, %v7014_v17  ;;  %v3319_v33 = vmul.f32 %v3318_v50, %v7045_v1  ;;  %v7085_v44 = vmul.f32 0.70710677, %v7071_v47 }
 0x337   : > { %v3739_v55 = vmul.f32 %v3738_v3, %v3714_v46  ;;  %v4448_v49 = vpop.eup %4447  ;;  %v7082_v57 = vmin.f32 %v3782_v23, 16.0  ;;  %v3273_v62 = vadd.f32 1.1283791, %v3272_v35  ;;  %v3308_v43 = vmul.f32 %v3307_v53, %v7045_v1 }
 0x338   : > { %v3286_v32 = vmul.f32 %v4448_v49, %v7055_v60  ;;  %v3751_v21 = vadd.f32 0.18741608, %v3750_v11  ;;  %v7089_v16 = vadd.f32 1.0, %v3763_v4  ;;  %v3320_v41 = vadd.f32 0.112945676, %v3319_v33 }
 0x339   : > { %v4322_v51 = vclamps-f32 %v3739_v55, 1.0  ;;  %v1793_v40 = vadd.f32 %v1743_v61, %v1568_v12  ;;  %v3784_v5 = vmul.f32 2.1237322e-06, %v7082_v57  ;;  %v3342_v52 = vmul.f32 %v7085_v44, %v7085_v44 }
 0x33a   : > { %v3287_v45 = vsub.f32 1.0, %v3286_v32  ;;  %vm3291_vm8 = vweird.f32 %v4448_v49  ;;  %v3294_v58 = vand.u32 2147483647, %v7055_v60  ;;  %v3296_v0 = vand.u32 2147483648, %v7055_v60 }
 0x33b   : > { %v3906_v18 = vadd.f32 1.0, %v4322_v51  ;;  %4449 = vrcp.f32 %v7089_v16  ;;  %v3309_v10 = vadd.f32 0.05243302, %v3308_v43  ;;  %v3321_v37 = vmul.f32 %v3320_v41, %v7045_v1 }
 0x33c   : > { %v3288_v19 = vmul.f32 %v4448_v49, %v3287_v45  ;;  %v3274_v34 = vmul.f32 %v3273_v62, %v6965_v24  ;;  %vm3290_vm9 = vweird.f32 %v7055_v60  ;;  %v3785_v13 = vadd.f32 0.00028619796, %v3784_v5 }
 0x33d   : > { %v3954_v20 = vmul.f32 %v3906_v18, %v1890_v14  ;;  %v3795_v48 = vmul.f32 3.8918573e-05, %v7082_v57  ;;  %v3752_v39 = vmul.f32 %v3751_v21, %v7014_v17  ;;  %v3322_v29 = vadd.f32 0.4994258, %v3321_v37  ;;  %vm3292_vm10 = vmor %vm3290_vm9, %vm3291_vm8 }
 0x33e   : > { %v3289_v27 = vadd.f32 %v4448_v49, %v3288_v19  ;;  %v7103_v22 = vmin.f32 %v3342_v52, 16.0  ;;  %vm3295_vm11 = vcmp.eq.f32.partialorder %v3294_v58, 8.507059e+37  ;;  %v3297_v42 = vor.u32 1.1754944e-38, %v3296_v0 }
 0x33f   : > { %4002 = vst [vmem:[%s5141_s26 + $0x160] sm:$0xff] %v3954_v20  ;;  %v3786_v38 = vmul.f32 %v3785_v13, %v7082_v57  ;;  %v3796_v46 = vadd.f32 0.001143296, %v3795_v48  ;;  %v3310_v60 = vmul.f32 %v3309_v10, %v7045_v1  ;;  %v3323_v54 = vmul.f32 %v3322_v29, %v7045_v1 }
 0x340   : > { %v3293_v24 = vsel %vm3292_vm10, %v4448_v49, %v3289_v27  ;;  %v3344_v9 = vmul.f32 2.1237322e-06, %v7103_v22  ;;  %v3355_v30 = vmul.f32 3.8918573e-05, %v7103_v22  ;;  %v7113_v28 = vadd.f32 %v6857_v31, %v1793_v40 }
 0x341   : > { %v4450_v26 = vpop.eup %4449  ;;  %v3298_v15 = vsel %vm3295_vm11, %v3297_v42, %v3293_v24  ;;  %v3797_v17 = vmul.f32 %v3796_v46, %v7082_v57  ;;  %v3753_v35 = vadd.f32 1.1283791, %v3752_v39  ;;  %v3787_v53 = vadd.f32 0.0036580483, %v3786_v38 }
 0x342   : > { %v3299_v8 = vmul.f32 %v3298_v15, %v3274_v34  ;;  %v3766_v6 = vmul.f32 %v4450_v26, %v7089_v16  ;;  %v1879_v3 = vmul.f32 0.5, %v6950_v36  ;;  %v7117_v11 = vadd.f32 1.0, %v3323_v54 }
 0x343   : > { %v3798_v50 = vadd.f32 0.014752088, %v3797_v17  ;;  %v3345_v23 = vadd.f32 0.00028619796, %v3344_v9  ;;  %v3311_v4 = vadd.f32 0.18741608, %v3310_v60  ;;  %vm3771_vm0 = vweird.f32 %v4450_v26 }
 0x344   : > { %v4311_v12 = vclamps-f32 %v3299_v8, 1.0  ;;  %v3767_v55 = vsub.f32 1.0, %v3766_v6  ;;  %v3356_v61 = vadd.f32 0.001143296, %v3355_v30  ;;  %v3774_v49 = vand.u32 2147483647, %v7089_v16 }
 0x345   : > { %v3776_v31 = vand.u32 2147483648, %v7089_v16  ;;  %4451 = vrcp.f32 %v7117_v11  ;;  %v7123_v14 = vmul.f32 0.70710677, %v7113_v28  ;;  %v3799_v36 = vmul.f32 %v3798_v50, %v7082_v57 }
 0x346   : > { %v3895_v33 = vadd.f32 1.0, %v4311_v12  ;;  %v3768_v51 = vmul.f32 %v4450_v26, %v3767_v55  ;;  %vm3770_vm12 = vweird.f32 %v7089_v16  ;;  %v3788_v62 = vmul.f32 %v3787_v53, %v7082_v57 }
 0x347   : > { %v3346_v32 = vmul.f32 %v3345_v23, %v7103_v22  ;;  %v3357_v43 = vmul.f32 %v3356_v61, %v7103_v22  ;;  %v3312_v40 = vmul.f32 %v3311_v4, %v7045_v1  ;;  %v3800_v18 = vadd.f32 0.112945676, %v3799_v36  ;;  %vm3772_vm2 = vmor %vm3770_vm12, %vm3771_vm0 }
 0x348   : > { %v3943_v21 = vmul.f32 %v3895_v33, %v1879_v3  ;;  %v3769_v41 = vadd.f32 %v4450_v26, %v3768_v51  ;;  %v3754_v45 = vmul.f32 %v3753_v35, %v6999_v7  ;;  %v3777_v5 = vor.u32 1.1754944e-38, %v3776_v31 }
 0x349   : > { %v3358_v52 = vadd.f32 0.014752088, %v3357_v43  ;;  %v3822_v58 = vmul.f32 %v7123_v14, %v7123_v14  ;;  %vm3775_vm13 = vcmp.eq.f32.partialorder %v3774_v49, 8.507059e+37  ;;  %v3801_v0 = vmul.f32 %v3800_v18, %v7082_v57 }
 0x34a   : > { %3991 = vst [vmem:[%s5141_s26 + $0x108] sm:$0xff] %v3943_v21  ;;  %v3773_v16 = vsel %vm3772_vm2, %v4450_v26, %v3769_v41  ;;  %v3347_v20 = vadd.f32 0.0036580483, %v3346_v32  ;;  %v3789_v37 = vadd.f32 0.05243302, %v3788_v62  ;;  %v1891_v39 = vmul.f32 0.5, %v6990_v25 }
 0x34b   : > { %v4452_v19 = vpop.eup %4451  ;;  %v3778_v10 = vsel %vm3775_vm13, %v3777_v5, %v3773_v16  ;;  %v3359_v1 = vmul.f32 %v3358_v52, %v7103_v22  ;;  %v7137_v34 = vmin.f32 %v3822_v58, 16.0  ;;  %v3313_v13 = vadd.f32 1.1283791, %v3312_v40 }
 0x34c   : > { %v3779_v7 = vmul.f32 %v3778_v10, %v3754_v45  ;;  %v3326_v48 = vmul.f32 %v4452_v19, %v7117_v11  ;;  %v3334_v27 = vand.u32 2147483647, %v7117_v11  ;;  %v3336_v29 = vand.u32 2147483648, %v7117_v11 }
 0x34d   : > { %v3802_v42 = vadd.f32 0.4994258, %v3801_v0  ;;  %v3360_v38 = vadd.f32 0.112945676, %v3359_v1  ;;  %v3348_v60 = vmul.f32 %v3347_v20, %v7103_v22  ;;  %v3824_v54 = vmul.f32 2.1237322e-06, %v7137_v34 }
 0x34e   : > { %v4323_v46 = vclamps-f32 %v3779_v7, 1.0  ;;  %v3327_v24 = vsub.f32 1.0, %v3326_v48  ;;  %v3790_v9 = vmul.f32 %v3789_v37, %v7082_v57  ;;  %v3835_v17 = vmul.f32 3.8918573e-05, %v7137_v34 }
 0x34f   : > { %v3803_v26 = vmul.f32 %v3802_v42, %v7082_v57  ;;  %v3361_v15 = vmul.f32 %v3360_v38, %v7103_v22  ;;  %vm3331_vm3 = vweird.f32 %v4452_v19  ;;  %v3825_v8 = vadd.f32 0.00028619796, %v3824_v54 }
 0x350   : > { %v3907_v30 = vadd.f32 1.0, %v4323_v46  ;;  %v3328_v25 = vmul.f32 %v4452_v19, %v3327_v24  ;;  %vm3330_vm14 = vweird.f32 %v7117_v11  ;;  %v3349_v50 = vadd.f32 0.05243302, %v3348_v60 }
 0x351   : > { %v3804_v35 = vadd.f32 1.0, %v3803_v26  ;;  %v3362_v6 = vadd.f32 0.4994258, %v3361_v15  ;;  %v3836_v23 = vadd.f32 0.001143296, %v3835_v17  ;;  %v3314_v12 = vmul.f32 %v3313_v13, %v7032_v56  ;;  %vm3332_vm15 = vmor %vm3330_vm14, %vm3331_vm3 }
 0x352   : > { %v3955_v53 = vmul.f32 %v3907_v30, %v1891_v39  ;;  %v3329_v3 = vadd.f32 %v4452_v19, %v3328_v25  ;;  %vm3335_vm1 = vcmp.eq.f32.partialorder %v3334_v27, 8.507059e+37  ;;  %v3337_v55 = vor.u32 1.1754944e-38, %v3336_v29 }
 0x353   : > { %4453 = vrcp.f32 %v3804_v35  ;;  %v3791_v61 = vadd.f32 0.18741608, %v3790_v9  ;;  %v3363_v49 = vmul.f32 %v3362_v6, %v7103_v22  ;;  %v3826_v31 = vmul.f32 %v3825_v8, %v7137_v34 }
 0x354   : > { %4003 = vst [vmem:[%s5141_s26 + $0x168] sm:$0xff] %v3955_v53  ;;  %v3333_v4 = vsel %vm3332_vm15, %v4452_v19, %v3329_v3  ;;  %v3837_v33 = vmul.f32 %v3836_v23, %v7137_v34  ;;  %v3350_v36 = vmul.f32 %v3349_v50, %v7103_v22  ;;  %v1880_v18 = vmul.f32 0.5, %v7011_v63 }
 0x355   : > { %v3338_v11 = vsel %vm3335_vm1, %v3337_v55, %v3333_v4  ;;  %v3364_v62 = vadd.f32 1.0, %v3363_v49  ;;  %v3792_v43 = vmul.f32 %v3791_v61, %v7082_v57  ;;  %v3827_v21 = vadd.f32 0.0036580483, %v3826_v31 }
 0x356   : > { %v3339_v51 = vmul.f32 %v3338_v11, %v3314_v12  ;;  %v3838_v32 = vadd.f32 0.014752088, %v3837_v33  ;;  %v3351_v52 = vadd.f32 0.18741608, %v3350_v36  ;;  %v3814_v10 = vand.u32 2147483647, %v3804_v35 }
 0x357   : > { %4455 = vrcp.f32 %v3364_v62  ;;  %v3793_v0 = vadd.f32 1.1283791, %v3792_v43  ;;  %v3828_v19 = vmul.f32 %v3827_v21, %v7137_v34  ;;  %v3816_v37 = vand.u32 2147483648, %v3804_v35 }
 0x358   : > { %v4312_v56 = vclamps-f32 %v3339_v51, 1.0  ;;  %v3839_v40 = vmul.f32 %v3838_v32, %v7137_v34  ;;  %v3352_v13 = vmul.f32 %v3351_v52, %v7103_v22  ;;  %vm3810_vm5 = vweird.f32 %v3804_v35 }
 0x359   : > { %v4454_v41 = vpop.eup %4453  ;;  %v3794_v27 = vmul.f32 %v3793_v0, %v7068_v59  ;;  %v3829_v29 = vadd.f32 0.05243302, %v3828_v19  ;;  %vm3815_vm7 = vcmp.eq.f32.partialorder %v3814_v10, 8.507059e+37  ;;  %v3817_v42 = vor.u32 1.1754944e-38, %v3816_v37 }
 0x35a   : > { %v3896_v45 = vadd.f32 1.0, %v4312_v56  ;;  %v3806_v5 = vmul.f32 %v4454_v41, %v3804_v35  ;;  %v3840_v58 = vadd.f32 0.112945676, %v3839_v40  ;;  %vm3811_vm4 = vweird.f32 %v4454_v41 }
 0x35b   : > { %vm3812_vm6 = vmor %vm3810_vm5, %vm3811_vm4  ;;  %v3353_v60 = vadd.f32 1.1283791, %v3352_v13  ;;  %v3374_v54 = vand.u32 2147483647, %v3364_v62  ;;  %v3376_v9 = vand.u32 2147483648, %v3364_v62  ;;  %v3830_v59 = vmul.f32 %v3829_v29, %v7137_v34 }
 0x35c   : > { %v3944_v16 = vmul.f32 %v3896_v45, %v1880_v18  ;;  %v3807_v20 = vsub.f32 1.0, %v3806_v5  ;;  %v3841_v57 = vmul.f32 %v3840_v58, %v7137_v34  ;;  %vm3370_vm9 = vweird.f32 %v3364_v62 }
 0x35d   : > { %v4456_v1 = vpop.eup %4455  ;;  %v3377_v8 = vor.u32 1.1754944e-38, %v3376_v9  ;;  %v3354_v35 = vmul.f32 %v3353_v60, %v7085_v44  ;;  %vm3375_vm11 = vcmp.eq.f32.partialorder %v3374_v54, 8.507059e+37  ;;  %v1892_v53 = vmul.f32 0.5, %v7058_v2 }
 0x35e   : > { %3992 = vst [vmem:[%s5141_s26 + $0x110] sm:$0xff] %v3944_v16  ;;  %v3808_v7 = vmul.f32 %v4454_v41, %v3807_v20  ;;  %v3366_v63 = vmul.f32 %v4456_v1, %v3364_v62  ;;  %v3842_v48 = vadd.f32 0.4994258, %v3841_v57  ;;  %vm3371_vm8 = vweird.f32 %v4456_v1 }
 0x35f   : > { %vm3372_vm10 = vmor %vm3370_vm9, %vm3371_vm8  ;;  %v3831_v23 = vadd.f32 0.18741608, %v3830_v59  ;;  %v1881_v11 = vmul.f32 0.5, %v7071_v47  ;;  %v1893_v18 = vmul.f32 0.5, %v7113_v28 }
 0x360   : > { %v3809_v39 = vadd.f32 %v4454_v41, %v3808_v7  ;;  %v3367_v38 = vsub.f32 1.0, %v3366_v63  ;;  %v3843_v46 = vmul.f32 %v3842_v48, %v7137_v34 }
 0x361   : > { %v3832_v49 = vmul.f32 %v3831_v23, %v7137_v34 }
 0x362   : > { %v3813_v24 = vsel %vm3812_vm6, %v4454_v41, %v3809_v39  ;;  %v3368_v15 = vmul.f32 %v4456_v1, %v3367_v38  ;;  %v3844_v22 = vadd.f32 1.0, %v3843_v46 }
 0x363   : > { %v3818_v26 = vsel %vm3815_vm7, %v3817_v42, %v3813_v24  ;;  %v3833_v62 = vadd.f32 1.1283791, %v3832_v49 }
 0x364   : > { %v3819_v17 = vmul.f32 %v3818_v26, %v3794_v27  ;;  %v3369_v30 = vadd.f32 %v4456_v1, %v3368_v15  ;;  %4457 = vrcp.f32 %v3844_v22  ;;  %v3856_v36 = vand.u32 2147483648, %v3844_v22 }
 0x365   : > { %v3854_v32 = vand.u32 2147483647, %v3844_v22  ;;  %vm3850_vm12 = vweird.f32 %v3844_v22  ;;  %v3834_v21 = vmul.f32 %v3833_v62, %v7123_v14 }
 0x366   : > { %v4324_v25 = vclamps-f32 %v3819_v17, 1.0  ;;  %v3373_v6 = vsel %vm3372_vm10, %v4456_v1, %v3369_v30  ;;  %v3857_v43 = vor.u32 1.1754944e-38, %v3856_v36 }
 0x367   : > { %v3378_v50 = vsel %vm3375_vm11, %v3377_v8, %v3373_v6  ;;  %vm3855_vm13 = vcmp.eq.f32.partialorder %v3854_v32, 8.507059e+37 }
 0x368   : > { %v3908_v3 = vadd.f32 1.0, %v4324_v25  ;;  %v3379_v12 = vmul.f32 %v3378_v50, %v3354_v35 }
 0x36a   : > { %v3956_v55 = vmul.f32 %v3908_v3, %v1892_v53  ;;  %v4458_v4 = vpop.eup %4457  ;;  %v4313_v61 = vclamps-f32 %v3379_v12, 1.0 }
 0x36b   : > { %v3846_v31 = vmul.f32 %v4458_v4, %v3844_v22  ;;  %vm3851_vm0 = vweird.f32 %v4458_v4 }
 0x36c   : > { %4004 = vst [vmem:[%s5141_s26 + $0x170] sm:$0xff] %v3956_v55  ;;  %v3897_v33 = vadd.f32 1.0, %v4313_v61  ;;  %vm3852_vm2 = vmor %vm3850_vm12, %vm3851_vm0 }
 0x36d   : > { %v3847_v44 = vsub.f32 1.0, %v3846_v31 }
 0x36e   : > { %v3945_v51 = vmul.f32 %v3897_v33, %v1881_v11 }
 0x36f   : > { %v3848_v2 = vmul.f32 %v4458_v4, %v3847_v44 }
 0x370   : > { %3993 = vst [vmem:[%s5141_s26 + $0x118] sm:$0xff] %v3945_v51 }
 0x371   : > { %v3849_v56 = vadd.f32 %v4458_v4, %v3848_v2 }
 0x373   : > { %v3853_v34 = vsel %vm3852_vm2, %v4458_v4, %v3849_v56 }
 0x374   : > { %v3858_v41 = vsel %vm3855_vm13, %v3857_v43, %v3853_v34 }
 0x375   : > { %v3859_v47 = vmul.f32 %v3858_v41, %v3834_v21 }
 0x377   : > { %v4325_v40 = vclamps-f32 %v3859_v47, 1.0 }
 0x379   : > { %v3909_v45 = vadd.f32 1.0, %v4325_v40 }
 0x37b   : > { %v3957_v5 = vmul.f32 %v3909_v45, %v1893_v18 }
 0x37d   : > { %4005 = vst [vmem:[%s5141_s26 + $0x178] sm:$0xff] %v3957_v5 }
 0x37e PF: > { %s14_s17 = sadd.s32 1, %s4485_s17   ;;  %s7233_s15 = smov %s4481_s16 }
 0x37f   : > { %p11_p5 = scmp.ge.s32.totalorder %s14_s17, 4   ;;  %s7234_s16 = smov %s7236_s18 }
 0x381   :  { %13 = sbr.rel (!%p11_p5) target bundleno = 2 (0x2), region = 71 }

</bundles_post_ra>
